<compile_context>
chip_gen: v7x
topology: tpu7x:2x2x1
jax: 0.10.0
libtpu: 0.0.40
codegen_flags: <defaults>
</compile_context>

<pallas_src>
import functools

import jax
import jax.numpy as jnp
import numpy as np
from jax import lax
from jax.experimental import pallas as pl
from jax.experimental.pallas import tpu as pltpu

NUM_REPLICATES = 10


# ----------------------------------------------------------------------------
# Fused kernel: 2-layer LSTM -> SDN decoder -> (optional) E_SINDy rollout
# ----------------------------------------------------------------------------
def shred_kernel(*refs, sindy, dt, n_rollout):
    if sindy:
        (x_ref, wih0_ref, whh0_ref, b0_ref, w1_ref, b1_ref,
         dw1_ref, db1_ref, dw2_ref, db2_ref, dw3_ref, db3_ref,
         cbd_ref, cconst_ref,
         out_ref, hrep_ref, srep_ref) = refs
    else:
        (x_ref, wih0_ref, whh0_ref, b0_ref, w1_ref, b1_ref,
         dw1_ref, db1_ref, dw2_ref, db2_ref, dw3_ref, db3_ref,
         out_ref) = refs

    L, B, I = x_ref.shape
    H = whh0_ref.shape[0]
    G = 4 * H
    HP = lax.Precision.HIGHEST   # Mosaic dot lowering supports DEFAULT/HIGHEST

    # ---------------- 2-layer LSTM (PyTorch gate order i, f, g, o) -----------
    # Hoisted layer-0 input projection: one (L*B, I) @ (I, 4H) matmul + bias,
    # done once before the recurrence.
    xg_all = (jnp.dot(x_ref[...].reshape(L * B, I), wih0_ref[...],
                      precision=HP, preferred_element_type=jnp.float32)
              + b0_ref[...]).reshape(L, B, G)
    whh0 = whh0_ref[...]
    w1 = w1_ref[...]                                              # (2H, 4H)
    b1 = jnp.broadcast_to(b1_ref[...], (B, G))                    # hoisted

    def gate(pre, c_prev):
        # i/f/o columns of the weights were pre-scaled by 0.5 in the wrapper:
        #   sigmoid(x) = 0.5 * tanh(0.5 * x) + 0.5
        # so ONE whole-tile tanh covers all four gates (single EUP pass).
        t = jnp.tanh(pre)
        i = 0.5 * t[:, 0:H] + 0.5
        f = 0.5 * t[:, H:2 * H] + 0.5
        o = 0.5 * t[:, 3 * H:4 * H] + 0.5
        g = t[:, 2 * H:3 * H]
        c_new = f * c_prev + i * g
        h_new = o * jnp.tanh(c_new)
        return h_new, c_new

    zeros = jnp.zeros((B, H), jnp.float32)
    h0, c0, h1, c1 = zeros, zeros, zeros, zeros
    for t in range(L):                       # fully unrolled (L static & small)
        pre0 = xg_all[t] + jnp.dot(h0, whh0, precision=HP,
                                   preferred_element_type=jnp.float32)
        h0, c0 = gate(pre0, c0)
        # One stacked K=2H dot: [h0, h1] @ [[Wih1]; [Whh1]]
        pre1 = (jnp.dot(jnp.concatenate([h0, h1], axis=1), w1, precision=HP,
                        preferred_element_type=jnp.float32) + b1)
        h1, c1 = gate(pre1, c1)

    # ---------------- SDN decoder (dropout == identity in eval) --------------
    z = jnp.maximum(jnp.dot(h1, dw1_ref[...], precision=HP,
                            preferred_element_type=jnp.float32) + db1_ref[...],
                    0.0)
    z = jnp.maximum(jnp.dot(z, dw2_ref[...], precision=HP,
                            preferred_element_type=jnp.float32) + db2_ref[...],
                    0.0)
    out_ref[...] = (jnp.dot(z, dw3_ref[...], precision=HP,
                            preferred_element_type=jnp.float32) + db3_ref[...])

    # ---------------- E_SINDy replicate rollout (optional) -------------------
    if sindy:
        N = B - 1
        RH = cbd_ref.shape[1]                                     # R * H
        R = RH // H

        # h_out[1:] replicated -> single lane-dense (N, R*H) store.
        h_tail = h1[1:, :]                                        # (N, H)
        hrep_ref[...] = jnp.concatenate([h_tail] * R, axis=1)     # (N, R*H)

        # poly_order=1 library: dz = c_const + h @ C_blockdiag.
        # Lane-dense state (N, R*H); weight is loop-invariant bf16 (cast
        # hoisted to the wrapper); only h is cast per step.
        cbd = cbd_ref[...]                                        # bf16
        c_const = jnp.broadcast_to(cconst_ref[...], (N, RH))      # hoisted
        h = jnp.concatenate([h1[:N, :]] * R, axis=1)              # (N, R*H) f32
        for _ in range(n_rollout):                                # unrolled
            dz = c_const + jnp.dot(h.astype(jnp.bfloat16), cbd,
                                   preferred_element_type=jnp.float32)
            h = h + dz * dt
        srep_ref[...] = h                                         # one store


# ----------------------------------------------------------------------------
# Wrapper (single pallas_call, jitted so residual XLA glue / param prep fuses)
# ----------------------------------------------------------------------------
_VMEM = pl.BlockSpec(memory_space=pltpu.MemorySpace.VMEM)


def _prep_lstm_params(p):
    """Fold the sigmoid->tanh 0.5 rescale into the i/f/o gate columns and
    pre-stack the layer-1 weights (all loop-invariant, runs inside the jit)."""
    H = p["whh0"].shape[0]
    half = jnp.full((1, H), 0.5, jnp.float32)
    one = jnp.ones((1, H), jnp.float32)
    gate_scale = jnp.concatenate([half, half, one, half], axis=1)   # (1, 4H)
    w1 = jnp.concatenate([p["wih1"], p["whh1"]], axis=0)            # (2H, 4H)
    return (p["wih0"] * gate_scale, p["whh0"] * gate_scale,
            p["b0"] * gate_scale, w1 * gate_scale, p["b1"] * gate_scale)


@functools.partial(jax.jit, static_argnames=("sindy", "dt"))
def shred_forward(x, p, sindy=False, dt=0.01):
    """SHRED.forward: LSTM -> SDN (+ optional E_SINDy replicate rollout)."""
    B, L, I = x.shape
    H = p["whh0"].shape[0]
    out_size = p["dw3"].shape[1]
    xt = jnp.transpose(x, (1, 0, 2))        # (L, B, I): time-major recurrence

    wih0s, whh0s, b0s, w1s, b1s = _prep_lstm_params(p)
    lstm_sdn_args = (xt, wih0s, whh0s, b0s, w1s, b1s,
                     p["dw1"], p["db1"], p["dw2"], p["db2"],
                     p["dw3"], p["db3"])

    if not sindy:
        kern = functools.partial(shred_kernel, sindy=False, dt=dt, n_rollout=10)
        return pl.pallas_call(
            kern,
            out_shape=jax.ShapeDtypeStruct((B, out_size), jnp.float32),
            in_specs=[_VMEM] * len(lstm_sdn_args),
            out_specs=_VMEM,
        )(*lstm_sdn_args)

    # --- SINDy parameter prep (wrapper-side, XLA-fused) -----------------------
    # Effective coefficients, split into constant row + block-diagonal linear
    # map over the lane-dense (R*H) state; weight cast to bf16 once here.
    R = p["sindy_coeff"].shape[0]
    ce = p["sindy_coeff"] * p["sindy_mask"]              # (R, 1+H, H)
    c_const = ce[:, 0, :].reshape(1, R * H)              # (1, R*H)
    c_lin = ce[:, 1:, :]                                 # (R, H, H)
    eye_r = jnp.eye(R, dtype=jnp.float32)                # (R, R)
    c_bd = (eye_r[:, None, :, None] * c_lin[:, :, None, :]).reshape(R * H, R * H)
    c_bd_bf16 = c_bd.astype(jnp.bfloat16)                # loop-invariant cast

    kern = functools.partial(shred_kernel, sindy=True, dt=dt, n_rollout=10)
    out, hrep_flat, srep_flat = pl.pallas_call(
        kern,
        out_shape=(jax.ShapeDtypeStruct((B, out_size), jnp.float32),
                   jax.ShapeDtypeStruct((B - 1, R * H), jnp.float32),
                   jax.ShapeDtypeStruct((B - 1, R * H), jnp.float32)),
        in_specs=[_VMEM] * (len(lstm_sdn_args) + 2),
        out_specs=(_VMEM, _VMEM, _VMEM),
    )(*lstm_sdn_args, c_bd_bf16, c_const)
    # Metadata-only reshapes back to the torch (num_data-1, R, H) layout.
    h_out_replicates = hrep_flat.reshape(B - 1, R, H)
    ht_replicates = srep_flat.reshape(B - 1, R, H)
    return out, h_out_replicates, ht_replicates


# ----------------------------------------------------------------------------
# Pure-JAX reference (for correctness checking only)
# ----------------------------------------------------------------------------
def _lstm_ref(x, p):
    B, L, _ = x.shape
    H = p["whh0"].shape[0]

    def cell(x_t, h, c, wih, whh, b):
        g = x_t @ wih + h @ whh + b
        i = jax.nn.sigmoid(g[:, :H])
        f = jax.nn.sigmoid(g[:, H:2 * H])
        gg = jnp.tanh(g[:, 2 * H:3 * H])
        o = jax.nn.sigmoid(g[:, 3 * H:])
        c = f * c + i * gg
        return o * jnp.tanh(c), c

    h0 = c0 = h1 = c1 = jnp.zeros((B, H), jnp.float32)
    for t in range(L):
        h0, c0 = cell(x[:, t], h0, c0, p["wih0"], p["whh0"], p["b0"])
        h1, c1 = cell(h0, h1, c1, p["wih1"], p["whh1"], p["b1"])
    return h1


def _sdn_ref(h, p):
    z = jnp.maximum(h @ p["dw1"] + p["db1"], 0.0)
    z = jnp.maximum(z @ p["dw2"] + p["db2"], 0.0)
    return z @ p["dw3"] + p["db3"]


def _esindy_ref(h_t, coeff_eff, dt, n_steps):
    N, D = h_t.shape
    R = coeff_eff.shape[0]
    h = jnp.broadcast_to(h_t[:, None, :], (N, R, D))
    for _ in range(n_steps):
        flat = h.reshape(N * R, D)
        theta = jnp.concatenate([jnp.ones((N * R, 1), jnp.float32), flat],
                                axis=1).reshape(N, R, D + 1)
        h = h + jnp.einsum("ijk,jkl->ijl", theta, coeff_eff) * dt
    return h


# ----------------------------------------------------------------------------
# Parameter construction (deterministic, synthetic)
# ----------------------------------------------------------------------------
def init_params(key, input_size, hidden, l1, l2, out_size, n_rep):
    ks = jax.random.split(key, 12)
    k = 1.0 / np.sqrt(hidden)
    u = lambda kk, shape, b: jax.random.uniform(kk, shape, jnp.float32, -b, b)
    p = {
        "wih0": u(ks[0], (input_size, 4 * hidden), k),
        "whh0": u(ks[1], (hidden, 4 * hidden), k),
        "b0":   u(ks[2], (1, 4 * hidden), k),
        "wih1": u(ks[3], (hidden, 4 * hidden), k),
        "whh1": u(ks[4], (hidden, 4 * hidden), k),
        "b1":   u(ks[5], (1, 4 * hidden), k),
        "dw1":  u(ks[6], (hidden, l1), 1.0 / np.sqrt(hidden)),
        "db1":  jnp.zeros((1, l1), jnp.float32),
        "dw2":  u(ks[7], (l1, l2), 1.0 / np.sqrt(l1)),
        "db2":  jnp.zeros((1, l2), jnp.float32),
        "dw3":  u(ks[8], (l2, out_size), 1.0 / np.sqrt(l2)),
        "db3":  jnp.zeros((1, out_size), jnp.float32),
        # E_SINDy: coefficients ~ N(0, 0.001), mask = ones (poly_order=1 library)
        "sindy_coeff": 0.001 * jax.random.normal(ks[9], (n_rep, hidden + 1, hidden),
                                                 jnp.float32),
        "sindy_mask": jnp.ones((n_rep, hidden + 1, hidden), jnp.float32),
    }
    return p


# ----------------------------------------------------------------------------
# Main
# ----------------------------------------------------------------------------
if __name__ == "__main__":
    num_data = 8      # "batch" axis of SHRED (time samples)
    lags = 6
    num_sensors = 8   # input_size
    hidden = 32       # LSTM hidden_size == SINDy latent_dim
    l1, l2 = 64, 64   # SDN hidden widths
    out_size = 40     # reconstructed state dimension
    dt = 0.01

    key = jax.random.PRNGKey(0)
    kx, kp = jax.random.split(key)
    x = jax.random.normal(kx, (num_data, lags, num_sensors), jnp.float32)
    params = init_params(kp, num_sensors, hidden, l1, l2, out_size, NUM_REPLICATES)

    # --- plain forward (sindy=False) ---
    out = shred_forward(x, params, sindy=False, dt=dt)
    out = jax.block_until_ready(out)

    # --- sindy forward: (output, h_gru_replicates, h_sindy_replicates) ---
    out_s, h_gru_rep, h_sindy_rep = shred_forward(x, params, sindy=True, dt=dt)
    jax.block_until_ready((out_s, h_gru_rep, h_sindy_rep))

    # --- correctness vs. pure-JAX reference (f32 matmuls as ground truth) ---
    with jax.default_matmul_precision("highest"):
        h_ref = _lstm_ref(x, params)
        out_ref = _sdn_ref(h_ref, params)
        sindy_ref = _esindy_ref(h_ref[:-1, :],
                                params["sindy_coeff"] * params["sindy_mask"],
                                dt, 10)
        jax.block_until_ready((h_ref, out_ref, sindy_ref))

    np.testing.assert_allclose(np.asarray(out), np.asarray(out_ref),
                               rtol=1e-3, atol=1e-3)
    np.testing.assert_allclose(np.asarray(out_s), np.asarray(out_ref),
                               rtol=1e-3, atol=1e-3)
    np.testing.assert_allclose(np.asarray(h_sindy_rep), np.asarray(sindy_ref),
                               rtol=1e-3, atol=1e-3)
    np.testing.assert_allclose(
        np.asarray(h_gru_rep),
        np.asarray(jnp.repeat(h_ref[1:, :][:, None, :], NUM_REPLICATES, axis=1)),
        rtol=1e-3, atol=1e-3)

    print("KERNEL_OK")
</pallas_src>

<mosaic_0001>
module attributes {stable_mosaic.version = 11 : i64} {
  func.func @shred_kernel(%arg0: memref<6x8x8xf32, #tpu.memory_space<vmem>>, %arg1: memref<8x128xf32, #tpu.memory_space<vmem>>, %arg2: memref<32x128xf32, #tpu.memory_space<vmem>>, %arg3: memref<1x128xf32, #tpu.memory_space<vmem>>, %arg4: memref<64x128xf32, #tpu.memory_space<vmem>>, %arg5: memref<1x128xf32, #tpu.memory_space<vmem>>, %arg6: memref<32x64xf32, #tpu.memory_space<vmem>>, %arg7: memref<1x64xf32, #tpu.memory_space<vmem>>, %arg8: memref<64x64xf32, #tpu.memory_space<vmem>>, %arg9: memref<1x64xf32, #tpu.memory_space<vmem>>, %arg10: memref<64x40xf32, #tpu.memory_space<vmem>>, %arg11: memref<1x40xf32, #tpu.memory_space<vmem>>, %arg12: memref<8x40xf32, #tpu.memory_space<vmem>>) attributes {dimension_semantics = [], scalar_prefetch = 0 : i64, scratch_operands = 0 : i64, tpu.core_type = #tpu.core_type<tc>} {
    %c0 = arith.constant 0 : index
    %c0_0 = arith.constant 0 : index
    %c0_1 = arith.constant 0 : index
    %0 = vector.load %arg0[%c0, %c0_0, %c0_1] : memref<6x8x8xf32, #tpu.memory_space<vmem>>, vector<6x8x8xf32>
    %1 = vector.shape_cast %0 : vector<6x8x8xf32> to vector<48x8xf32>
    %c0_2 = arith.constant 0 : index
    %c0_3 = arith.constant 0 : index
    %2 = vector.load %arg1[%c0_2, %c0_3] : memref<8x128xf32, #tpu.memory_space<vmem>>, vector<8x128xf32>
    %cst = arith.constant dense<0.000000e+00> : vector<48x128xf32>
    %3 = tpu.matmul %1, %2, %cst {dimension_numbers = #tpu.dot_dimension_numbers<[1], [0], [0], [1], [0, 0, 1, 1], [], []>, precision = #tpu.contract_precision<fp32>} : vector<48x8xf32>, vector<8x128xf32>, vector<48x128xf32> -> vector<48x128xf32>
    %c0_4 = arith.constant 0 : index
    %c0_5 = arith.constant 0 : index
    %4 = vector.load %arg3[%c0_4, %c0_5] : memref<1x128xf32, #tpu.memory_space<vmem>>, vector<1x128xf32>
    %5 = vector.broadcast %4 : vector<1x128xf32> to vector<48x128xf32>
    %6 = arith.addf %3, %5 : vector<48x128xf32>
    %7 = vector.shape_cast %6 : vector<48x128xf32> to vector<6x8x128xf32>
    %c0_6 = arith.constant 0 : index
    %c0_7 = arith.constant 0 : index
    %8 = vector.load %arg2[%c0_6, %c0_7] : memref<32x128xf32, #tpu.memory_space<vmem>>, vector<32x128xf32>
    %c0_8 = arith.constant 0 : index
    %c0_9 = arith.constant 0 : index
    %9 = vector.load %arg4[%c0_8, %c0_9] : memref<64x128xf32, #tpu.memory_space<vmem>>, vector<64x128xf32>
    %c0_10 = arith.constant 0 : index
    %c0_11 = arith.constant 0 : index
    %10 = vector.load %arg5[%c0_10, %c0_11] : memref<1x128xf32, #tpu.memory_space<vmem>>, vector<1x128xf32>
    %11 = vector.shape_cast %10 : vector<1x128xf32> to vector<1x128xf32>
    %12 = vector.broadcast %11 : vector<1x128xf32> to vector<8x128xf32>
    %cst_12 = arith.constant 0.000000e+00 : f32
    %13 = vector.broadcast %cst_12 : f32 to vector<8x32xf32>
    %14 = vector.extract_strided_slice %7 {offsets = [0, 0, 0], sizes = [1, 8, 128], strides = [1, 1, 1]} : vector<6x8x128xf32> to vector<1x8x128xf32>
    %15 = vector.shape_cast %14 : vector<1x8x128xf32> to vector<8x128xf32>
    %cst_13 = arith.constant dense<0.000000e+00> : vector<8x128xf32>
    %16 = tpu.matmul %13, %8, %cst_13 {dimension_numbers = #tpu.dot_dimension_numbers<[1], [0], [0], [1], [0, 0, 1, 1], [], []>, precision = #tpu.contract_precision<fp32>} : vector<8x32xf32>, vector<32x128xf32>, vector<8x128xf32> -> vector<8x128xf32>
    %17 = arith.addf %15, %16 : vector<8x128xf32>
    %18 = math.tanh %17 : vector<8x128xf32>
    %19 = vector.extract_strided_slice %18 {offsets = [0, 0], sizes = [8, 32], strides = [1, 1]} : vector<8x128xf32> to vector<8x32xf32>
    %cst_14 = arith.constant 5.000000e-01 : f32
    %20 = vector.broadcast %cst_14 : f32 to vector<8x32xf32>
    %21 = arith.mulf %20, %19 : vector<8x32xf32>
    %cst_15 = arith.constant 5.000000e-01 : f32
    %22 = vector.broadcast %cst_15 : f32 to vector<8x32xf32>
    %23 = arith.addf %21, %22 : vector<8x32xf32>
    %24 = vector.extract_strided_slice %18 {offsets = [0, 32], sizes = [8, 32], strides = [1, 1]} : vector<8x128xf32> to vector<8x32xf32>
    %cst_16 = arith.constant 5.000000e-01 : f32
    %25 = vector.broadcast %cst_16 : f32 to vector<8x32xf32>
    %26 = arith.mulf %25, %24 : vector<8x32xf32>
    %cst_17 = arith.constant 5.000000e-01 : f32
    %27 = vector.broadcast %cst_17 : f32 to vector<8x32xf32>
    %28 = arith.addf %26, %27 : vector<8x32xf32>
    %29 = vector.extract_strided_slice %18 {offsets = [0, 96], sizes = [8, 32], strides = [1, 1]} : vector<8x128xf32> to vector<8x32xf32>
    %cst_18 = arith.constant 5.000000e-01 : f32
    %30 = vector.broadcast %cst_18 : f32 to vector<8x32xf32>
    %31 = arith.mulf %30, %29 : vector<8x32xf32>
    %cst_19 = arith.constant 5.000000e-01 : f32
    %32 = vector.broadcast %cst_19 : f32 to vector<8x32xf32>
    %33 = arith.addf %31, %32 : vector<8x32xf32>
    %34 = vector.extract_strided_slice %18 {offsets = [0, 64], sizes = [8, 32], strides = [1, 1]} : vector<8x128xf32> to vector<8x32xf32>
    %35 = arith.mulf %28, %13 : vector<8x32xf32>
    %36 = arith.mulf %23, %34 : vector<8x32xf32>
    %37 = arith.addf %35, %36 : vector<8x32xf32>
    %38 = math.tanh %37 : vector<8x32xf32>
    %39 = arith.mulf %33, %38 : vector<8x32xf32>
    %40 = tpu.concatenate %39, %13 in 1 : vector<8x32xf32>, vector<8x32xf32> -> vector<8x64xf32>
    %cst_20 = arith.constant dense<0.000000e+00> : vector<8x128xf32>
    %41 = tpu.matmul %40, %9, %cst_20 {dimension_numbers = #tpu.dot_dimension_numbers<[1], [0], [0], [1], [0, 0, 1, 1], [], []>, precision = #tpu.contract_precision<fp32>} : vector<8x64xf32>, vector<64x128xf32>, vector<8x128xf32> -> vector<8x128xf32>
    %42 = arith.addf %41, %12 : vector<8x128xf32>
    %43 = math.tanh %42 : vector<8x128xf32>
    %44 = vector.extract_strided_slice %43 {offsets = [0, 0], sizes = [8, 32], strides = [1, 1]} : vector<8x128xf32> to vector<8x32xf32>
    %cst_21 = arith.constant 5.000000e-01 : f32
    %45 = vector.broadcast %cst_21 : f32 to vector<8x32xf32>
    %46 = arith.mulf %45, %44 : vector<8x32xf32>
    %cst_22 = arith.constant 5.000000e-01 : f32
    %47 = vector.broadcast %cst_22 : f32 to vector<8x32xf32>
    %48 = arith.addf %46, %47 : vector<8x32xf32>
    %49 = vector.extract_strided_slice %43 {offsets = [0, 32], sizes = [8, 32], strides = [1, 1]} : vector<8x128xf32> to vector<8x32xf32>
    %cst_23 = arith.constant 5.000000e-01 : f32
    %50 = vector.broadcast %cst_23 : f32 to vector<8x32xf32>
    %51 = arith.mulf %50, %49 : vector<8x32xf32>
    %cst_24 = arith.constant 5.000000e-01 : f32
    %52 = vector.broadcast %cst_24 : f32 to vector<8x32xf32>
    %53 = arith.addf %51, %52 : vector<8x32xf32>
    %54 = vector.extract_strided_slice %43 {offsets = [0, 96], sizes = [8, 32], strides = [1, 1]} : vector<8x128xf32> to vector<8x32xf32>
    %cst_25 = arith.constant 5.000000e-01 : f32
    %55 = vector.broadcast %cst_25 : f32 to vector<8x32xf32>
    %56 = arith.mulf %55, %54 : vector<8x32xf32>
    %cst_26 = arith.constant 5.000000e-01 : f32
    %57 = vector.broadcast %cst_26 : f32 to vector<8x32xf32>
    %58 = arith.addf %56, %57 : vector<8x32xf32>
    %59 = vector.extract_strided_slice %43 {offsets = [0, 64], sizes = [8, 32], strides = [1, 1]} : vector<8x128xf32> to vector<8x32xf32>
    %60 = arith.mulf %53, %13 : vector<8x32xf32>
    %61 = arith.mulf %48, %59 : vector<8x32xf32>
    %62 = arith.addf %60, %61 : vector<8x32xf32>
    %63 = math.tanh %62 : vector<8x32xf32>
    %64 = arith.mulf %58, %63 : vector<8x32xf32>
    %65 = vector.extract_strided_slice %7 {offsets = [1, 0, 0], sizes = [1, 8, 128], strides = [1, 1, 1]} : vector<6x8x128xf32> to vector<1x8x128xf32>
    %66 = vector.shape_cast %65 : vector<1x8x128xf32> to vector<8x128xf32>
    %cst_27 = arith.constant dense<0.000000e+00> : vector<8x128xf32>
    %67 = tpu.matmul %39, %8, %cst_27 {dimension_numbers = #tpu.dot_dimension_numbers<[1], [0], [0], [1], [0, 0, 1, 1], [], []>, precision = #tpu.contract_precision<fp32>} : vector<8x32xf32>, vector<32x128xf32>, vector<8x128xf32> -> vector<8x128xf32>
    %68 = arith.addf %66, %67 : vector<8x128xf32>
    %69 = math.tanh %68 : vector<8x128xf32>
    %70 = vector.extract_strided_slice %69 {offsets = [0, 0], sizes = [8, 32], strides = [1, 1]} : vector<8x128xf32> to vector<8x32xf32>
    %cst_28 = arith.constant 5.000000e-01 : f32
    %71 = vector.broadcast %cst_28 : f32 to vector<8x32xf32>
    %72 = arith.mulf %71, %70 : vector<8x32xf32>
    %cst_29 = arith.constant 5.000000e-01 : f32
    %73 = vector.broadcast %cst_29 : f32 to vector<8x32xf32>
    %74 = arith.addf %72, %73 : vector<8x32xf32>
    %75 = vector.extract_strided_slice %69 {offsets = [0, 32], sizes = [8, 32], strides = [1, 1]} : vector<8x128xf32> to vector<8x32xf32>
    %cst_30 = arith.constant 5.000000e-01 : f32
    %76 = vector.broadcast %cst_30 : f32 to vector<8x32xf32>
    %77 = arith.mulf %76, %75 : vector<8x32xf32>
    %cst_31 = arith.constant 5.000000e-01 : f32
    %78 = vector.broadcast %cst_31 : f32 to vector<8x32xf32>
    %79 = arith.addf %77, %78 : vector<8x32xf32>
    %80 = vector.extract_strided_slice %69 {offsets = [0, 96], sizes = [8, 32], strides = [1, 1]} : vector<8x128xf32> to vector<8x32xf32>
    %cst_32 = arith.constant 5.000000e-01 : f32
    %81 = vector.broadcast %cst_32 : f32 to vector<8x32xf32>
    %82 = arith.mulf %81, %80 : vector<8x32xf32>
    %cst_33 = arith.constant 5.000000e-01 : f32
    %83 = vector.broadcast %cst_33 : f32 to vector<8x32xf32>
    %84 = arith.addf %82, %83 : vector<8x32xf32>
    %85 = vector.extract_strided_slice %69 {offsets = [0, 64], sizes = [8, 32], strides = [1, 1]} : vector<8x128xf32> to vector<8x32xf32>
    %86 = arith.mulf %79, %37 : vector<8x32xf32>
    %87 = arith.mulf %74, %85 : vector<8x32xf32>
    %88 = arith.addf %86, %87 : vector<8x32xf32>
    %89 = math.tanh %88 : vector<8x32xf32>
    %90 = arith.mulf %84, %89 : vector<8x32xf32>
    %91 = tpu.concatenate %90, %64 in 1 : vector<8x32xf32>, vector<8x32xf32> -> vector<8x64xf32>
    %cst_34 = arith.constant dense<0.000000e+00> : vector<8x128xf32>
    %92 = tpu.matmul %91, %9, %cst_34 {dimension_numbers = #tpu.dot_dimension_numbers<[1], [0], [0], [1], [0, 0, 1, 1], [], []>, precision = #tpu.contract_precision<fp32>} : vector<8x64xf32>, vector<64x128xf32>, vector<8x128xf32> -> vector<8x128xf32>
    %93 = arith.addf %92, %12 : vector<8x128xf32>
    %94 = math.tanh %93 : vector<8x128xf32>
    %95 = vector.extract_strided_slice %94 {offsets = [0, 0], sizes = [8, 32], strides = [1, 1]} : vector<8x128xf32> to vector<8x32xf32>
    %cst_35 = arith.constant 5.000000e-01 : f32
    %96 = vector.broadcast %cst_35 : f32 to vector<8x32xf32>
    %97 = arith.mulf %96, %95 : vector<8x32xf32>
    %cst_36 = arith.constant 5.000000e-01 : f32
    %98 = vector.broadcast %cst_36 : f32 to vector<8x32xf32>
    %99 = arith.addf %97, %98 : vector<8x32xf32>
    %100 = vector.extract_strided_slice %94 {offsets = [0, 32], sizes = [8, 32], strides = [1, 1]} : vector<8x128xf32> to vector<8x32xf32>
    %cst_37 = arith.constant 5.000000e-01 : f32
    %101 = vector.broadcast %cst_37 : f32 to vector<8x32xf32>
    %102 = arith.mulf %101, %100 : vector<8x32xf32>
    %cst_38 = arith.constant 5.000000e-01 : f32
    %103 = vector.broadcast %cst_38 : f32 to vector<8x32xf32>
    %104 = arith.addf %102, %103 : vector<8x32xf32>
    %105 = vector.extract_strided_slice %94 {offsets = [0, 96], sizes = [8, 32], strides = [1, 1]} : vector<8x128xf32> to vector<8x32xf32>
    %cst_39 = arith.constant 5.000000e-01 : f32
    %106 = vector.broadcast %cst_39 : f32 to vector<8x32xf32>
    %107 = arith.mulf %106, %105 : vector<8x32xf32>
    %cst_40 = arith.constant 5.000000e-01 : f32
    %108 = vector.broadcast %cst_40 : f32 to vector<8x32xf32>
    %109 = arith.addf %107, %108 : vector<8x32xf32>
    %110 = vector.extract_strided_slice %94 {offsets = [0, 64], sizes = [8, 32], strides = [1, 1]} : vector<8x128xf32> to vector<8x32xf32>
    %111 = arith.mulf %104, %62 : vector<8x32xf32>
    %112 = arith.mulf %99, %110 : vector<8x32xf32>
    %113 = arith.addf %111, %112 : vector<8x32xf32>
    %114 = math.tanh %113 : vector<8x32xf32>
    %115 = arith.mulf %109, %114 : vector<8x32xf32>
    %116 = vector.extract_strided_slice %7 {offsets = [2, 0, 0], sizes = [1, 8, 128], strides = [1, 1, 1]} : vector<6x8x128xf32> to vector<1x8x128xf32>
    %117 = vector.shape_cast %116 : vector<1x8x128xf32> to vector<8x128xf32>
    %cst_41 = arith.constant dense<0.000000e+00> : vector<8x128xf32>
    %118 = tpu.matmul %90, %8, %cst_41 {dimension_numbers = #tpu.dot_dimension_numbers<[1], [0], [0], [1], [0, 0, 1, 1], [], []>, precision = #tpu.contract_precision<fp32>} : vector<8x32xf32>, vector<32x128xf32>, vector<8x128xf32> -> vector<8x128xf32>
    %119 = arith.addf %117, %118 : vector<8x128xf32>
    %120 = math.tanh %119 : vector<8x128xf32>
    %121 = vector.extract_strided_slice %120 {offsets = [0, 0], sizes = [8, 32], strides = [1, 1]} : vector<8x128xf32> to vector<8x32xf32>
    %cst_42 = arith.constant 5.000000e-01 : f32
    %122 = vector.broadcast %cst_42 : f32 to vector<8x32xf32>
    %123 = arith.mulf %122, %121 : vector<8x32xf32>
    %cst_43 = arith.constant 5.000000e-01 : f32
    %124 = vector.broadcast %cst_43 : f32 to vector<8x32xf32>
    %125 = arith.addf %123, %124 : vector<8x32xf32>
    %126 = vector.extract_strided_slice %120 {offsets = [0, 32], sizes = [8, 32], strides = [1, 1]} : vector<8x128xf32> to vector<8x32xf32>
    %cst_44 = arith.constant 5.000000e-01 : f32
    %127 = vector.broadcast %cst_44 : f32 to vector<8x32xf32>
    %128 = arith.mulf %127, %126 : vector<8x32xf32>
    %cst_45 = arith.constant 5.000000e-01 : f32
    %129 = vector.broadcast %cst_45 : f32 to vector<8x32xf32>
    %130 = arith.addf %128, %129 : vector<8x32xf32>
    %131 = vector.extract_strided_slice %120 {offsets = [0, 96], sizes = [8, 32], strides = [1, 1]} : vector<8x128xf32> to vector<8x32xf32>
    %cst_46 = arith.constant 5.000000e-01 : f32
    %132 = vector.broadcast %cst_46 : f32 to vector<8x32xf32>
    %133 = arith.mulf %132, %131 : vector<8x32xf32>
    %cst_47 = arith.constant 5.000000e-01 : f32
    %134 = vector.broadcast %cst_47 : f32 to vector<8x32xf32>
    %135 = arith.addf %133, %134 : vector<8x32xf32>
    %136 = vector.extract_strided_slice %120 {offsets = [0, 64], sizes = [8, 32], strides = [1, 1]} : vector<8x128xf32> to vector<8x32xf32>
    %137 = arith.mulf %130, %88 : vector<8x32xf32>
    %138 = arith.mulf %125, %136 : vector<8x32xf32>
    %139 = arith.addf %137, %138 : vector<8x32xf32>
    %140 = math.tanh %139 : vector<8x32xf32>
    %141 = arith.mulf %135, %140 : vector<8x32xf32>
    %142 = tpu.concatenate %141, %115 in 1 : vector<8x32xf32>, vector<8x32xf32> -> vector<8x64xf32>
    %cst_48 = arith.constant dense<0.000000e+00> : vector<8x128xf32>
    %143 = tpu.matmul %142, %9, %cst_48 {dimension_numbers = #tpu.dot_dimension_numbers<[1], [0], [0], [1], [0, 0, 1, 1], [], []>, precision = #tpu.contract_precision<fp32>} : vector<8x64xf32>, vector<64x128xf32>, vector<8x128xf32> -> vector<8x128xf32>
    %144 = arith.addf %143, %12 : vector<8x128xf32>
    %145 = math.tanh %144 : vector<8x128xf32>
    %146 = vector.extract_strided_slice %145 {offsets = [0, 0], sizes = [8, 32], strides = [1, 1]} : vector<8x128xf32> to vector<8x32xf32>
    %cst_49 = arith.constant 5.000000e-01 : f32
    %147 = vector.broadcast %cst_49 : f32 to vector<8x32xf32>
    %148 = arith.mulf %147, %146 : vector<8x32xf32>
    %cst_50 = arith.constant 5.000000e-01 : f32
    %149 = vector.broadcast %cst_50 : f32 to vector<8x32xf32>
    %150 = arith.addf %148, %149 : vector<8x32xf32>
    %151 = vector.extract_strided_slice %145 {offsets = [0, 32], sizes = [8, 32], strides = [1, 1]} : vector<8x128xf32> to vector<8x32xf32>
    %cst_51 = arith.constant 5.000000e-01 : f32
    %152 = vector.broadcast %cst_51 : f32 to vector<8x32xf32>
    %153 = arith.mulf %152, %151 : vector<8x32xf32>
    %cst_52 = arith.constant 5.000000e-01 : f32
    %154 = vector.broadcast %cst_52 : f32 to vector<8x32xf32>
    %155 = arith.addf %153, %154 : vector<8x32xf32>
    %156 = vector.extract_strided_slice %145 {offsets = [0, 96], sizes = [8, 32], strides = [1, 1]} : vector<8x128xf32> to vector<8x32xf32>
    %cst_53 = arith.constant 5.000000e-01 : f32
    %157 = vector.broadcast %cst_53 : f32 to vector<8x32xf32>
    %158 = arith.mulf %157, %156 : vector<8x32xf32>
    %cst_54 = arith.constant 5.000000e-01 : f32
    %159 = vector.broadcast %cst_54 : f32 to vector<8x32xf32>
    %160 = arith.addf %158, %159 : vector<8x32xf32>
    %161 = vector.extract_strided_slice %145 {offsets = [0, 64], sizes = [8, 32], strides = [1, 1]} : vector<8x128xf32> to vector<8x32xf32>
    %162 = arith.mulf %155, %113 : vector<8x32xf32>
    %163 = arith.mulf %150, %161 : vector<8x32xf32>
    %164 = arith.addf %162, %163 : vector<8x32xf32>
    %165 = math.tanh %164 : vector<8x32xf32>
    %166 = arith.mulf %160, %165 : vector<8x32xf32>
    %167 = vector.extract_strided_slice %7 {offsets = [3, 0, 0], sizes = [1, 8, 128], strides = [1, 1, 1]} : vector<6x8x128xf32> to vector<1x8x128xf32>
    %168 = vector.shape_cast %167 : vector<1x8x128xf32> to vector<8x128xf32>
    %cst_55 = arith.constant dense<0.000000e+00> : vector<8x128xf32>
    %169 = tpu.matmul %141, %8, %cst_55 {dimension_numbers = #tpu.dot_dimension_numbers<[1], [0], [0], [1], [0, 0, 1, 1], [], []>, precision = #tpu.contract_precision<fp32>} : vector<8x32xf32>, vector<32x128xf32>, vector<8x128xf32> -> vector<8x128xf32>
    %170 = arith.addf %168, %169 : vector<8x128xf32>
    %171 = math.tanh %170 : vector<8x128xf32>
    %172 = vector.extract_strided_slice %171 {offsets = [0, 0], sizes = [8, 32], strides = [1, 1]} : vector<8x128xf32> to vector<8x32xf32>
    %cst_56 = arith.constant 5.000000e-01 : f32
    %173 = vector.broadcast %cst_56 : f32 to vector<8x32xf32>
    %174 = arith.mulf %173, %172 : vector<8x32xf32>
    %cst_57 = arith.constant 5.000000e-01 : f32
    %175 = vector.broadcast %cst_57 : f32 to vector<8x32xf32>
    %176 = arith.addf %174, %175 : vector<8x32xf32>
    %177 = vector.extract_strided_slice %171 {offsets = [0, 32], sizes = [8, 32], strides = [1, 1]} : vector<8x128xf32> to vector<8x32xf32>
    %cst_58 = arith.constant 5.000000e-01 : f32
    %178 = vector.broadcast %cst_58 : f32 to vector<8x32xf32>
    %179 = arith.mulf %178, %177 : vector<8x32xf32>
    %cst_59 = arith.constant 5.000000e-01 : f32
    %180 = vector.broadcast %cst_59 : f32 to vector<8x32xf32>
    %181 = arith.addf %179, %180 : vector<8x32xf32>
    %182 = vector.extract_strided_slice %171 {offsets = [0, 96], sizes = [8, 32], strides = [1, 1]} : vector<8x128xf32> to vector<8x32xf32>
    %cst_60 = arith.constant 5.000000e-01 : f32
    %183 = vector.broadcast %cst_60 : f32 to vector<8x32xf32>
    %184 = arith.mulf %183, %182 : vector<8x32xf32>
    %cst_61 = arith.constant 5.000000e-01 : f32
    %185 = vector.broadcast %cst_61 : f32 to vector<8x32xf32>
    %186 = arith.addf %184, %185 : vector<8x32xf32>
    %187 = vector.extract_strided_slice %171 {offsets = [0, 64], sizes = [8, 32], strides = [1, 1]} : vector<8x128xf32> to vector<8x32xf32>
    %188 = arith.mulf %181, %139 : vector<8x32xf32>
    %189 = arith.mulf %176, %187 : vector<8x32xf32>
    %190 = arith.addf %188, %189 : vector<8x32xf32>
    %191 = math.tanh %190 : vector<8x32xf32>
    %192 = arith.mulf %186, %191 : vector<8x32xf32>
    %193 = tpu.concatenate %192, %166 in 1 : vector<8x32xf32>, vector<8x32xf32> -> vector<8x64xf32>
    %cst_62 = arith.constant dense<0.000000e+00> : vector<8x128xf32>
    %194 = tpu.matmul %193, %9, %cst_62 {dimension_numbers = #tpu.dot_dimension_numbers<[1], [0], [0], [1], [0, 0, 1, 1], [], []>, precision = #tpu.contract_precision<fp32>} : vector<8x64xf32>, vector<64x128xf32>, vector<8x128xf32> -> vector<8x128xf32>
    %195 = arith.addf %194, %12 : vector<8x128xf32>
    %196 = math.tanh %195 : vector<8x128xf32>
    %197 = vector.extract_strided_slice %196 {offsets = [0, 0], sizes = [8, 32], strides = [1, 1]} : vector<8x128xf32> to vector<8x32xf32>
    %cst_63 = arith.constant 5.000000e-01 : f32
    %198 = vector.broadcast %cst_63 : f32 to vector<8x32xf32>
    %199 = arith.mulf %198, %197 : vector<8x32xf32>
    %cst_64 = arith.constant 5.000000e-01 : f32
    %200 = vector.broadcast %cst_64 : f32 to vector<8x32xf32>
    %201 = arith.addf %199, %200 : vector<8x32xf32>
    %202 = vector.extract_strided_slice %196 {offsets = [0, 32], sizes = [8, 32], strides = [1, 1]} : vector<8x128xf32> to vector<8x32xf32>
    %cst_65 = arith.constant 5.000000e-01 : f32
    %203 = vector.broadcast %cst_65 : f32 to vector<8x32xf32>
    %204 = arith.mulf %203, %202 : vector<8x32xf32>
    %cst_66 = arith.constant 5.000000e-01 : f32
    %205 = vector.broadcast %cst_66 : f32 to vector<8x32xf32>
    %206 = arith.addf %204, %205 : vector<8x32xf32>
    %207 = vector.extract_strided_slice %196 {offsets = [0, 96], sizes = [8, 32], strides = [1, 1]} : vector<8x128xf32> to vector<8x32xf32>
    %cst_67 = arith.constant 5.000000e-01 : f32
    %208 = vector.broadcast %cst_67 : f32 to vector<8x32xf32>
    %209 = arith.mulf %208, %207 : vector<8x32xf32>
    %cst_68 = arith.constant 5.000000e-01 : f32
    %210 = vector.broadcast %cst_68 : f32 to vector<8x32xf32>
    %211 = arith.addf %209, %210 : vector<8x32xf32>
    %212 = vector.extract_strided_slice %196 {offsets = [0, 64], sizes = [8, 32], strides = [1, 1]} : vector<8x128xf32> to vector<8x32xf32>
    %213 = arith.mulf %206, %164 : vector<8x32xf32>
    %214 = arith.mulf %201, %212 : vector<8x32xf32>
    %215 = arith.addf %213, %214 : vector<8x32xf32>
    %216 = math.tanh %215 : vector<8x32xf32>
    %217 = arith.mulf %211, %216 : vector<8x32xf32>
    %218 = vector.extract_strided_slice %7 {offsets = [4, 0, 0], sizes = [1, 8, 128], strides = [1, 1, 1]} : vector<6x8x128xf32> to vector<1x8x128xf32>
    %219 = vector.shape_cast %218 : vector<1x8x128xf32> to vector<8x128xf32>
    %cst_69 = arith.constant dense<0.000000e+00> : vector<8x128xf32>
    %220 = tpu.matmul %192, %8, %cst_69 {dimension_numbers = #tpu.dot_dimension_numbers<[1], [0], [0], [1], [0, 0, 1, 1], [], []>, precision = #tpu.contract_precision<fp32>} : vector<8x32xf32>, vector<32x128xf32>, vector<8x128xf32> -> vector<8x128xf32>
    %221 = arith.addf %219, %220 : vector<8x128xf32>
    %222 = math.tanh %221 : vector<8x128xf32>
    %223 = vector.extract_strided_slice %222 {offsets = [0, 0], sizes = [8, 32], strides = [1, 1]} : vector<8x128xf32> to vector<8x32xf32>
    %cst_70 = arith.constant 5.000000e-01 : f32
    %224 = vector.broadcast %cst_70 : f32 to vector<8x32xf32>
    %225 = arith.mulf %224, %223 : vector<8x32xf32>
    %cst_71 = arith.constant 5.000000e-01 : f32
    %226 = vector.broadcast %cst_71 : f32 to vector<8x32xf32>
    %227 = arith.addf %225, %226 : vector<8x32xf32>
    %228 = vector.extract_strided_slice %222 {offsets = [0, 32], sizes = [8, 32], strides = [1, 1]} : vector<8x128xf32> to vector<8x32xf32>
    %cst_72 = arith.constant 5.000000e-01 : f32
    %229 = vector.broadcast %cst_72 : f32 to vector<8x32xf32>
    %230 = arith.mulf %229, %228 : vector<8x32xf32>
    %cst_73 = arith.constant 5.000000e-01 : f32
    %231 = vector.broadcast %cst_73 : f32 to vector<8x32xf32>
    %232 = arith.addf %230, %231 : vector<8x32xf32>
    %233 = vector.extract_strided_slice %222 {offsets = [0, 96], sizes = [8, 32], strides = [1, 1]} : vector<8x128xf32> to vector<8x32xf32>
    %cst_74 = arith.constant 5.000000e-01 : f32
    %234 = vector.broadcast %cst_74 : f32 to vector<8x32xf32>
    %235 = arith.mulf %234, %233 : vector<8x32xf32>
    %cst_75 = arith.constant 5.000000e-01 : f32
    %236 = vector.broadcast %cst_75 : f32 to vector<8x32xf32>
    %237 = arith.addf %235, %236 : vector<8x32xf32>
    %238 = vector.extract_strided_slice %222 {offsets = [0, 64], sizes = [8, 32], strides = [1, 1]} : vector<8x128xf32> to vector<8x32xf32>
    %239 = arith.mulf %232, %190 : vector<8x32xf32>
    %240 = arith.mulf %227, %238 : vector<8x32xf32>
    %241 = arith.addf %239, %240 : vector<8x32xf32>
    %242 = math.tanh %241 : vector<8x32xf32>
    %243 = arith.mulf %237, %242 : vector<8x32xf32>
    %244 = tpu.concatenate %243, %217 in 1 : vector<8x32xf32>, vector<8x32xf32> -> vector<8x64xf32>
    %cst_76 = arith.constant dense<0.000000e+00> : vector<8x128xf32>
    %245 = tpu.matmul %244, %9, %cst_76 {dimension_numbers = #tpu.dot_dimension_numbers<[1], [0], [0], [1], [0, 0, 1, 1], [], []>, precision = #tpu.contract_precision<fp32>} : vector<8x64xf32>, vector<64x128xf32>, vector<8x128xf32> -> vector<8x128xf32>
    %246 = arith.addf %245, %12 : vector<8x128xf32>
    %247 = math.tanh %246 : vector<8x128xf32>
    %248 = vector.extract_strided_slice %247 {offsets = [0, 0], sizes = [8, 32], strides = [1, 1]} : vector<8x128xf32> to vector<8x32xf32>
    %cst_77 = arith.constant 5.000000e-01 : f32
    %249 = vector.broadcast %cst_77 : f32 to vector<8x32xf32>
    %250 = arith.mulf %249, %248 : vector<8x32xf32>
    %cst_78 = arith.constant 5.000000e-01 : f32
    %251 = vector.broadcast %cst_78 : f32 to vector<8x32xf32>
    %252 = arith.addf %250, %251 : vector<8x32xf32>
    %253 = vector.extract_strided_slice %247 {offsets = [0, 32], sizes = [8, 32], strides = [1, 1]} : vector<8x128xf32> to vector<8x32xf32>
    %cst_79 = arith.constant 5.000000e-01 : f32
    %254 = vector.broadcast %cst_79 : f32 to vector<8x32xf32>
    %255 = arith.mulf %254, %253 : vector<8x32xf32>
    %cst_80 = arith.constant 5.000000e-01 : f32
    %256 = vector.broadcast %cst_80 : f32 to vector<8x32xf32>
    %257 = arith.addf %255, %256 : vector<8x32xf32>
    %258 = vector.extract_strided_slice %247 {offsets = [0, 96], sizes = [8, 32], strides = [1, 1]} : vector<8x128xf32> to vector<8x32xf32>
    %cst_81 = arith.constant 5.000000e-01 : f32
    %259 = vector.broadcast %cst_81 : f32 to vector<8x32xf32>
    %260 = arith.mulf %259, %258 : vector<8x32xf32>
    %cst_82 = arith.constant 5.000000e-01 : f32
    %261 = vector.broadcast %cst_82 : f32 to vector<8x32xf32>
    %262 = arith.addf %260, %261 : vector<8x32xf32>
    %263 = vector.extract_strided_slice %247 {offsets = [0, 64], sizes = [8, 32], strides = [1, 1]} : vector<8x128xf32> to vector<8x32xf32>
    %264 = arith.mulf %257, %215 : vector<8x32xf32>
    %265 = arith.mulf %252, %263 : vector<8x32xf32>
    %266 = arith.addf %264, %265 : vector<8x32xf32>
    %267 = math.tanh %266 : vector<8x32xf32>
    %268 = arith.mulf %262, %267 : vector<8x32xf32>
    %269 = vector.extract_strided_slice %7 {offsets = [5, 0, 0], sizes = [1, 8, 128], strides = [1, 1, 1]} : vector<6x8x128xf32> to vector<1x8x128xf32>
    %270 = vector.shape_cast %269 : vector<1x8x128xf32> to vector<8x128xf32>
    %cst_83 = arith.constant dense<0.000000e+00> : vector<8x128xf32>
    %271 = tpu.matmul %243, %8, %cst_83 {dimension_numbers = #tpu.dot_dimension_numbers<[1], [0], [0], [1], [0, 0, 1, 1], [], []>, precision = #tpu.contract_precision<fp32>} : vector<8x32xf32>, vector<32x128xf32>, vector<8x128xf32> -> vector<8x128xf32>
    %272 = arith.addf %270, %271 : vector<8x128xf32>
    %273 = math.tanh %272 : vector<8x128xf32>
    %274 = vector.extract_strided_slice %273 {offsets = [0, 0], sizes = [8, 32], strides = [1, 1]} : vector<8x128xf32> to vector<8x32xf32>
    %cst_84 = arith.constant 5.000000e-01 : f32
    %275 = vector.broadcast %cst_84 : f32 to vector<8x32xf32>
    %276 = arith.mulf %275, %274 : vector<8x32xf32>
    %cst_85 = arith.constant 5.000000e-01 : f32
    %277 = vector.broadcast %cst_85 : f32 to vector<8x32xf32>
    %278 = arith.addf %276, %277 : vector<8x32xf32>
    %279 = vector.extract_strided_slice %273 {offsets = [0, 32], sizes = [8, 32], strides = [1, 1]} : vector<8x128xf32> to vector<8x32xf32>
    %cst_86 = arith.constant 5.000000e-01 : f32
    %280 = vector.broadcast %cst_86 : f32 to vector<8x32xf32>
    %281 = arith.mulf %280, %279 : vector<8x32xf32>
    %cst_87 = arith.constant 5.000000e-01 : f32
    %282 = vector.broadcast %cst_87 : f32 to vector<8x32xf32>
    %283 = arith.addf %281, %282 : vector<8x32xf32>
    %284 = vector.extract_strided_slice %273 {offsets = [0, 96], sizes = [8, 32], strides = [1, 1]} : vector<8x128xf32> to vector<8x32xf32>
    %cst_88 = arith.constant 5.000000e-01 : f32
    %285 = vector.broadcast %cst_88 : f32 to vector<8x32xf32>
    %286 = arith.mulf %285, %284 : vector<8x32xf32>
    %cst_89 = arith.constant 5.000000e-01 : f32
    %287 = vector.broadcast %cst_89 : f32 to vector<8x32xf32>
    %288 = arith.addf %286, %287 : vector<8x32xf32>
    %289 = vector.extract_strided_slice %273 {offsets = [0, 64], sizes = [8, 32], strides = [1, 1]} : vector<8x128xf32> to vector<8x32xf32>
    %290 = arith.mulf %283, %241 : vector<8x32xf32>
    %291 = arith.mulf %278, %289 : vector<8x32xf32>
    %292 = arith.addf %290, %291 : vector<8x32xf32>
    %293 = math.tanh %292 : vector<8x32xf32>
    %294 = arith.mulf %288, %293 : vector<8x32xf32>
    %295 = tpu.concatenate %294, %268 in 1 : vector<8x32xf32>, vector<8x32xf32> -> vector<8x64xf32>
    %cst_90 = arith.constant dense<0.000000e+00> : vector<8x128xf32>
    %296 = tpu.matmul %295, %9, %cst_90 {dimension_numbers = #tpu.dot_dimension_numbers<[1], [0], [0], [1], [0, 0, 1, 1], [], []>, precision = #tpu.contract_precision<fp32>} : vector<8x64xf32>, vector<64x128xf32>, vector<8x128xf32> -> vector<8x128xf32>
    %297 = arith.addf %296, %12 : vector<8x128xf32>
    %298 = math.tanh %297 : vector<8x128xf32>
    %299 = vector.extract_strided_slice %298 {offsets = [0, 0], sizes = [8, 32], strides = [1, 1]} : vector<8x128xf32> to vector<8x32xf32>
    %cst_91 = arith.constant 5.000000e-01 : f32
    %300 = vector.broadcast %cst_91 : f32 to vector<8x32xf32>
    %301 = arith.mulf %300, %299 : vector<8x32xf32>
    %cst_92 = arith.constant 5.000000e-01 : f32
    %302 = vector.broadcast %cst_92 : f32 to vector<8x32xf32>
    %303 = arith.addf %301, %302 : vector<8x32xf32>
    %304 = vector.extract_strided_slice %298 {offsets = [0, 32], sizes = [8, 32], strides = [1, 1]} : vector<8x128xf32> to vector<8x32xf32>
    %cst_93 = arith.constant 5.000000e-01 : f32
    %305 = vector.broadcast %cst_93 : f32 to vector<8x32xf32>
    %306 = arith.mulf %305, %304 : vector<8x32xf32>
    %cst_94 = arith.constant 5.000000e-01 : f32
    %307 = vector.broadcast %cst_94 : f32 to vector<8x32xf32>
    %308 = arith.addf %306, %307 : vector<8x32xf32>
    %309 = vector.extract_strided_slice %298 {offsets = [0, 96], sizes = [8, 32], strides = [1, 1]} : vector<8x128xf32> to vector<8x32xf32>
    %cst_95 = arith.constant 5.000000e-01 : f32
    %310 = vector.broadcast %cst_95 : f32 to vector<8x32xf32>
    %311 = arith.mulf %310, %309 : vector<8x32xf32>
    %cst_96 = arith.constant 5.000000e-01 : f32
    %312 = vector.broadcast %cst_96 : f32 to vector<8x32xf32>
    %313 = arith.addf %311, %312 : vector<8x32xf32>
    %314 = vector.extract_strided_slice %298 {offsets = [0, 64], sizes = [8, 32], strides = [1, 1]} : vector<8x128xf32> to vector<8x32xf32>
    %315 = arith.mulf %308, %266 : vector<8x32xf32>
    %316 = arith.mulf %303, %314 : vector<8x32xf32>
    %317 = arith.addf %315, %316 : vector<8x32xf32>
    %318 = math.tanh %317 : vector<8x32xf32>
    %319 = arith.mulf %313, %318 : vector<8x32xf32>
    %c0_97 = arith.constant 0 : index
    %c0_98 = arith.constant 0 : index
    %320 = vector.load %arg6[%c0_97, %c0_98] : memref<32x64xf32, #tpu.memory_space<vmem>>, vector<32x64xf32>
    %cst_99 = arith.constant dense<0.000000e+00> : vector<8x64xf32>
    %321 = tpu.matmul %319, %320, %cst_99 {dimension_numbers = #tpu.dot_dimension_numbers<[1], [0], [0], [1], [0, 0, 1, 1], [], []>, precision = #tpu.contract_precision<fp32>} : vector<8x32xf32>, vector<32x64xf32>, vector<8x64xf32> -> vector<8x64xf32>
    %c0_100 = arith.constant 0 : index
    %c0_101 = arith.constant 0 : index
    %322 = vector.load %arg7[%c0_100, %c0_101] : memref<1x64xf32, #tpu.memory_space<vmem>>, vector<1x64xf32>
    %323 = vector.broadcast %322 : vector<1x64xf32> to vector<8x64xf32>
    %324 = arith.addf %321, %323 : vector<8x64xf32>
    %cst_102 = arith.constant 0.000000e+00 : f32
    %325 = vector.broadcast %cst_102 : f32 to vector<8x64xf32>
    %326 = arith.maximumf %324, %325 : vector<8x64xf32>
    %c0_103 = arith.constant 0 : index
    %c0_104 = arith.constant 0 : index
    %327 = vector.load %arg8[%c0_103, %c0_104] : memref<64x64xf32, #tpu.memory_space<vmem>>, vector<64x64xf32>
    %cst_105 = arith.constant dense<0.000000e+00> : vector<8x64xf32>
    %328 = tpu.matmul %326, %327, %cst_105 {dimension_numbers = #tpu.dot_dimension_numbers<[1], [0], [0], [1], [0, 0, 1, 1], [], []>, precision = #tpu.contract_precision<fp32>} : vector<8x64xf32>, vector<64x64xf32>, vector<8x64xf32> -> vector<8x64xf32>
    %c0_106 = arith.constant 0 : index
    %c0_107 = arith.constant 0 : index
    %329 = vector.load %arg9[%c0_106, %c0_107] : memref<1x64xf32, #tpu.memory_space<vmem>>, vector<1x64xf32>
    %330 = vector.broadcast %329 : vector<1x64xf32> to vector<8x64xf32>
    %331 = arith.addf %328, %330 : vector<8x64xf32>
    %cst_108 = arith.constant 0.000000e+00 : f32
    %332 = vector.broadcast %cst_108 : f32 to vector<8x64xf32>
    %333 = arith.maximumf %331, %332 : vector<8x64xf32>
    %c0_109 = arith.constant 0 : index
    %c0_110 = arith.constant 0 : index
    %334 = vector.load %arg10[%c0_109, %c0_110] : memref<64x40xf32, #tpu.memory_space<vmem>>, vector<64x40xf32>
    %cst_111 = arith.constant dense<0.000000e+00> : vector<8x40xf32>
    %335 = tpu.matmul %333, %334, %cst_111 {dimension_numbers = #tpu.dot_dimension_numbers<[1], [0], [0], [1], [0, 0, 1, 1], [], []>, precision = #tpu.contract_precision<fp32>} : vector<8x64xf32>, vector<64x40xf32>, vector<8x40xf32> -> vector<8x40xf32>
    %c0_112 = arith.constant 0 : index
    %c0_113 = arith.constant 0 : index
    %336 = vector.load %arg11[%c0_112, %c0_113] : memref<1x40xf32, #tpu.memory_space<vmem>>, vector<1x40xf32>
    %337 = vector.broadcast %336 : vector<1x40xf32> to vector<8x40xf32>
    %338 = arith.addf %335, %337 : vector<8x40xf32>
    %c0_114 = arith.constant 0 : index
    %c0_115 = arith.constant 0 : index
    %339 = vector.load %arg12[%c0_114, %c0_115] : memref<8x40xf32, #tpu.memory_space<vmem>>, vector<8x40xf32>
    tpu.vector_store %arg12[%c0_114, %c0_115], %338 {strides = array<i32>} : memref<8x40xf32, #tpu.memory_space<vmem>>, vector<8x40xf32>,
    return
  }
}

</mosaic_0001>

<bundles_post_ra>
// kernel: shred_forward.1
= control target key start
LH: loop header
LB: loop body
LE: loop exit
PB: predicated region body
PF: predicated region fallthrough
CT: control target
= control target key end

     0   :  { %vm56_vm0 = vcmask 64512   ;;  %s13485_s0 = inlined_call_operand.vmem [shape: f32[6,8,8], index: 0, kind: input, shape index: {}]   ;;  %s13486_s1 = inlined_call_operand.vmem [shape: f32[8,128], index: 1, kind: input, shape index: {}]   ;;  %s13487_s2 = inlined_call_operand.vmem [shape: f32[32,128], index: 2, kind: input, shape index: {}]   ;;  %s13488_s3 = inlined_call_operand.vmem [shape: f32[1,128], index: 3, kind: input, shape index: {}]   ;;  %s13489_s4 = inlined_call_operand.vmem [shape: f32[64,128], index: 4, kind: input, shape index: {}]   ;;  %s13490_s5 = inlined_call_operand.vmem [shape: f32[1,128], index: 5, kind: input, shape index: {}]   ;;  %s13491_s6 = inlined_call_operand.vmem [shape: f32[32,64], index: 6, kind: input, shape index: {}]   ;;  %s13492_s7 = inlined_call_operand.vmem [shape: f32[1,64], index: 7, kind: input, shape index: {}]   ;;  %s13493_s8 = inlined_call_operand.vmem [shape: f32[64,64], index: 8, kind: input, shape index: {}]   ;;  %s13494_s9 = inlined_call_operand.vmem [shape: f32[1,64], index: 9, kind: input, shape index: {}]   ;;  %s13495_s10 = inlined_call_operand.vmem [shape: f32[64,40], index: 10, kind: input, shape index: {}]   ;;  %s13496_s11 = inlined_call_operand.vmem [shape: f32[1,40], index: 11, kind: input, shape index: {}]   ;;  %s13497_s12 = inlined_call_operand.hbm [shape: f32[8,40], index: 12, kind: output, shape index: {}]  }
   0x1   :  { %v48_v0 = vld [vmem:[%s13486_s1] sm:$0xff]  ;;  %v43_v2 = vld [vmem:[%s13485_s0 + $0x8] sm:$0xff]  ;;  %v44_v8 = vld [vmem:[%s13485_s0 + $0x10] sm:$0xff] }
   0x2   :  { %v42_v1 = vld [vmem:[%s13485_s0] sm:$0xff]  ;;  %v12156_v3 = vand.u32 4294901760, %v48_v0  ;;  %v61_v5 = vsel %vm56_vm0, %v43_v2, 0  ;;  %v737_v7 = vld [vmem:[%s13487_s2 + $0x8] sm:$0xff]  ;;  %v45_v11 = vld [vmem:[%s13485_s0 + $0x18] sm:$0xff]  ;;  %v64_v15 = vsel %vm56_vm0, %v44_v8, 0 }
   0x3   :  { %v58_v4 = vsel %vm56_vm0, %v42_v1, 0  ;;  %v736_v6 = vld [vmem:[%s13487_s2] sm:$0xff]  ;;  %v12171_v10 = vand.u32 4294901760, %v61_v5  ;;  %v738_v12 = vld [vmem:[%s13487_s2 + $0x10] sm:$0xff]  ;;  %v67_v16 = vsel %vm56_vm0, %v45_v11, 0  ;;  %v763_v20 = vand.u32 4294901760, %v737_v7 }
   0x4   :  { %v12169_v9 = vand.u32 4294901760, %v58_v4  ;;  %9534 = vmatprep.subr.mxu1 %v12156_v3  ;;  %v203_v13 = vsub.f32 %v48_v0, %v12156_v3  ;;  %v760_v14 = vand.u32 4294901760, %v736_v6  ;;  %v46_v17 = vld [vmem:[%s13485_s0 + $0x20] sm:$0xff]  ;;  %v12194_v21 = vand.u32 4294901760, %v64_v15  ;;  %v739_v22 = vld [vmem:[%s13487_s2 + $0x18] sm:$0xff]  ;;  %v47_v23 = vld [vmem:[%s13485_s0 + $0x28] sm:$0xff] }
   0x5   :  { %9535 = vmatpush3.msra.mxu1 %v12156_v3  ;;  %v12192_v19 = vsub.f32 %v61_v5, %v12171_v10 }
   0x6   :  { %v12188_v18 = vsub.f32 %v58_v4, %v12169_v9  ;;  %9547 = vmatprep.mubr.f32.mxu0 %v12169_v9 }
   0x7   :  { %17 = vsyncpa [#allocation3], 0  ;;  %v12202_v24 = vand.u32 4294901760, %v203_v13  ;;  %v12076_v25 = vmov 0.0|0.0   ;;  %v12205_v26 = vand.u32 4294901760, %v67_v16  ;;  %v766_v27 = vand.u32 4294901760, %v738_v12 }
   0x8   :  { %10974 = vmatprep.subr.bf16.mxu1 %v12076_v25  ;;  %v70_v28 = vsel %vm56_vm0, %v46_v17, 0  ;;  %v143_v29 = vand.u32 4294901760, %v12188_v18  ;;  %v153_v30 = vand.u32 4294901760, %v12192_v19  ;;  %v12211_v31 = vsub.f32 %v64_v15, %v12194_v21  ;;  %s12080_s24 = smov 32   ;;  %s12081_s18 = smov [#allocation2]  }
   0x9   :  { %v12213_v32 = vand.u32 4294901760, %v70_v28  ;;  %v205_v33 = vsub.f32 %v203_v13, %v12202_v24  ;;  %v12217_v34 = vsub.f32 %v67_v16, %v12205_v26  ;;  %v769_v35 = vand.u32 4294901760, %v739_v22  ;;  %s8837_s19 = sshll.u32 %s12081_s18, 4  ;;  %s8838_s19 = int_to_ptr.vmem [resolvable:$true] %s8837_s19 }
   0xa   :  { %v73_v36 = vsel %vm56_vm0, %v47_v23, 0  ;;  %v144_v37 = vsub.f32 %v12188_v18, %v143_v29  ;;  %v154_v38 = vsub.f32 %v12192_v19, %v153_v30  ;;  %v163_v39 = vand.u32 4294901760, %v12211_v31  ;;  %s12052_s20 = scalar_lea.vmem %s8838_s19, 128  ;;  %p12057_p1 = scmp.lt.s32.totalorder %s8838_s19, %s8838_s19 }
   0xb   :  { %v12228_v40 = vsub.f32 %v70_v28, %v12213_v32  ;;  %v206_v41 = vand.u32 4294901760, %v205_v33  ;;  %v12230_v42 = vpack.c.bf16 %v763_v20, %v760_v14  ;;  %v173_v43 = vand.u32 4294901760, %v12217_v34  ;;  %p12053_p0 = scmp.ne.s32.totalorder %s8838_s19, %s12052_s20  ;;  %p12058_p2 = scmp.lt.s32.totalorder %s12052_s20, %s12052_s20 }
   0xc   :  { %v12233_v44 = vand.u32 4294901760, %v73_v36  ;;  %v145_v45 = vand.u32 4294901760, %v144_v37  ;;  %v155_v46 = vand.u32 4294901760, %v154_v38  ;;  %v164_v47 = vsub.f32 %v12211_v31, %v163_v39 }
   0xd   :  { %v183_v48 = vand.u32 4294901760, %v12228_v40  ;;  %9545 = vmatprep.subr.mxu0 %v206_v41  ;;  %v174_v49 = vsub.f32 %v12217_v34, %v173_v43  ;;  %v12245_v51 = vsub.f32 %v736_v6, %v760_v14  ;;  %v12247_v52 = vsub.f32 %v737_v7, %v763_v20  ;;  %p12059_p3 = por %p12058_p2, %p12057_p1 }
   0xe   :  { %v12243_v50 = vsub.f32 %v73_v36, %v12233_v44  ;;  %9536 = vmatprep.mubr.f32.mxu1 %v145_v45  ;;  %9546 = vmatpush3.msra.mxu0 %v206_v41  ;;  %v165_v53 = vand.u32 4294901760, %v164_v47  ;;  %v12252_v55 = vsub.f32 %v738_v12, %v766_v27  ;;  %v12254_v56 = vsub.f32 %v739_v22, %v769_v35 }
   0xf   :  { %v184_v54 = vsub.f32 %v12228_v40, %v183_v48  ;;  %9537 = vmatmul.mubr.f32.vlgmr.msra.gmra.mrb[0].mxu1 %v155_v46  ;;  %9548 = vmatmul.mubr.f32.vlgmr.msra.gmra.mrb[0].mxu0 %v12171_v10  ;;  %v175_v57 = vand.u32 4294901760, %v174_v49  ;;  %v841_v59 = vand.u32 4294901760, %v12245_v51  ;;  %v848_v60 = vand.u32 4294901760, %v12247_v52  ;;  %p12060_p4 = pnand %p12059_p3, %p12053_p0 }
  0x10   :  { %v193_v58 = vand.u32 4294901760, %v12243_v50  ;;  %9556 = vmatprep.subr.mxu0 %v203_v13  ;;  %10976 = vmatpush3.bf16.msra.mxu1 %v12230_v42  ;;  %v12261_v61 = vpack.c.bf16 %v769_v35, %v766_v27  ;;  %v855_v63 = vand.u32 4294901760, %v12252_v55  ;;  %v862_v0 = vand.u32 4294901760, %v12254_v56 }
  0x11   :  { %v185_v62 = vand.u32 4294901760, %v184_v54  ;;  %9557 = vmatpush3.msra.mxu0 %v203_v13  ;;  %9539 = vmatprep.mubr.f32.mxu1 %v165_v53  ;;  %v842_v2 = vsub.f32 %v12245_v51, %v841_v59  ;;  %v849_v4 = vsub.f32 %v12247_v52, %v848_v60  ;;  %vm12077_vm1 = vmmov 0  }
  0x12   :  { %v194_v1 = vsub.f32 %v12243_v50, %v193_v58  ;;  %9550 = vmatprep.mubr.f32.mxu0 %v12194_v21  ;;  %10977 = vmatprep.subr.bf16.mxu1 %v12076_v25  ;;  %v856_v8 = vsub.f32 %v12252_v55, %v855_v63  ;;  %v863_v11 = vsub.f32 %v12254_v56, %v862_v0  ;;  %v12078_v12 = vmov 0.0  }
  0x13   :  { %9540 = vmatmul.mubr.f32.gmra.mrb[2].mxu1 %v175_v57  ;;  %9551 = vmatmul.mubr.f32.gmra.mrb[2].mxu0 %v12205_v26  ;;  %v843_v6 = vand.u32 4294901760, %v842_v2  ;;  %v850_v7 = vand.u32 4294901760, %v849_v4  ;;  %v12309_v17 = vpack.c.bf16 %v12247_v52, %v12245_v51  ;;  %v12319_v20 = vpack.c.bf16 %v12254_v56, %v12252_v55  ;;  %v12415_v56 = vld [vmem:[%s13489_s4] sm:$0xff]  ;;  %v12420_v57 = vld [vmem:[%s13489_s4 + $0x8] sm:$0xff] }
  0x14   :  { %v195_v5 = vand.u32 4294901760, %v194_v1  ;;  %10979 = vmatpush3.bf16.msra.mxu1 %v12261_v61  ;;  %9542 = vmatprep.mubr.f32.mxu1 %v185_v62  ;;  %v857_v14 = vand.u32 4294901760, %v856_v8  ;;  %v864_v15 = vand.u32 4294901760, %v863_v11  ;;  %vm755_vm2 = vcmask 261120  }
  0x15   :  { %9553 = vmatprep.mubr.f32.mxu0 %v12213_v32  ;;  %10980 = vmatprep.subr.bf16.mxu1 %v12076_v25  ;;  %v12291_v13 = vpack.c.bf16 %v850_v7, %v843_v6  ;;  %v745_v6 = vld [vmem:[%s13489_s4 + $0x28] sm:$0xff]  ;;  %vm1270_vm3 = vcmask 523264   ;;  %vm8829_vm4 = vcmask 326656  }
  0x16   :  { %9567 = vmatprep.subr.mxu0 %v12156_v3  ;;  %v12297_v16 = vpack.c.bf16 %v864_v15, %v857_v14  ;;  %v1290_v8 = vand.u32 4294901760, %v745_v6  ;;  %v746_v14 = vld [vmem:[%s13489_s4 + $0x30] sm:$0xff]  ;;  %v747_v15 = vld [vmem:[%s13489_s4 + $0x38] sm:$0xff] }
  0x17   :  { %9543 = vmatmul.mubr.f32.gmra.mrb[4].mxu1 %v195_v5  ;;  %9554 = vmatmul.mubr.f32.gmra.mrb[4].mxu0 %v12233_v44  ;;  %v744_v5 = vld [vmem:[%s13489_s4 + $0x20] sm:$0xff] }
  0x18   :  { %9558 = vmatprep.mubr.f32.mxu0 %v12188_v18  ;;  %9608 = vmatprep.mubr.msk.f32.mxu1 %vm12077_vm1, %v12078_v12  ;;  %v12349_v18 = vpack.c.bf16 %v848_v60, %v841_v59  ;;  %v1278_v59 = vand.u32 4294901760, %v12420_v57  ;;  %v1287_v7 = vand.u32 4294901760, %v744_v5 }
  0x1a   :  { %v12449_v11 = vpack.c.bf16 %v1290_v8, %v1287_v7 }
  0x1b   :  { %9559 = vmatmul.mubr.f32.vlgmr.msra.gmra.mrb[0].mxu0 %v12192_v19  ;;  %9609 = vmatmul.mubr.f32.vlgmr.msra.gmra.mrb[6].mxu1 %v12078_v12  ;;  %v12360_v19 = vpack.c.bf16 %v862_v0, %v855_v63  ;;  %v742_v63 = vld [vmem:[%s13489_s4 + $0x10] sm:$0xff]  ;;  %v743_v0 = vld [vmem:[%s13489_s4 + $0x18] sm:$0xff] }
  0x1c   :  { %10982 = vmatpush3.bf16.msra.mxu1 %v12291_v13  ;;  %9568 = vmatpush3.msra.mxu0 %v12156_v3  ;;  %v1281_v1 = vand.u32 4294901760, %v742_v63  ;;  %v1284_v2 = vand.u32 4294901760, %v743_v0 }
  0x1d   :  { %9561 = vmatprep.mubr.f32.mxu0 %v12211_v31  ;;  %10983 = vmatprep.subr.bf16.mxu1 %v12076_v25 }
  0x1e   :  { %9619 = vmatprep.mubr.msk.f32.mxu1 %vm12077_vm1, %v12078_v12  ;;  %9578 = vmatprep.subr.mxu0 %v12202_v24  ;;  %v12439_v4 = vpack.c.bf16 %v1284_v2, %v1281_v1 }
  0x1f   :  { %9562 = vmatmul.mubr.f32.gmra.mrb[2].mxu0 %v12217_v34 }
  0x20   :  { %10985 = vmatpush3.bf16.msra.mxu1 %v12297_v16  ;;  %9564 = vmatprep.mubr.f32.mxu0 %v12228_v40 }
  0x21   :  { %10986 = vmatprep.subr.bf16.mxu1 %v12076_v25 }
  0x23   :  { %9565 = vmatmul.mubr.f32.gmra.mrb[4].mxu0 %v12243_v50  ;;  %9620 = vmatmul.mubr.f32.vlgmr.msra.gmra.mrb[6].mxu1 %v12078_v12 }
  0x24   :  { %10988 = vmatpush3.bf16.msra.mxu1 %v12309_v17  ;;  %9569 = vmatprep.mubr.f32.mxu0 %v143_v29 }
  0x25   :  { %10989 = vmatprep.subr.bf16.mxu1 %v12076_v25  ;;  %9630 = vmatprep.mubr.msk.f32.mxu1 %vm12077_vm1, %v12078_v12 }
  0x27   :  { %9570 = vmatmul.mubr.f32.vlgmr.msra.gmra.mrb[0].mxu0 %v153_v30 }
  0x28   :  { %10991 = vmatpush3.bf16.msra.mxu1 %v12319_v20  ;;  %9579 = vmatpush3.msra.mxu0 %v12202_v24 }
  0x29   :  { %9572 = vmatprep.mubr.f32.mxu0 %v163_v39  ;;  %10992 = vmatprep.subr.bf16.mxu1 %v12076_v25 }
  0x2a   :  { %9589 = vmatprep.subr.mxu0 %v12156_v3 }
  0x2b   :  { %9573 = vmatmul.mubr.f32.gmra.mrb[2].mxu0 %v173_v43  ;;  %9631 = vmatmul.mubr.f32.vlgmr.msra.gmra.mrb[6].mxu1 %v12078_v12 }
  0x2c   :  { %10994 = vmatpush3.bf16.msra.mxu1 %v12230_v42  ;;  %9575 = vmatprep.mubr.f32.mxu0 %v183_v48 }
  0x2d   :  { %10995 = vmatprep.subr.bf16.mxu1 %v12076_v25  ;;  %9641 = vmatprep.mubr.msk.f32.mxu1 %vm12077_vm1, %v12078_v12 }
  0x2f   :  { %9576 = vmatmul.mubr.f32.gmra.mrb[4].mxu0 %v193_v58  ;;  %v1275_v58 = vand.u32 4294901760, %v12415_v56 }
  0x30   :  { %10997 = vmatpush3.bf16.msra.mxu1 %v12261_v61  ;;  %9580 = vmatprep.mubr.f32.mxu0 %v12169_v9 }
  0x31   :  { %10998 = vmatprep.subr.bf16.mxu1 %v12076_v25  ;;  %v12428_v60 = vpack.c.bf16 %v1278_v59, %v1275_v58 }
  0x33   :  { %9581 = vmatmul.mubr.f32.vlgmr.msra.gmra.mrb[0].mxu0 %v12171_v10  ;;  %9642 = vmatmul.mubr.f32.vlgmr.msra.gmra.mrb[6].mxu1 %v12078_v12 }
  0x34   :  { %11000 = vmatpush3.bf16.msra.mxu1 %v12349_v18  ;;  %9590 = vmatpush3.msra.mxu0 %v12156_v3  ;;  %v8845_v3 = vld [vmem:[%s13488_s3] ss:$0 sm:$0xff]  ;;  %s12079_s3 = smov 64  }
  0x35   :  { %9583 = vmatprep.mubr.f32.mxu0 %v12194_v21  ;;  %11001 = vmatprep.subr.bf16.mxu1 %v12076_v25 }
  0x36   :  { %9652 = vmatprep.mubr.msk.f32.mxu1 %vm12077_vm1, %v12078_v12  ;;  %11082 = vmatprep.subr.bf16.mxu0 %v12076_v25 }
  0x37   :  { %9584 = vmatmul.mubr.f32.gmra.mrb[2].mxu0 %v12205_v26 }
  0x38   :  { %11003 = vmatpush3.bf16.msra.mxu1 %v12360_v19  ;;  %9586 = vmatprep.mubr.f32.mxu0 %v12213_v32 }
  0x39   :  { %11004 = vmatprep.subr.bf16.mxu1 %v12076_v25 }
  0x3b   :  { %9587 = vmatmul.mubr.f32.gmra.mrb[4].mxu0 %v12233_v44  ;;  %9653 = vmatmul.mubr.f32.vlgmr.msra.gmra.mrb[6].mxu1 %v12078_v12 }
  0x3c   :  { %11006 = vmatpush3.bf16.msra.mxu1 %v12230_v42  ;;  %9591 = vmatprep.mubr.f32.mxu0 %v12169_v9 }
  0x3d   :  { %11007 = vmatprep.subr.bf16.mxu1 %v12076_v25  ;;  %9663 = vmatprep.mubr.msk.f32.mxu1 %vm12077_vm1, %v12078_v12 }
  0x3f   :  { %9592 = vmatmul.mubr.f32.vlgmr.msra.gmra.mrb[0].mxu0 %v12171_v10 }
  0x40   :  { %11009 = vmatpush3.bf16.msra.mxu1 %v12261_v61  ;;  %9594 = vmatprep.mubr.f32.mxu0 %v12194_v21 }
  0x41   :  { %11010 = vmatprep.subr.bf16.mxu1 %v12076_v25  ;;  %11084 = vmatpush3.bf16.msra.mxu0 %v12230_v42 }
  0x42   :  { %11085 = vmatprep.subr.bf16.mxu0 %v12076_v25 }
  0x43   :  { %9595 = vmatmul.mubr.f32.gmra.mrb[2].mxu0 %v12205_v26  ;;  %9664 = vmatmul.mubr.f32.vlgmr.msra.gmra.mrb[6].mxu1 %v12078_v12 }
  0x44   :  { %9597 = vmatprep.mubr.f32.mxu0 %v12213_v32  ;;  %9682 = vmatprep.mubr.msk.f32.mxu1 %vm12077_vm1, %v12078_v12 }
  0x45   :  { %11087 = vmatpush3.bf16.msra.mxu0 %v12261_v61  ;;  %11012 = vmatpush3.bf16.msra.mxu1 %v12428_v60 }
  0x46   :  { %11088 = vmatprep.subr.bf16.mxu0 %v12076_v25  ;;  %11013 = vmatprep.subr.bf16.mxu1 %v12076_v25 }
  0x47   :  { %9598 = vmatmul.mubr.f32.gmra.mrb[4].mxu0 %v12233_v44 }
  0x48   :  { %9788 = vmatprep.mubr.msk.f32.mxu0 %vm12077_vm1, %v12078_v12 }
  0x49   :  { %11015 = vmatpush3.bf16.msra.mxu1 %v12439_v4 }
  0x4a   :  { %11016 = vmatprep.subr.bf16.mxu1 %v12076_v25 }
  0x4d   :  { %11018 = vmatpush3.bf16.msra.mxu1 %v12449_v11 }
  0x4e   :  { %11019 = vmatprep.subr.bf16.mxu1 %v12076_v25 }
  0xe2   :  { %v9538_v9 = vpop.f32.mrb[0].mxu1 }
  0xe3   :  { %v158_v10 = vadd.f32 %v9538_v9, %v8845_v3  ;;  %v147_v21 = vpop.f32.mrb[1].mxu1  ;;  %v1296_v9 = vand.u32 4294901760, %v747_v15 }
  0xe4   :  { %v148_v31 = vadd.f32 %v8845_v3, %v147_v21  ;;  %v1373_v21 = vsub.f32 %v742_v63, %v1281_v1 }
  0xe6   :  { %v9541_v22 = vpop.f32.mrb[2].mxu1 }
  0xe7   :  { %v178_v23 = vadd.f32 %v9541_v22, %v8845_v3  ;;  %v167_v24 = vpop.f32.mrb[3].mxu1  ;;  %v1380_v22 = vsub.f32 %v743_v0, %v1284_v2 }
  0xe8   :  { %v168_v26 = vadd.f32 %v8845_v3, %v167_v24 }
  0xe9   :  { %v1381_v24 = vand.u32 4294901760, %v1380_v22  ;;  %v12470_v0 = vpack.c.bf16 %v1380_v22, %v1373_v21 }
  0xea   :  { %v9544_v27 = vpop.f32.mrb[4].mxu1 }
  0xeb   :  { %v198_v28 = vadd.f32 %v9544_v27, %v8845_v3  ;;  %v187_v29 = vpop.f32.mrb[5].mxu1 }
  0xec   :  { %v188_v30 = vadd.f32 %v8845_v3, %v187_v29  ;;  %v1293_v3 = vand.u32 4294901760, %v746_v14  ;;  %v1382_v29 = vsub.f32 %v1380_v22, %v1381_v24 }
 0x112   :  { %v9593_v32 = vpop.f32.mrb[0].mxu0 }
 0x113   :  { %v12397_v33 = vadd.f32 %v9593_v32, %v158_v10  ;;  %v702_v34 = vpop.f32.mrb[1].mxu0  ;;  %v12459_v10 = vpack.c.bf16 %v1296_v9, %v1293_v3 }
 0x114   :  { %v11805_v35 = vadd.f32 %v702_v34, %v148_v31  ;;  %v1394_v31 = vsub.f32 %v745_v6, %v1290_v8  ;;  %v1383_v34 = vand.u32 4294901760, %v1382_v29  ;;  %v12485_v8 = vsub.f32 %v12415_v56, %v1275_v58 }
 0x115   :  { %11021 = vmatpush3.bf16.msra.mxu1 %v12459_v10 }
 0x116   :  { %v9596_v36 = vpop.f32.mrb[2].mxu0  ;;  %v1240_v37 = vpop.f32.mrb[6].mxu1  ;;  %11022 = vmatprep.subr.bf16.mxu1 %v12076_v25 }
 0x117   :  { %v12399_v38 = vadd.f32 %v9596_v36, %v178_v23  ;;  %v1244_v39 = vadd.f32 %v11805_v35, %v1240_v37  ;;  %v714_v40 = vpop.f32.mrb[3].mxu0  ;;  %v9665_v41 = vpop.f32.mrb[7].mxu1  ;;  %v1374_v23 = vand.u32 4294901760, %v1373_v21  ;;  %v1395_v36 = vand.u32 4294901760, %v1394_v31 }
 0x118   :  { %v12401_v43 = vadd.f32 %v714_v40, %v168_v26  ;;  %v1401_v40 = vsub.f32 %v746_v14, %v1293_v3  ;;  %v1408_v41 = vsub.f32 %v747_v15, %v1296_v9  ;;  %v12490_v14 = vsub.f32 %v12420_v57, %v1278_v59 }
 0x119   :  { %12003 = vtanh.f32 %v1244_v39  ;;  %v1360_v15 = vand.u32 4294901760, %v12485_v8 }
 0x11a   :  { %v9599_v44 = vpop.f32.mrb[4].mxu0  ;;  %v12474_v2 = vpack.c.bf16 %v1408_v41, %v1401_v40  ;;  %v1367_v3 = vand.u32 4294901760, %v12490_v14 }
 0x11b   :  { %v12403_v45 = vadd.f32 %v9599_v44, %v198_v28  ;;  %v726_v46 = vpop.f32.mrb[5].mxu0  ;;  %v1375_v28 = vsub.f32 %v1373_v21, %v1374_v23  ;;  %v1396_v44 = vsub.f32 %v1394_v31, %v1395_v36  ;;  %v1361_v57 = vsub.f32 %v12485_v8, %v1360_v15 }
 0x11c   :  { %v12405_v47 = vadd.f32 %v726_v46, %v188_v30  ;;  %v1387_v30 = vsub.f32 %v744_v5, %v1287_v7  ;;  %v12476_v5 = vpack.c.bf16 %v1381_v24, %v1374_v23  ;;  %v1368_v58 = vsub.f32 %v12490_v14, %v1367_v3 }
 0x11d   :  { %v1376_v32 = vand.u32 4294901760, %v1375_v28  ;;  %v1362_v28 = vand.u32 4294901760, %v1361_v57 }
 0x11e   :  { %v1388_v35 = vand.u32 4294901760, %v1387_v30  ;;  %v12472_v1 = vpack.c.bf16 %v1394_v31, %v1387_v30  ;;  %v1369_v29 = vand.u32 4294901760, %v1368_v58 }
 0x11f   :  { %v12464_v37 = vpack.c.bf16 %v1383_v34, %v1376_v32 }
 0x120   :  { %v1389_v39 = vsub.f32 %v1387_v30, %v1388_v35  ;;  %v12478_v6 = vpack.c.bf16 %v1395_v36, %v1388_v35  ;;  %v12515_v35 = vpack.c.bf16 %v1369_v29, %v1362_v28 }
 0x122   :  { %v1390_v46 = vand.u32 4294901760, %v1389_v39  ;;  %v12541_v39 = vpack.c.bf16 %v12490_v14, %v12485_v8 }
 0x123   :  { %v12004_v48 = vpop.eup %12003 }
 0x124   :  { %1250 = vrot.lane.b32.xlu0 %v12004_v48, %s12079_s3  ;;  %v1246_v49 = vmul.f32 0.5, %v12004_v48  ;;  %v1402_v48 = vand.u32 4294901760, %v1401_v40 }
 0x126   :  { %v1247_v50 = vadd.f32 0.5, %v1246_v49  ;;  %v1409_v49 = vand.u32 4294901760, %v1408_v41 }
 0x128   :  { %v1248_v53 = vmul.f32 0.0, %v1247_v50  ;;  %v12480_v7 = vpack.c.bf16 %v1409_v49, %v1402_v48 }
 0x196   :  { %v1251_v51 = vpop.permute.xlu0 %1250 }
 0x197   :  { %v1253_v52 = vmul.f32 %v1251_v51, %v1247_v50  ;;  %v1403_v51 = vsub.f32 %v1401_v40, %v1402_v48  ;;  %v12594_v40 = vpack.c.bf16 %v1367_v3, %v1360_v15 }
 0x199   :  { %1255 = vrot.lane.b32.xlu0 %v1253_v52, %s12080_s24  ;;  %v1410_v52 = vsub.f32 %v1408_v41, %v1409_v49  ;;  %v12637_v49 = vld [vmem:[%s13490_s5] ss:$0 sm:$0xff] }
 0x20b   :  { %v1256_v54 = vpop.permute.xlu0 %1255 }
 0x20c   :  { %v12409_v55 = vadd.f32 %v1256_v54, %v1248_v53  ;;  %v1404_v54 = vand.u32 4294901760, %v1403_v51 }
 0x20e   :  { %12005 = vtanh.f32 %v12409_v55 }
 0x218   :  { %v12006_v62 = vpop.eup %12005 }
 0x219   :  { %1261 = vrot.lane.b32.xlu1 %v12006_v62, %s12079_s3  ;;  %v1411_v62 = vand.u32 4294901760, %v1410_v52 }
 0x21b   :  { %v12468_v63 = vpack.c.bf16 %v1411_v62, %v1404_v54 }
 0x28b   :  { %v1262_v26 = vpop.permute.xlu1 %1261 }
 0x28c   :  { %v1264_v27 = vmul.f32 %v1262_v26, %v1247_v50  ;;  %v1397_v50 = vand.u32 4294901760, %v1396_v44 }
 0x28e   :  { %1266 = vrot.lane.b32.xlu1 %v1264_v27, %s12080_s24  ;;  %v12466_v53 = vpack.c.bf16 %v1397_v50, %v1390_v46 }
 0x300   :  { %v1267_v9 = vpop.permute.xlu1 %1266 }
 0x301   :  { %v1269_v21 = vsel %vm755_vm2, %v1267_v9, 0.0  ;;  %v1831_v22 = vsel %vm755_vm2, %v1267_v9, 0 }
 0x302   :  { %v1272_v23 = vsel %vm1270_vm3, %v1269_v21, 0  ;;  %v12497_v56 = vand.u32 4294901760, %v1831_v22 }
 0x303   :  { %v12505_v59 = vand.u32 4294901760, %v1272_v23 }
 0x304   :  { %v1903_v24 = vsub.f32 %v1831_v22, %v12497_v56 }
 0x305   :  { %v12509_v26 = vsub.f32 %v1272_v23, %v12505_v59 }
 0x306   :  { %v1904_v27 = vand.u32 4294901760, %v1903_v24 }
 0x307   :  { %v1349_v30 = vand.u32 4294901760, %v12509_v26 }
 0x308   :  { %v1905_v31 = vsub.f32 %v1903_v24, %v1904_v27 }
 0x309   :  { %v1350_v32 = vsub.f32 %v12509_v26, %v1349_v30 }
 0x30a   :  { %v1906_v34 = vand.u32 4294901760, %v1905_v31 }
 0x30b   :  { %v1351_v36 = vand.u32 4294901760, %v1350_v32 }
 0x30c   :  { %9789 = vmatmul.mubr.f32.vlgmr.msra.gmra.mrb[6].mxu0 %v1906_v34 }
 0x30d   :  { %9683 = vmatmul.mubr.f32.vlgmr.msra.gmra.mrb[8].mxu1 %v1351_v36  ;;  %11090 = vmatpush3.bf16.msra.mxu0 %v12291_v13 }
 0x30e   :  { %11024 = vmatpush3.bf16.msra.mxu1 %v12515_v35  ;;  %11091 = vmatprep.subr.bf16.mxu0 %v12076_v25 }
 0x30f   :  { %11025 = vmatprep.subr.bf16.mxu1 %v12076_v25  ;;  %9799 = vmatprep.mubr.msk.f32.mxu0 %vm12077_vm1, %v12078_v12 }
 0x310   :  { %9701 = vmatprep.mubr.msk.f32.mxu1 %vm12077_vm1, %v12078_v12 }
 0x311   :  { %11093 = vmatpush3.bf16.msra.mxu0 %v12297_v16 }
 0x312   :  { %11027 = vmatpush3.bf16.msra.mxu1 %v12464_v37  ;;  %11094 = vmatprep.subr.bf16.mxu0 %v12076_v25 }
 0x313   :  { %11028 = vmatprep.subr.bf16.mxu1 %v12076_v25 }
 0x314   :  { %9800 = vmatmul.mubr.f32.vlgmr.msra.gmra.mrb[6].mxu0 %v12497_v56 }
 0x315   :  { %11096 = vmatpush3.bf16.msra.mxu0 %v12309_v17  ;;  %9810 = vmatprep.mubr.msk.f32.mxu0 %vm12077_vm1, %v12078_v12 }
 0x316   :  { %11030 = vmatpush3.bf16.msra.mxu1 %v12466_v53  ;;  %11097 = vmatprep.subr.bf16.mxu0 %v12076_v25 }
 0x317   :  { %11031 = vmatprep.subr.bf16.mxu1 %v12076_v25 }
 0x319   :  { %11099 = vmatpush3.bf16.msra.mxu0 %v12319_v20 }
 0x31a   :  { %11033 = vmatpush3.bf16.msra.mxu1 %v12468_v63  ;;  %11100 = vmatprep.subr.bf16.mxu0 %v12076_v25 }
 0x31b   :  { %11034 = vmatprep.subr.bf16.mxu1 %v12076_v25 }
 0x31c   :  { %9811 = vmatmul.mubr.f32.vlgmr.msra.gmra.mrb[6].mxu0 %v1903_v24 }
 0x31d   :  { %9702 = vmatmul.mubr.f32.vlgmr.msra.gmra.mrb[8].mxu1 %v12505_v59  ;;  %11102 = vmatpush3.bf16.msra.mxu0 %v12230_v42 }
 0x31e   :  { %11036 = vmatpush3.bf16.msra.mxu1 %v12541_v39  ;;  %11103 = vmatprep.subr.bf16.mxu0 %v12076_v25 }
 0x31f   :  { %11037 = vmatprep.subr.bf16.mxu1 %v12076_v25  ;;  %9821 = vmatprep.mubr.msk.f32.mxu0 %vm12077_vm1, %v12078_v12 }
 0x320   :  { %9720 = vmatprep.mubr.msk.f32.mxu1 %vm12077_vm1, %v12078_v12 }
 0x321   :  { %11105 = vmatpush3.bf16.msra.mxu0 %v12261_v61 }
 0x322   :  { %11039 = vmatpush3.bf16.msra.mxu1 %v12470_v0  ;;  %11106 = vmatprep.subr.bf16.mxu0 %v12076_v25 }
 0x323   :  { %11040 = vmatprep.subr.bf16.mxu1 %v12076_v25 }
 0x324   :  { %9822 = vmatmul.mubr.f32.vlgmr.msra.gmra.mrb[6].mxu0 %v1904_v27 }
 0x325   :  { %11108 = vmatpush3.bf16.msra.mxu0 %v12349_v18  ;;  %9832 = vmatprep.mubr.msk.f32.mxu0 %vm12077_vm1, %v12078_v12 }
 0x326   :  { %11042 = vmatpush3.bf16.msra.mxu1 %v12472_v1  ;;  %11109 = vmatprep.subr.bf16.mxu0 %v12076_v25 }
 0x327   :  { %11043 = vmatprep.subr.bf16.mxu1 %v12076_v25 }
 0x329   :  { %11111 = vmatpush3.bf16.msra.mxu0 %v12360_v19 }
 0x32a   :  { %11045 = vmatpush3.bf16.msra.mxu1 %v12474_v2  ;;  %11112 = vmatprep.subr.bf16.mxu0 %v12076_v25 }
 0x32b   :  { %11046 = vmatprep.subr.bf16.mxu1 %v12076_v25 }
 0x32c   :  { %9833 = vmatmul.mubr.f32.vlgmr.msra.gmra.mrb[6].mxu0 %v12497_v56 }
 0x32d   :  { %9721 = vmatmul.mubr.f32.vlgmr.msra.gmra.mrb[8].mxu1 %v12509_v26  ;;  %11114 = vmatpush3.bf16.msra.mxu0 %v12230_v42 }
 0x32e   :  { %11048 = vmatpush3.bf16.msra.mxu1 %v12428_v60  ;;  %11115 = vmatprep.subr.bf16.mxu0 %v12076_v25 }
 0x32f   :  { %11049 = vmatprep.subr.bf16.mxu1 %v12076_v25  ;;  %9843 = vmatprep.mubr.msk.f32.mxu0 %vm12077_vm1, %v12078_v12 }
 0x330   :  { %9739 = vmatprep.mubr.msk.f32.mxu1 %vm12077_vm1, %v12078_v12 }
 0x331   :  { %11117 = vmatpush3.bf16.msra.mxu0 %v12261_v61 }
 0x332   :  { %11051 = vmatpush3.bf16.msra.mxu1 %v12439_v4  ;;  %11118 = vmatprep.subr.bf16.mxu0 %v12076_v25 }
 0x333   :  { %11052 = vmatprep.subr.bf16.mxu1 %v12076_v25 }
 0x334   :  { %9844 = vmatmul.mubr.f32.vlgmr.msra.gmra.mrb[6].mxu0 %v12497_v56 }
 0x335   :  { %11120 = vmatpush3.bf16.msra.mxu0 %v12428_v60  ;;  %9862 = vmatprep.mubr.msk.f32.mxu0 %vm12077_vm1, %v12078_v12 }
 0x336   :  { %11054 = vmatpush3.bf16.msra.mxu1 %v12449_v11  ;;  %11121 = vmatprep.subr.bf16.mxu0 %v12076_v25 }
 0x337   :  { %11055 = vmatprep.subr.bf16.mxu1 %v12076_v25 }
 0x339   :  { %11123 = vmatpush3.bf16.msra.mxu0 %v12439_v4 }
 0x33a   :  { %11057 = vmatpush3.bf16.msra.mxu1 %v12459_v10  ;;  %11124 = vmatprep.subr.bf16.mxu0 %v12076_v25 }
 0x33b   :  { %11058 = vmatprep.subr.bf16.mxu1 %v12076_v25 }
 0x33d   :  { %9740 = vmatmul.mubr.f32.vlgmr.msra.gmra.mrb[8].mxu1 %v1349_v30  ;;  %11126 = vmatpush3.bf16.msra.mxu0 %v12449_v11 }
 0x33e   :  { %11060 = vmatpush3.bf16.msra.mxu1 %v12594_v40  ;;  %9758 = vmatprep.mubr.msk.f32.mxu1 %vm12077_vm1, %v12078_v12 }
 0x33f   :  { %11061 = vmatprep.subr.bf16.mxu1 %v12076_v25  ;;  %11127 = vmatprep.subr.bf16.mxu0 %v12076_v25 }
 0x341   :  { %11129 = vmatpush3.bf16.msra.mxu0 %v12459_v10 }
 0x342   :  { %11063 = vmatpush3.bf16.msra.mxu1 %v12476_v5  ;;  %11130 = vmatprep.subr.bf16.mxu0 %v12076_v25 }
 0x343   :  { %11064 = vmatprep.subr.bf16.mxu1 %v12076_v25 }
 0x346   :  { %11066 = vmatpush3.bf16.msra.mxu1 %v12478_v6 }
 0x347   :  { %11067 = vmatprep.subr.bf16.mxu1 %v12076_v25 }
 0x34a   :  { %11069 = vmatpush3.bf16.msra.mxu1 %v12480_v7 }
 0x34b   :  { %11070 = vmatprep.subr.bf16.mxu1 %v12076_v25 }
 0x34d   :  { %9759 = vmatmul.mubr.f32.vlgmr.msra.gmra.mrb[8].mxu1 %v12505_v59 }
 0x34e   :  { %11072 = vmatpush3.bf16.msra.mxu1 %v12428_v60  ;;  %9777 = vmatprep.mubr.msk.f32.mxu1 %vm12077_vm1, %v12078_v12 }
 0x34f   :  { %11073 = vmatprep.subr.bf16.mxu1 %v12076_v25 }
 0x352   :  { %11075 = vmatpush3.bf16.msra.mxu1 %v12439_v4 }
 0x353   :  { %11076 = vmatprep.subr.bf16.mxu1 %v12076_v25 }
 0x356   :  { %11078 = vmatpush3.bf16.msra.mxu1 %v12449_v11 }
 0x357   :  { %11079 = vmatprep.subr.bf16.mxu1 %v12076_v25 }
 0x35a   :  { %11081 = vmatpush3.bf16.msra.mxu1 %v12459_v10 }
 0x35b   :  { %11190 = vmatprep.subr.bf16.mxu1 %v12076_v25 }
 0x35d   :  { %9778 = vmatmul.mubr.f32.vlgmr.msra.gmra.mrb[8].mxu1 %v12505_v59 }
 0x35e   :  { %11192 = vmatpush3.bf16.msra.mxu1 %v12230_v42  ;;  %9968 = vmatprep.mubr.msk.f32.mxu1 %vm12077_vm1, %v12078_v12 }
 0x35f   :  { %11193 = vmatprep.subr.bf16.mxu1 %v12076_v25 }
 0x362   :  { %11195 = vmatpush3.bf16.msra.mxu1 %v12261_v61 }
 0x363   :  { %11196 = vmatprep.subr.bf16.mxu1 %v12076_v25 }
 0x407   :  { %v2314_v41 = vpop.f32.mrb[6].mxu0 }
 0x408   :  { %v2318_v44 = vadd.f32 %v12397_v33, %v2314_v41  ;;  %v9845_v46 = vpop.f32.mrb[7].mxu0 }
 0x40a   :  { %12007 = vtanh.f32 %v2318_v44 }
 0x414   :  { %v12008_v48 = vpop.eup %12007 }
 0x415   :  { %2324 = vrot.lane.b32.xlu1 %v12008_v48, %s12079_s3  ;;  %v2320_v62 = vmul.f32 0.5, %v12008_v48 }
 0x417   :  { %v2321_v33 = vadd.f32 0.5, %v2320_v62 }
 0x419   :  { %v2322_v22 = vmul.f32 %v2321_v33, %v12409_v55 }
 0x430   :  { %v1807_v50 = vpop.f32.mrb[8].mxu1 }
 0x431   :  { %v11814_v51 = vadd.f32 %v12637_v49, %v1807_v50  ;;  %v9779_v52 = vpop.f32.mrb[9].mxu1 }
 0x433   :  { %12009 = vtanh.f32 %v11814_v51 }
 0x43d   :  { %v12010_v54 = vpop.eup %12009 }
 0x43e   :  { %1816 = vrot.lane.b32.xlu0 %v12010_v54, %s12079_s3  ;;  %v1812_v15 = vmul.f32 0.5, %v12010_v54 }
 0x440   :  { %v1813_v3 = vadd.f32 0.5, %v1812_v15 }
 0x442   :  { %v1814_v58 = vmul.f32 0.0, %v1813_v3 }
 0x487   :  { %v2325_v8 = vpop.permute.xlu1 %2324 }
 0x488   :  { %v2327_v14 = vmul.f32 %v2325_v8, %v2321_v33 }
 0x48a   :  { %2329 = vrot.lane.b32.xlu1 %v2327_v14, %s12080_s24 }
 0x4b0   :  { %v1817_v9 = vpop.permute.xlu0 %1816 }
 0x4b1   :  { %v1819_v21 = vmul.f32 %v1817_v9, %v1813_v3 }
 0x4b3   :  { %1821 = vrot.lane.b32.xlu0 %v1819_v21, %s12080_s24 }
 0x4fc   :  { %v2330_v23 = vpop.permute.xlu1 %2329 }
 0x4fd   :  { %v12644_v56 = vadd.f32 %v2330_v23, %v2322_v22 }
 0x4ff   :  { %12011 = vtanh.f32 %v12644_v56 }
 0x509   :  { %v12012_v57 = vpop.eup %12011 }
 0x50a   :  { %2335 = vrot.lane.b32.xlu1 %v12012_v57, %s12079_s3 }
 0x525   :  { %v1822_v59 = vpop.permute.xlu0 %1821 }
 0x526   :  { %v12648_v24 = vadd.f32 %v1822_v59, %v1814_v58 }
 0x528   :  { %12013 = vtanh.f32 %v12648_v24 }
 0x532   :  { %v12014_v26 = vpop.eup %12013 }
 0x533   :  { %1827 = vrot.lane.b32.xlu0 %v12014_v26, %s12079_s3 }
 0x57c   :  { %v2336_v27 = vpop.permute.xlu1 %2335 }
 0x57d   :  { %v2338_v28 = vmul.f32 %v2336_v27, %v2321_v33 }
 0x57f   :  { %2340 = vrot.lane.b32.xlu0 %v2338_v28, %s12080_s24 }
 0x5a5   :  { %v1828_v55 = vpop.permute.xlu0 %1827 }
 0x5a6   :  { %v1830_v29 = vmul.f32 %v1828_v55, %v1813_v3 }
 0x5a8   :  { %2344 = vrot.lane.b32.xlu1 %v1830_v29, %s12079_s3 }
 0x5f1   :  { %v2341_v30 = vpop.permute.xlu0 %2340 }
 0x5f2   :  { %v2908_v31 = vsel %vm755_vm2, %v2341_v30, 0 }
 0x5f3   :  { %v2979_v32 = vand.u32 4294901760, %v2908_v31 }
 0x5f5   :  { %v2980_v34 = vsub.f32 %v2908_v31, %v2979_v32 }
 0x5f7   :  { %v2981_v36 = vand.u32 4294901760, %v2980_v34 }
 0x5f9   :  { %v2982_v41 = vsub.f32 %v2980_v34, %v2981_v36 }
 0x5fb   :  { %v2983_v44 = vand.u32 4294901760, %v2982_v41 }
 0x5fd   :  { %9969 = vmatmul.mubr.f32.vlgmr.msra.gmra.mrb[10].mxu1 %v2983_v44 }
 0x5fe   :  { %11198 = vmatpush3.bf16.msra.mxu1 %v12291_v13  ;;  %9979 = vmatprep.mubr.msk.f32.mxu1 %vm12077_vm1, %v12078_v12 }
 0x5ff   :  { %11199 = vmatprep.subr.bf16.mxu1 %v12076_v25 }
 0x602   :  { %11201 = vmatpush3.bf16.msra.mxu1 %v12297_v16 }
 0x603   :  { %11202 = vmatprep.subr.bf16.mxu1 %v12076_v25 }
 0x605   :  { %9980 = vmatmul.mubr.f32.vlgmr.msra.gmra.mrb[10].mxu1 %v2979_v32 }
 0x606   :  { %11204 = vmatpush3.bf16.msra.mxu1 %v12309_v17  ;;  %9990 = vmatprep.mubr.msk.f32.mxu1 %vm12077_vm1, %v12078_v12 }
 0x607   :  { %11205 = vmatprep.subr.bf16.mxu1 %v12076_v25 }
 0x60a   :  { %11207 = vmatpush3.bf16.msra.mxu1 %v12319_v20 }
 0x60b   :  { %11208 = vmatprep.subr.bf16.mxu1 %v12076_v25 }
 0x60d   :  { %9991 = vmatmul.mubr.f32.vlgmr.msra.gmra.mrb[10].mxu1 %v2980_v34 }
 0x60e   :  { %11210 = vmatpush3.bf16.msra.mxu1 %v12230_v42  ;;  %10001 = vmatprep.mubr.msk.f32.mxu1 %vm12077_vm1, %v12078_v12 }
 0x60f   :  { %11211 = vmatprep.subr.bf16.mxu1 %v12076_v25 }
 0x612   :  { %11213 = vmatpush3.bf16.msra.mxu1 %v12261_v61 }
 0x613   :  { %11214 = vmatprep.subr.bf16.mxu1 %v12076_v25 }
 0x615   :  { %10002 = vmatmul.mubr.f32.vlgmr.msra.gmra.mrb[10].mxu1 %v2981_v36 }
 0x616   :  { %11216 = vmatpush3.bf16.msra.mxu1 %v12349_v18  ;;  %10012 = vmatprep.mubr.msk.f32.mxu1 %vm12077_vm1, %v12078_v12 }
 0x617   :  { %11217 = vmatprep.subr.bf16.mxu1 %v12076_v25 }
 0x61a   :  { %v2345_v46 = vpop.permute.xlu1 %2344  ;;  %11219 = vmatpush3.bf16.msra.mxu1 %v12360_v19 }
 0x61b   :  { %v2347_v48 = vsel %vm755_vm2, %v2341_v30, %v2345_v46  ;;  %11220 = vmatprep.subr.bf16.mxu1 %v12076_v25 }
 0x61c   :  { %v2349_v50 = vsel %vm1270_vm3, %v2347_v48, 0 }
 0x61d   :  { %v12681_v51 = vand.u32 4294901760, %v2349_v50  ;;  %10013 = vmatmul.mubr.f32.vlgmr.msra.gmra.mrb[10].mxu1 %v2979_v32 }
 0x61e   :  { %11222 = vmatpush3.bf16.msra.mxu1 %v12230_v42  ;;  %10023 = vmatprep.mubr.msk.f32.mxu1 %vm12077_vm1, %v12078_v12 }
 0x61f   :  { %v2425_v52 = vsub.f32 %v2349_v50, %v12681_v51  ;;  %11223 = vmatprep.subr.bf16.mxu1 %v12076_v25 }
 0x621   :  { %v2426_v54 = vand.u32 4294901760, %v2425_v52 }
 0x622   :  { %11225 = vmatpush3.bf16.msra.mxu1 %v12261_v61 }
 0x623   :  { %v2427_v62 = vsub.f32 %v2425_v52, %v2426_v54  ;;  %11226 = vmatprep.subr.bf16.mxu1 %v12076_v25 }
 0x625   :  { %10024 = vmatmul.mubr.f32.vlgmr.msra.gmra.mrb[10].mxu1 %v2979_v32  ;;  %v2428_v33 = vand.u32 4294901760, %v2427_v62 }
 0x626   :  { %11228 = vmatpush3.bf16.msra.mxu1 %v12428_v60  ;;  %10042 = vmatprep.mubr.msk.f32.mxu1 %vm12077_vm1, %v12078_v12 }
 0x627   :  { %9863 = vmatmul.mubr.f32.vlgmr.msra.gmra.mrb[8].mxu0 %v2428_v33  ;;  %11229 = vmatprep.subr.bf16.mxu1 %v12076_v25 }
 0x628   :  { %11132 = vmatpush3.bf16.msra.mxu0 %v12515_v35  ;;  %9881 = vmatprep.mubr.msk.f32.mxu0 %vm12077_vm1, %v12078_v12 }
 0x629   :  { %11133 = vmatprep.subr.bf16.mxu0 %v12076_v25 }
 0x62a   :  { %11231 = vmatpush3.bf16.msra.mxu1 %v12439_v4 }
 0x62b   :  { %11232 = vmatprep.subr.bf16.mxu1 %v12076_v25 }
 0x62c   :  { %11135 = vmatpush3.bf16.msra.mxu0 %v12464_v37 }
 0x62d   :  { %11136 = vmatprep.subr.bf16.mxu0 %v12076_v25 }
 0x62e   :  { %11234 = vmatpush3.bf16.msra.mxu1 %v12449_v11 }
 0x62f   :  { %11235 = vmatprep.subr.bf16.mxu1 %v12076_v25 }
 0x630   :  { %11138 = vmatpush3.bf16.msra.mxu0 %v12466_v53 }
 0x631   :  { %11139 = vmatprep.subr.bf16.mxu0 %v12076_v25 }
 0x632   :  { %11237 = vmatpush3.bf16.msra.mxu1 %v12459_v10 }
 0x633   :  { %11238 = vmatprep.subr.bf16.mxu1 %v12076_v25 }
 0x634   :  { %11141 = vmatpush3.bf16.msra.mxu0 %v12468_v63 }
 0x635   :  { %11142 = vmatprep.subr.bf16.mxu0 %v12076_v25 }
 0x637   :  { %9882 = vmatmul.mubr.f32.vlgmr.msra.gmra.mrb[8].mxu0 %v12681_v51 }
 0x638   :  { %11144 = vmatpush3.bf16.msra.mxu0 %v12541_v39  ;;  %9900 = vmatprep.mubr.msk.f32.mxu0 %vm12077_vm1, %v12078_v12 }
 0x639   :  { %11145 = vmatprep.subr.bf16.mxu0 %v12076_v25 }
 0x63c   :  { %11147 = vmatpush3.bf16.msra.mxu0 %v12470_v0 }
 0x63d   :  { %11148 = vmatprep.subr.bf16.mxu0 %v12076_v25 }
 0x640   :  { %11150 = vmatpush3.bf16.msra.mxu0 %v12472_v1 }
 0x641   :  { %11151 = vmatprep.subr.bf16.mxu0 %v12076_v25 }
 0x644   :  { %11153 = vmatpush3.bf16.msra.mxu0 %v12474_v2 }
 0x645   :  { %11154 = vmatprep.subr.bf16.mxu0 %v12076_v25 }
 0x647   :  { %9901 = vmatmul.mubr.f32.vlgmr.msra.gmra.mrb[8].mxu0 %v2425_v52 }
 0x648   :  { %11156 = vmatpush3.bf16.msra.mxu0 %v12428_v60  ;;  %9919 = vmatprep.mubr.msk.f32.mxu0 %vm12077_vm1, %v12078_v12 }
 0x649   :  { %11157 = vmatprep.subr.bf16.mxu0 %v12076_v25 }
 0x64c   :  { %11159 = vmatpush3.bf16.msra.mxu0 %v12439_v4 }
 0x64d   :  { %11160 = vmatprep.subr.bf16.mxu0 %v12076_v25 }
 0x650   :  { %11162 = vmatpush3.bf16.msra.mxu0 %v12449_v11 }
 0x651   :  { %11163 = vmatprep.subr.bf16.mxu0 %v12076_v25 }
 0x654   :  { %11165 = vmatpush3.bf16.msra.mxu0 %v12459_v10 }
 0x655   :  { %11166 = vmatprep.subr.bf16.mxu0 %v12076_v25 }
 0x657   :  { %9920 = vmatmul.mubr.f32.vlgmr.msra.gmra.mrb[8].mxu0 %v2426_v54 }
 0x658   :  { %11168 = vmatpush3.bf16.msra.mxu0 %v12594_v40  ;;  %9938 = vmatprep.mubr.msk.f32.mxu0 %vm12077_vm1, %v12078_v12 }
 0x659   :  { %11169 = vmatprep.subr.bf16.mxu0 %v12076_v25 }
 0x65c   :  { %11171 = vmatpush3.bf16.msra.mxu0 %v12476_v5 }
 0x65d   :  { %11172 = vmatprep.subr.bf16.mxu0 %v12076_v25 }
 0x660   :  { %11174 = vmatpush3.bf16.msra.mxu0 %v12478_v6 }
 0x661   :  { %11175 = vmatprep.subr.bf16.mxu0 %v12076_v25 }
 0x664   :  { %11177 = vmatpush3.bf16.msra.mxu0 %v12480_v7 }
 0x665   :  { %11178 = vmatprep.subr.bf16.mxu0 %v12076_v25 }
 0x667   :  { %9939 = vmatmul.mubr.f32.vlgmr.msra.gmra.mrb[8].mxu0 %v12681_v51 }
 0x668   :  { %11180 = vmatpush3.bf16.msra.mxu0 %v12428_v60  ;;  %9957 = vmatprep.mubr.msk.f32.mxu0 %vm12077_vm1, %v12078_v12 }
 0x669   :  { %11181 = vmatprep.subr.bf16.mxu0 %v12076_v25 }
 0x66c   :  { %11183 = vmatpush3.bf16.msra.mxu0 %v12439_v4 }
 0x66d   :  { %11184 = vmatprep.subr.bf16.mxu0 %v12076_v25 }
 0x670   :  { %11186 = vmatpush3.bf16.msra.mxu0 %v12449_v11 }
 0x671   :  { %11187 = vmatprep.subr.bf16.mxu0 %v12076_v25 }
 0x674   :  { %11189 = vmatpush3.bf16.msra.mxu0 %v12459_v10 }
 0x675   :  { %11298 = vmatprep.subr.bf16.mxu0 %v12076_v25 }
 0x677   :  { %9958 = vmatmul.mubr.f32.vlgmr.msra.gmra.mrb[8].mxu0 %v12681_v51 }
 0x678   :  { %11300 = vmatpush3.bf16.msra.mxu0 %v12230_v42  ;;  %10148 = vmatprep.mubr.msk.f32.mxu0 %vm12077_vm1, %v12078_v12 }
 0x679   :  { %11301 = vmatprep.subr.bf16.mxu0 %v12076_v25 }
 0x67c   :  { %11303 = vmatpush3.bf16.msra.mxu0 %v12261_v61 }
 0x67d   :  { %11304 = vmatprep.subr.bf16.mxu0 %v12076_v25 }
 0x6f8   :  { %v3391_v8 = vpop.f32.mrb[10].mxu1 }
 0x6f9   :  { %v3395_v14 = vadd.f32 %v12401_v43, %v3391_v8  ;;  %v10025_v15 = vpop.f32.mrb[11].mxu1 }
 0x6fb   :  { %12015 = vtanh.f32 %v3395_v14 }
 0x705   :  { %v12016_v3 = vpop.eup %12015 }
 0x706   :  { %3401 = vrot.lane.b32.xlu1 %v12016_v3, %s12079_s3  ;;  %v3397_v57 = vmul.f32 0.5, %v12016_v3 }
 0x708   :  { %v3398_v58 = vadd.f32 0.5, %v3397_v57 }
 0x70a   :  { %v3399_v29 = vmul.f32 %v3398_v58, %v12644_v56 }
 0x74a   :  { %v2884_v9 = vpop.f32.mrb[8].mxu0 }
 0x74b   :  { %v11815_v21 = vadd.f32 %v12637_v49, %v2884_v9  ;;  %v9959_v22 = vpop.f32.mrb[9].mxu0 }
 0x74d   :  { %12017 = vtanh.f32 %v11815_v21 }
 0x757   :  { %v12018_v23 = vpop.eup %12017 }
 0x758   :  { %2893 = vrot.lane.b32.xlu0 %v12018_v23, %s12079_s3  ;;  %v2889_v43 = vmul.f32 0.5, %v12018_v23 }
 0x75a   :  { %v2890_v27 = vadd.f32 0.5, %v2889_v43 }
 0x75c   :  { %v2891_v34 = vmul.f32 %v2890_v27, %v12648_v24 }
 0x778   :  { %v3402_v59 = vpop.permute.xlu1 %3401 }
 0x779   :  { %v3404_v26 = vmul.f32 %v3402_v59, %v3398_v58 }
 0x77b   :  { %3406 = vrot.lane.b32.xlu1 %v3404_v26, %s12080_s24 }
 0x7ca   :  { %v2894_v28 = vpop.permute.xlu0 %2893 }
 0x7cb   :  { %v2896_v55 = vmul.f32 %v2894_v28, %v2890_v27 }
 0x7cd   :  { %2898 = vrot.lane.b32.xlu0 %v2896_v55, %s12080_s24 }
 0x7ed   :  { %v3407_v30 = vpop.permute.xlu1 %3406 }
 0x7ee   :  { %v12766_v31 = vadd.f32 %v3407_v30, %v3399_v29 }
 0x7f0   :  { %12019 = vtanh.f32 %v12766_v31 }
 0x7fa   :  { %v12020_v32 = vpop.eup %12019 }
 0x7fb   :  { %3412 = vrot.lane.b32.xlu1 %v12020_v32, %s12079_s3 }
 0x83f   :  { %v2899_v36 = vpop.permute.xlu0 %2898 }
 0x840   :  { %v12771_v41 = vadd.f32 %v2899_v36, %v2891_v34 }
 0x842   :  { %12021 = vtanh.f32 %v12771_v41 }
 0x84c   :  { %v12022_v44 = vpop.eup %12021 }
 0x84d   :  { %2904 = vrot.lane.b32.xlu0 %v12022_v44, %s12079_s3 }
 0x86d   :  { %v3413_v46 = vpop.permute.xlu1 %3412 }
 0x86e   :  { %v3415_v56 = vmul.f32 %v3413_v46, %v3398_v58 }
 0x870   :  { %3417 = vrot.lane.b32.xlu0 %v3415_v56, %s12080_s24 }
 0x8bf   :  { %v2905_v48 = vpop.permute.xlu0 %2904 }
 0x8c0   :  { %v2907_v50 = vmul.f32 %v2905_v48, %v2890_v27 }
 0x8c2   :  { %3421 = vrot.lane.b32.xlu1 %v2907_v50, %s12079_s3 }
 0x8e2   :  { %v3418_v51 = vpop.permute.xlu0 %3417 }
 0x8e3   :  { %v3985_v52 = vsel %vm755_vm2, %v3418_v51, 0 }
 0x8e4   :  { %v4056_v24 = vand.u32 4294901760, %v3985_v52 }
 0x8e6   :  { %v4057_v54 = vsub.f32 %v3985_v52, %v4056_v24 }
 0x8e8   :  { %v4058_v62 = vand.u32 4294901760, %v4057_v54 }
 0x8ea   :  { %v4059_v33 = vsub.f32 %v4057_v54, %v4058_v62 }
 0x8ec   :  { %v4060_v8 = vand.u32 4294901760, %v4059_v33 }
 0x8ee   :  { %10149 = vmatmul.mubr.f32.vlgmr.msra.gmra.mrb[10].mxu0 %v4060_v8 }
 0x8ef   :  { %11306 = vmatpush3.bf16.msra.mxu0 %v12291_v13  ;;  %10159 = vmatprep.mubr.msk.f32.mxu0 %vm12077_vm1, %v12078_v12 }
 0x8f0   :  { %11307 = vmatprep.subr.bf16.mxu0 %v12076_v25 }
 0x8f3   :  { %11309 = vmatpush3.bf16.msra.mxu0 %v12297_v16 }
 0x8f4   :  { %11310 = vmatprep.subr.bf16.mxu0 %v12076_v25 }
 0x8f6   :  { %10160 = vmatmul.mubr.f32.vlgmr.msra.gmra.mrb[10].mxu0 %v4056_v24 }
 0x8f7   :  { %11312 = vmatpush3.bf16.msra.mxu0 %v12309_v17  ;;  %10170 = vmatprep.mubr.msk.f32.mxu0 %vm12077_vm1, %v12078_v12 }
 0x8f8   :  { %11313 = vmatprep.subr.bf16.mxu0 %v12076_v25 }
 0x8fb   :  { %11315 = vmatpush3.bf16.msra.mxu0 %v12319_v20 }
 0x8fc   :  { %11316 = vmatprep.subr.bf16.mxu0 %v12076_v25 }
 0x8fe   :  { %10171 = vmatmul.mubr.f32.vlgmr.msra.gmra.mrb[10].mxu0 %v4057_v54 }
 0x8ff   :  { %11318 = vmatpush3.bf16.msra.mxu0 %v12230_v42  ;;  %10181 = vmatprep.mubr.msk.f32.mxu0 %vm12077_vm1, %v12078_v12 }
 0x900   :  { %11319 = vmatprep.subr.bf16.mxu0 %v12076_v25 }
 0x903   :  { %11321 = vmatpush3.bf16.msra.mxu0 %v12261_v61 }
 0x904   :  { %11322 = vmatprep.subr.bf16.mxu0 %v12076_v25 }
 0x906   :  { %10182 = vmatmul.mubr.f32.vlgmr.msra.gmra.mrb[10].mxu0 %v4058_v62 }
 0x907   :  { %11324 = vmatpush3.bf16.msra.mxu0 %v12349_v18  ;;  %10192 = vmatprep.mubr.msk.f32.mxu0 %vm12077_vm1, %v12078_v12 }
 0x908   :  { %11325 = vmatprep.subr.bf16.mxu0 %v12076_v25 }
 0x90b   :  { %11327 = vmatpush3.bf16.msra.mxu0 %v12360_v19 }
 0x90c   :  { %11328 = vmatprep.subr.bf16.mxu0 %v12076_v25 }
 0x90e   :  { %10193 = vmatmul.mubr.f32.vlgmr.msra.gmra.mrb[10].mxu0 %v4056_v24 }
 0x90f   :  { %11330 = vmatpush3.bf16.msra.mxu0 %v12230_v42  ;;  %10203 = vmatprep.mubr.msk.f32.mxu0 %vm12077_vm1, %v12078_v12 }
 0x910   :  { %11331 = vmatprep.subr.bf16.mxu0 %v12076_v25 }
 0x913   :  { %11333 = vmatpush3.bf16.msra.mxu0 %v12261_v61 }
 0x914   :  { %11334 = vmatprep.subr.bf16.mxu0 %v12076_v25 }
 0x916   :  { %10204 = vmatmul.mubr.f32.vlgmr.msra.gmra.mrb[10].mxu0 %v4056_v24 }
 0x917   :  { %11336 = vmatpush3.bf16.msra.mxu0 %v12428_v60  ;;  %10222 = vmatprep.mubr.msk.f32.mxu0 %vm12077_vm1, %v12078_v12 }
 0x918   :  { %11337 = vmatprep.subr.bf16.mxu0 %v12076_v25 }
 0x91b   :  { %11339 = vmatpush3.bf16.msra.mxu0 %v12439_v4 }
 0x91c   :  { %11340 = vmatprep.subr.bf16.mxu0 %v12076_v25 }
 0x91f   :  { %11342 = vmatpush3.bf16.msra.mxu0 %v12449_v11 }
 0x920   :  { %11343 = vmatprep.subr.bf16.mxu0 %v12076_v25 }
 0x923   :  { %11345 = vmatpush3.bf16.msra.mxu0 %v12459_v10 }
 0x924   :  { %11346 = vmatprep.subr.bf16.mxu0 %v12076_v25 }
 0x934   :  { %v3422_v14 = vpop.permute.xlu1 %3421 }
 0x935   :  { %v3424_v15 = vsel %vm755_vm2, %v3418_v51, %v3422_v14 }
 0x936   :  { %v3426_v3 = vsel %vm1270_vm3, %v3424_v15, 0 }
 0x937   :  { %v3501_v9 = vand.u32 4294901760, %v3426_v3 }
 0x939   :  { %v3502_v21 = vsub.f32 %v3426_v3, %v3501_v9 }
 0x93b   :  { %v3503_v22 = vand.u32 4294901760, %v3502_v21 }
 0x93d   :  { %v3504_v23 = vsub.f32 %v3502_v21, %v3503_v22 }
 0x93f   :  { %v3505_v57 = vand.u32 4294901760, %v3504_v23 }
 0x941   :  { %10043 = vmatmul.mubr.f32.vlgmr.msra.gmra.mrb[12].mxu1 %v3505_v57 }
 0x942   :  { %11240 = vmatpush3.bf16.msra.mxu1 %v12515_v35  ;;  %10061 = vmatprep.mubr.msk.f32.mxu1 %vm12077_vm1, %v12078_v12 }
 0x943   :  { %11241 = vmatprep.subr.bf16.mxu1 %v12076_v25 }
 0x946   :  { %11243 = vmatpush3.bf16.msra.mxu1 %v12464_v37 }
 0x947   :  { %11244 = vmatprep.subr.bf16.mxu1 %v12076_v25 }
 0x94a   :  { %11246 = vmatpush3.bf16.msra.mxu1 %v12466_v53 }
 0x94b   :  { %11247 = vmatprep.subr.bf16.mxu1 %v12076_v25 }
 0x94e   :  { %11249 = vmatpush3.bf16.msra.mxu1 %v12468_v63 }
 0x94f   :  { %11250 = vmatprep.subr.bf16.mxu1 %v12076_v25 }
 0x951   :  { %10062 = vmatmul.mubr.f32.vlgmr.msra.gmra.mrb[12].mxu1 %v3501_v9 }
 0x952   :  { %11252 = vmatpush3.bf16.msra.mxu1 %v12541_v39  ;;  %10080 = vmatprep.mubr.msk.f32.mxu1 %vm12077_vm1, %v12078_v12 }
 0x953   :  { %11253 = vmatprep.subr.bf16.mxu1 %v12076_v25 }
 0x956   :  { %11255 = vmatpush3.bf16.msra.mxu1 %v12470_v0 }
 0x957   :  { %11256 = vmatprep.subr.bf16.mxu1 %v12076_v25 }
 0x95a   :  { %11258 = vmatpush3.bf16.msra.mxu1 %v12472_v1 }
 0x95b   :  { %11259 = vmatprep.subr.bf16.mxu1 %v12076_v25 }
 0x95e   :  { %11261 = vmatpush3.bf16.msra.mxu1 %v12474_v2 }
 0x95f   :  { %11262 = vmatprep.subr.bf16.mxu1 %v12076_v25 }
 0x961   :  { %10081 = vmatmul.mubr.f32.vlgmr.msra.gmra.mrb[12].mxu1 %v3502_v21 }
 0x962   :  { %11264 = vmatpush3.bf16.msra.mxu1 %v12428_v60  ;;  %10099 = vmatprep.mubr.msk.f32.mxu1 %vm12077_vm1, %v12078_v12 }
 0x963   :  { %11265 = vmatprep.subr.bf16.mxu1 %v12076_v25 }
 0x966   :  { %11267 = vmatpush3.bf16.msra.mxu1 %v12439_v4 }
 0x967   :  { %11268 = vmatprep.subr.bf16.mxu1 %v12076_v25 }
 0x96a   :  { %11270 = vmatpush3.bf16.msra.mxu1 %v12449_v11 }
 0x96b   :  { %11271 = vmatprep.subr.bf16.mxu1 %v12076_v25 }
 0x96e   :  { %11273 = vmatpush3.bf16.msra.mxu1 %v12459_v10 }
 0x96f   :  { %11274 = vmatprep.subr.bf16.mxu1 %v12076_v25 }
 0x971   :  { %10100 = vmatmul.mubr.f32.vlgmr.msra.gmra.mrb[12].mxu1 %v3503_v22 }
 0x972   :  { %11276 = vmatpush3.bf16.msra.mxu1 %v12594_v40  ;;  %10118 = vmatprep.mubr.msk.f32.mxu1 %vm12077_vm1, %v12078_v12 }
 0x973   :  { %11277 = vmatprep.subr.bf16.mxu1 %v12076_v25 }
 0x976   :  { %11279 = vmatpush3.bf16.msra.mxu1 %v12476_v5 }
 0x977   :  { %11280 = vmatprep.subr.bf16.mxu1 %v12076_v25 }
 0x97a   :  { %11282 = vmatpush3.bf16.msra.mxu1 %v12478_v6 }
 0x97b   :  { %11283 = vmatprep.subr.bf16.mxu1 %v12076_v25 }
 0x97e   :  { %11285 = vmatpush3.bf16.msra.mxu1 %v12480_v7 }
 0x97f   :  { %11286 = vmatprep.subr.bf16.mxu1 %v12076_v25 }
 0x981   :  { %10119 = vmatmul.mubr.f32.vlgmr.msra.gmra.mrb[12].mxu1 %v3501_v9 }
 0x982   :  { %11288 = vmatpush3.bf16.msra.mxu1 %v12428_v60  ;;  %10137 = vmatprep.mubr.msk.f32.mxu1 %vm12077_vm1, %v12078_v12 }
 0x983   :  { %11289 = vmatprep.subr.bf16.mxu1 %v12076_v25 }
 0x986   :  { %11291 = vmatpush3.bf16.msra.mxu1 %v12439_v4 }
 0x987   :  { %11292 = vmatprep.subr.bf16.mxu1 %v12076_v25 }
 0x98a   :  { %11294 = vmatpush3.bf16.msra.mxu1 %v12449_v11 }
 0x98b   :  { %11295 = vmatprep.subr.bf16.mxu1 %v12076_v25 }
 0x98e   :  { %11297 = vmatpush3.bf16.msra.mxu1 %v12459_v10 }
 0x98f   :  { %11406 = vmatprep.subr.bf16.mxu1 %v12076_v25 }
 0x991   :  { %10138 = vmatmul.mubr.f32.vlgmr.msra.gmra.mrb[12].mxu1 %v3501_v9 }
 0x992   :  { %11408 = vmatpush3.bf16.msra.mxu1 %v12230_v42  ;;  %10328 = vmatprep.mubr.msk.f32.mxu1 %vm12077_vm1, %v12078_v12 }
 0x993   :  { %11409 = vmatprep.subr.bf16.mxu1 %v12076_v25 }
 0x996   :  { %11411 = vmatpush3.bf16.msra.mxu1 %v12261_v61 }
 0x997   :  { %11412 = vmatprep.subr.bf16.mxu1 %v12076_v25 }
 0x9e9   :  { %v4468_v58 = vpop.f32.mrb[10].mxu0 }
 0x9ea   :  { %v4472_v59 = vadd.f32 %v12399_v38, %v4468_v58  ;;  %v10205_v26 = vpop.f32.mrb[11].mxu0 }
 0x9ec   :  { %12023 = vtanh.f32 %v4472_v59 }
 0x9f6   :  { %v12024_v43 = vpop.eup %12023 }
 0x9f7   :  { %4478 = vrot.lane.b32.xlu1 %v12024_v43, %s12079_s3  ;;  %v4474_v28 = vmul.f32 0.5, %v12024_v43 }
 0x9f9   :  { %v4475_v30 = vadd.f32 0.5, %v4474_v28 }
 0x9fb   :  { %v4476_v38 = vmul.f32 %v4475_v30, %v12766_v31 }
 0xa64   :  { %v3961_v27 = vpop.f32.mrb[12].mxu1 }
 0xa65   :  { %v11816_v55 = vadd.f32 %v12637_v49, %v3961_v27  ;;  %v10139_v29 = vpop.f32.mrb[13].mxu1 }
 0xa67   :  { %12025 = vtanh.f32 %v11816_v55 }
 0xa69   :  { %v4479_v32 = vpop.permute.xlu1 %4478 }
 0xa6a   :  { %v4481_v34 = vmul.f32 %v4479_v32, %v4475_v30 }
 0xa6c   :  { %4483 = vrot.lane.b32.xlu1 %v4481_v34, %s12080_s24 }
 0xa71   :  { %v12026_v36 = vpop.eup %12025 }
 0xa72   :  { %3970 = vrot.lane.b32.xlu0 %v12026_v36, %s12079_s3  ;;  %v3966_v56 = vmul.f32 0.5, %v12026_v36 }
 0xa74   :  { %v3967_v48 = vadd.f32 0.5, %v3966_v56 }
 0xa76   :  { %v3968_v24 = vmul.f32 %v3967_v48, %v12771_v41 }
 0xade   :  { %v4484_v44 = vpop.permute.xlu1 %4483 }
 0xadf   :  { %v12882_v46 = vadd.f32 %v4484_v44, %v4476_v38 }
 0xae1   :  { %12027 = vtanh.f32 %v12882_v46 }
 0xae4   :  { %v3971_v50 = vpop.permute.xlu0 %3970 }
 0xae5   :  { %v3973_v51 = vmul.f32 %v3971_v50, %v3967_v48 }
 0xae7   :  { %3975 = vrot.lane.b32.xlu0 %v3973_v51, %s12080_s24 }
 0xaeb   :  { %v12028_v52 = vpop.eup %12027 }
 0xaec   :  { %4489 = vrot.lane.b32.xlu1 %v12028_v52, %s12079_s3 }
 0xb59   :  { %v3976_v54 = vpop.permute.xlu0 %3975 }
 0xb5a   :  { %v12888_v62 = vadd.f32 %v3976_v54, %v3968_v24 }
 0xb5c   :  { %12029 = vtanh.f32 %v12888_v62 }
 0xb5e   :  { %v4490_v33 = vpop.permute.xlu1 %4489 }
 0xb5f   :  { %v4492_v8 = vmul.f32 %v4490_v33, %v4475_v30 }
 0xb66   :  { %v12030_v31 = vpop.eup %12029 }
 0xb67   :  { %3981 = vrot.lane.b32.xlu0 %v12030_v31, %s12079_s3 }
 0xb6b   :  { %4494 = vrot.lane.b32.xlu0 %v4492_v8, %s12080_s24 }
 0xbd9   :  { %v3982_v14 = vpop.permute.xlu0 %3981 }
 0xbda   :  { %v3984_v15 = vmul.f32 %v3982_v14, %v3967_v48 }
 0xbdc   :  { %4498 = vrot.lane.b32.xlu1 %v3984_v15, %s12079_s3 }
 0xbdd   :  { %v4495_v3 = vpop.permute.xlu0 %4494 }
 0xbde   :  { %v5062_v9 = vsel %vm755_vm2, %v4495_v3, 0 }
 0xbdf   :  { %v5133_v41 = vand.u32 4294901760, %v5062_v9 }
 0xbe1   :  { %v5134_v21 = vsub.f32 %v5062_v9, %v5133_v41 }
 0xbe3   :  { %v5135_v22 = vand.u32 4294901760, %v5134_v21 }
 0xbe5   :  { %v5136_v23 = vsub.f32 %v5134_v21, %v5135_v22 }
 0xbe7   :  { %v5137_v57 = vand.u32 4294901760, %v5136_v23 }
 0xbe9   :  { %10329 = vmatmul.mubr.f32.vlgmr.msra.gmra.mrb[14].mxu1 %v5137_v57 }
 0xbea   :  { %11414 = vmatpush3.bf16.msra.mxu1 %v12291_v13  ;;  %10339 = vmatprep.mubr.msk.f32.mxu1 %vm12077_vm1, %v12078_v12 }
 0xbeb   :  { %11415 = vmatprep.subr.bf16.mxu1 %v12076_v25 }
 0xbee   :  { %11417 = vmatpush3.bf16.msra.mxu1 %v12297_v16 }
 0xbef   :  { %11418 = vmatprep.subr.bf16.mxu1 %v12076_v25 }
 0xbf1   :  { %10340 = vmatmul.mubr.f32.vlgmr.msra.gmra.mrb[14].mxu1 %v5133_v41 }
 0xbf2   :  { %11420 = vmatpush3.bf16.msra.mxu1 %v12309_v17  ;;  %10350 = vmatprep.mubr.msk.f32.mxu1 %vm12077_vm1, %v12078_v12 }
 0xbf3   :  { %11421 = vmatprep.subr.bf16.mxu1 %v12076_v25 }
 0xbf6   :  { %11423 = vmatpush3.bf16.msra.mxu1 %v12319_v20 }
 0xbf7   :  { %11424 = vmatprep.subr.bf16.mxu1 %v12076_v25 }
 0xbf9   :  { %10351 = vmatmul.mubr.f32.vlgmr.msra.gmra.mrb[14].mxu1 %v5134_v21 }
 0xbfa   :  { %11426 = vmatpush3.bf16.msra.mxu1 %v12230_v42  ;;  %10361 = vmatprep.mubr.msk.f32.mxu1 %vm12077_vm1, %v12078_v12 }
 0xbfb   :  { %11427 = vmatprep.subr.bf16.mxu1 %v12076_v25 }
 0xbfe   :  { %11429 = vmatpush3.bf16.msra.mxu1 %v12261_v61 }
 0xbff   :  { %11430 = vmatprep.subr.bf16.mxu1 %v12076_v25 }
 0xc01   :  { %10362 = vmatmul.mubr.f32.vlgmr.msra.gmra.mrb[14].mxu1 %v5135_v22 }
 0xc02   :  { %11432 = vmatpush3.bf16.msra.mxu1 %v12349_v18  ;;  %10372 = vmatprep.mubr.msk.f32.mxu1 %vm12077_vm1, %v12078_v12 }
 0xc03   :  { %11433 = vmatprep.subr.bf16.mxu1 %v12076_v25 }
 0xc06   :  { %11435 = vmatpush3.bf16.msra.mxu1 %v12360_v19 }
 0xc07   :  { %11436 = vmatprep.subr.bf16.mxu1 %v12076_v25 }
 0xc09   :  { %10373 = vmatmul.mubr.f32.vlgmr.msra.gmra.mrb[14].mxu1 %v5133_v41 }
 0xc0a   :  { %11438 = vmatpush3.bf16.msra.mxu1 %v12230_v42  ;;  %10383 = vmatprep.mubr.msk.f32.mxu1 %vm12077_vm1, %v12078_v12 }
 0xc0b   :  { %11439 = vmatprep.subr.bf16.mxu1 %v12076_v25 }
 0xc0e   :  { %11441 = vmatpush3.bf16.msra.mxu1 %v12261_v61 }
 0xc0f   :  { %11442 = vmatprep.subr.bf16.mxu1 %v12076_v25 }
 0xc11   :  { %10384 = vmatmul.mubr.f32.vlgmr.msra.gmra.mrb[14].mxu1 %v5133_v41 }
 0xc12   :  { %11444 = vmatpush3.bf16.msra.mxu1 %v12428_v60  ;;  %10402 = vmatprep.mubr.msk.f32.mxu1 %vm12077_vm1, %v12078_v12 }
 0xc13   :  { %11445 = vmatprep.subr.bf16.mxu1 %v12076_v25 }
 0xc16   :  { %11447 = vmatpush3.bf16.msra.mxu1 %v12439_v4 }
 0xc17   :  { %11448 = vmatprep.subr.bf16.mxu1 %v12076_v25 }
 0xc1a   :  { %11450 = vmatpush3.bf16.msra.mxu1 %v12449_v11 }
 0xc1b   :  { %11451 = vmatprep.subr.bf16.mxu1 %v12076_v25 }
 0xc1e   :  { %11453 = vmatpush3.bf16.msra.mxu1 %v12459_v10 }
 0xc1f   :  { %11454 = vmatprep.subr.bf16.mxu1 %v12076_v25 }
 0xc4e   :  { %v4499_v58 = vpop.permute.xlu1 %4498 }
 0xc4f   :  { %v4501_v59 = vsel %vm755_vm2, %v4495_v3, %v4499_v58 }
 0xc50   :  { %v4503_v26 = vsel %vm1270_vm3, %v4501_v59, 0 }
 0xc51   :  { %v4578_v43 = vand.u32 4294901760, %v4503_v26 }
 0xc53   :  { %v4579_v27 = vsub.f32 %v4503_v26, %v4578_v43 }
 0xc55   :  { %v4580_v28 = vand.u32 4294901760, %v4579_v27 }
 0xc57   :  { %v4581_v55 = vsub.f32 %v4579_v27, %v4580_v28 }
 0xc59   :  { %v4582_v29 = vand.u32 4294901760, %v4581_v55 }
 0xc5b   :  { %10223 = vmatmul.mubr.f32.vlgmr.msra.gmra.mrb[12].mxu0 %v4582_v29 }
 0xc5c   :  { %11348 = vmatpush3.bf16.msra.mxu0 %v12515_v35  ;;  %10241 = vmatprep.mubr.msk.f32.mxu0 %vm12077_vm1, %v12078_v12 }
 0xc5d   :  { %11349 = vmatprep.subr.bf16.mxu0 %v12076_v25 }
 0xc60   :  { %11351 = vmatpush3.bf16.msra.mxu0 %v12464_v37 }
 0xc61   :  { %11352 = vmatprep.subr.bf16.mxu0 %v12076_v25 }
 0xc64   :  { %11354 = vmatpush3.bf16.msra.mxu0 %v12466_v53 }
 0xc65   :  { %11355 = vmatprep.subr.bf16.mxu0 %v12076_v25 }
 0xc68   :  { %11357 = vmatpush3.bf16.msra.mxu0 %v12468_v63 }
 0xc69   :  { %11358 = vmatprep.subr.bf16.mxu0 %v12076_v25 }
 0xc6b   :  { %10242 = vmatmul.mubr.f32.vlgmr.msra.gmra.mrb[12].mxu0 %v4578_v43 }
 0xc6c   :  { %11360 = vmatpush3.bf16.msra.mxu0 %v12541_v39  ;;  %10260 = vmatprep.mubr.msk.f32.mxu0 %vm12077_vm1, %v12078_v12 }
 0xc6d   :  { %11361 = vmatprep.subr.bf16.mxu0 %v12076_v25 }
 0xc70   :  { %11363 = vmatpush3.bf16.msra.mxu0 %v12470_v0 }
 0xc71   :  { %11364 = vmatprep.subr.bf16.mxu0 %v12076_v25 }
 0xc74   :  { %11366 = vmatpush3.bf16.msra.mxu0 %v12472_v1 }
 0xc75   :  { %11367 = vmatprep.subr.bf16.mxu0 %v12076_v25 }
 0xc78   :  { %11369 = vmatpush3.bf16.msra.mxu0 %v12474_v2 }
 0xc79   :  { %11370 = vmatprep.subr.bf16.mxu0 %v12076_v25 }
 0xc7b   :  { %10261 = vmatmul.mubr.f32.vlgmr.msra.gmra.mrb[12].mxu0 %v4579_v27 }
 0xc7c   :  { %11372 = vmatpush3.bf16.msra.mxu0 %v12428_v60  ;;  %10279 = vmatprep.mubr.msk.f32.mxu0 %vm12077_vm1, %v12078_v12 }
 0xc7d   :  { %11373 = vmatprep.subr.bf16.mxu0 %v12076_v25 }
 0xc80   :  { %11375 = vmatpush3.bf16.msra.mxu0 %v12439_v4 }
 0xc81   :  { %11376 = vmatprep.subr.bf16.mxu0 %v12076_v25 }
 0xc84   :  { %11378 = vmatpush3.bf16.msra.mxu0 %v12449_v11 }
 0xc85   :  { %11379 = vmatprep.subr.bf16.mxu0 %v12076_v25 }
 0xc88   :  { %11381 = vmatpush3.bf16.msra.mxu0 %v12459_v10 }
 0xc89   :  { %11382 = vmatprep.subr.bf16.mxu0 %v12076_v25 }
 0xc8b   :  { %10280 = vmatmul.mubr.f32.vlgmr.msra.gmra.mrb[12].mxu0 %v4580_v28 }
 0xc8c   :  { %11384 = vmatpush3.bf16.msra.mxu0 %v12594_v40  ;;  %10298 = vmatprep.mubr.msk.f32.mxu0 %vm12077_vm1, %v12078_v12 }
 0xc8d   :  { %11385 = vmatprep.subr.bf16.mxu0 %v12076_v25 }
 0xc90   :  { %11387 = vmatpush3.bf16.msra.mxu0 %v12476_v5 }
 0xc91   :  { %11388 = vmatprep.subr.bf16.mxu0 %v12076_v25 }
 0xc94   :  { %11390 = vmatpush3.bf16.msra.mxu0 %v12478_v6 }
 0xc95   :  { %11391 = vmatprep.subr.bf16.mxu0 %v12076_v25 }
 0xc98   :  { %11393 = vmatpush3.bf16.msra.mxu0 %v12480_v7 }
 0xc99   :  { %11394 = vmatprep.subr.bf16.mxu0 %v12076_v25 }
 0xc9b   :  { %10299 = vmatmul.mubr.f32.vlgmr.msra.gmra.mrb[12].mxu0 %v4578_v43 }
 0xc9c   :  { %11396 = vmatpush3.bf16.msra.mxu0 %v12428_v60  ;;  %10317 = vmatprep.mubr.msk.f32.mxu0 %vm12077_vm1, %v12078_v12 }
 0xc9d   :  { %11397 = vmatprep.subr.bf16.mxu0 %v12076_v25 }
 0xca0   :  { %11399 = vmatpush3.bf16.msra.mxu0 %v12439_v4 }
 0xca1   :  { %11400 = vmatprep.subr.bf16.mxu0 %v12076_v25 }
 0xca4   :  { %11402 = vmatpush3.bf16.msra.mxu0 %v12449_v11 }
 0xca5   :  { %11403 = vmatprep.subr.bf16.mxu0 %v12076_v25 }
 0xca8   :  { %11405 = vmatpush3.bf16.msra.mxu0 %v12459_v10 }
 0xca9   :  { %11514 = vmatprep.subr.bf16.mxu0 %v12076_v25 }
 0xcab   :  { %10318 = vmatmul.mubr.f32.vlgmr.msra.gmra.mrb[12].mxu0 %v4578_v43 }
 0xcac   :  { %11516 = vmatpush3.bf16.msra.mxu0 %v12230_v42  ;;  %10508 = vmatprep.mubr.msk.f32.mxu0 %vm12077_vm1, %v12078_v12 }
 0xcad   :  { %11517 = vmatprep.subr.bf16.mxu0 %v12076_v25 }
 0xcb0   :  { %11519 = vmatpush3.bf16.msra.mxu0 %v12261_v61 }
 0xcb1   :  { %11520 = vmatprep.subr.bf16.mxu0 %v12076_v25 }
 0xce4   :  { %v5545_v30 = vpop.f32.mrb[14].mxu1 }
 0xce5   :  { %v5549_v32 = vadd.f32 %v12405_v47, %v5545_v30  ;;  %v10385_v34 = vpop.f32.mrb[15].mxu1 }
 0xce7   :  { %12031 = vtanh.f32 %v5549_v32 }
 0xcf1   :  { %v12032_v36 = vpop.eup %12031 }
 0xcf2   :  { %5555 = vrot.lane.b32.xlu1 %v12032_v36, %s12079_s3  ;;  %v5551_v38 = vmul.f32 0.5, %v12032_v36 }
 0xcf4   :  { %v5552_v44 = vadd.f32 0.5, %v5551_v38 }
 0xcf6   :  { %v5553_v47 = vmul.f32 %v5552_v44, %v12882_v46 }
 0xd64   :  { %v5556_v56 = vpop.permute.xlu1 %5555 }
 0xd65   :  { %v5558_v48 = vmul.f32 %v5556_v56, %v5552_v44 }
 0xd67   :  { %5560 = vrot.lane.b32.xlu1 %v5558_v48, %s12080_s24  ;;  %v13112_v48 = vld [vmem:[%s13490_s5] ss:$0 sm:$0xff] }
 0xd7e   :  { %v5038_v50 = vpop.f32.mrb[12].mxu0 }
 0xd7f   :  { %v11817_v51 = vadd.f32 %v12637_v49, %v5038_v50  ;;  %v10319_v52 = vpop.f32.mrb[13].mxu0 }
 0xd81   :  { %12033 = vtanh.f32 %v11817_v51 }
 0xd8b   :  { %v12034_v24 = vpop.eup %12033 }
 0xd8c   :  { %5047 = vrot.lane.b32.xlu0 %v12034_v24, %s12079_s3  ;;  %v5043_v8 = vmul.f32 0.5, %v12034_v24 }
 0xd8e   :  { %v5044_v14 = vadd.f32 0.5, %v5043_v8 }
 0xd90   :  { %v5045_v49 = vmul.f32 %v5044_v14, %v12888_v62 }
 0xdd9   :  { %v5561_v54 = vpop.permute.xlu1 %5560 }
 0xdda   :  { %v12999_v31 = vadd.f32 %v5561_v54, %v5553_v47 }
 0xddc   :  { %12035 = vtanh.f32 %v12999_v31 }
 0xde6   :  { %v12036_v33 = vpop.eup %12035 }
 0xde7   :  { %5566 = vrot.lane.b32.xlu1 %v12036_v33, %s12079_s3 }
 0xdfe   :  { %v5048_v15 = vpop.permute.xlu0 %5047 }
 0xdff   :  { %v5050_v3 = vmul.f32 %v5048_v15, %v5044_v14 }
 0xe01   :  { %5052 = vrot.lane.b32.xlu0 %v5050_v3, %s12080_s24 }
 0xe59   :  { %v5567_v21 = vpop.permute.xlu1 %5566 }
 0xe5a   :  { %v5569_v22 = vmul.f32 %v5567_v21, %v5552_v44 }
 0xe73   :  { %v5053_v9 = vpop.permute.xlu0 %5052 }
 0xe74   :  { %v13005_v41 = vadd.f32 %v5053_v9, %v5045_v49 }
 0xe76   :  { %12037 = vtanh.f32 %v13005_v41 }
 0xe80   :  { %v12038_v46 = vpop.eup %12037 }
 0xe81   :  { %5058 = vrot.lane.b32.xlu0 %v12038_v46, %s12079_s3 }
 0xe85   :  { %5571 = vrot.lane.b32.xlu0 %v5569_v22, %s12080_s24 }
 0xef3   :  { %v5059_v23 = vpop.permute.xlu0 %5058 }
 0xef4   :  { %v5061_v57 = vmul.f32 %v5059_v23, %v5044_v14 }
 0xef6   :  { %5575 = vrot.lane.b32.xlu1 %v5061_v57, %s12079_s3 }
 0xef7   :  { %v5572_v58 = vpop.permute.xlu0 %5571 }
 0xef8   :  { %v6139_v59 = vsel %vm755_vm2, %v5572_v58, 0 }
 0xef9   :  { %v6210_v62 = vand.u32 4294901760, %v6139_v59 }
 0xefb   :  { %v6211_v26 = vsub.f32 %v6139_v59, %v6210_v62 }
 0xefd   :  { %v6212_v43 = vand.u32 4294901760, %v6211_v26 }
 0xeff   :  { %v6213_v27 = vsub.f32 %v6211_v26, %v6212_v43 }
 0xf01   :  { %v6214_v28 = vand.u32 4294901760, %v6213_v27 }
 0xf03   :  { %10509 = vmatmul.mubr.f32.vlgmr.msra.gmra.mrb[14].mxu0 %v6214_v28 }
 0xf04   :  { %11522 = vmatpush3.bf16.msra.mxu0 %v12291_v13  ;;  %10519 = vmatprep.mubr.msk.f32.mxu0 %vm12077_vm1, %v12078_v12 }
 0xf05   :  { %11523 = vmatprep.subr.bf16.mxu0 %v12076_v25 }
 0xf08   :  { %11525 = vmatpush3.bf16.msra.mxu0 %v12297_v16 }
 0xf09   :  { %11526 = vmatprep.subr.bf16.mxu0 %v12076_v25 }
 0xf0b   :  { %10520 = vmatmul.mubr.f32.vlgmr.msra.gmra.mrb[14].mxu0 %v6210_v62 }
 0xf0c   :  { %11528 = vmatpush3.bf16.msra.mxu0 %v12309_v17  ;;  %10530 = vmatprep.mubr.msk.f32.mxu0 %vm12077_vm1, %v12078_v12 }
 0xf0d   :  { %11529 = vmatprep.subr.bf16.mxu0 %v12076_v25 }
 0xf10   :  { %11531 = vmatpush3.bf16.msra.mxu0 %v12319_v20 }
 0xf11   :  { %11532 = vmatprep.subr.bf16.mxu0 %v12076_v25 }
 0xf13   :  { %10531 = vmatmul.mubr.f32.vlgmr.msra.gmra.mrb[14].mxu0 %v6211_v26 }
 0xf14   :  { %11534 = vmatpush3.bf16.msra.mxu0 %v12230_v42  ;;  %10541 = vmatprep.mubr.msk.f32.mxu0 %vm12077_vm1, %v12078_v12 }
 0xf15   :  { %11535 = vmatprep.subr.bf16.mxu0 %v12076_v25 }
 0xf18   :  { %11537 = vmatpush3.bf16.msra.mxu0 %v12261_v61 }
 0xf19   :  { %11538 = vmatprep.subr.bf16.mxu0 %v12076_v25 }
 0xf1b   :  { %10542 = vmatmul.mubr.f32.vlgmr.msra.gmra.mrb[14].mxu0 %v6212_v43 }
 0xf1c   :  { %11540 = vmatpush3.bf16.msra.mxu0 %v12349_v18  ;;  %10552 = vmatprep.mubr.msk.f32.mxu0 %vm12077_vm1, %v12078_v12 }
 0xf1d   :  { %11541 = vmatprep.subr.bf16.mxu0 %v12076_v25 }
 0xf20   :  { %11543 = vmatpush3.bf16.msra.mxu0 %v12360_v19 }
 0xf21   :  { %11544 = vmatprep.subr.bf16.mxu0 %v12076_v25 }
 0xf23   :  { %10553 = vmatmul.mubr.f32.vlgmr.msra.gmra.mrb[14].mxu0 %v6210_v62 }
 0xf24   :  { %11546 = vmatpush3.bf16.msra.mxu0 %v12230_v42  ;;  %10563 = vmatprep.mubr.msk.f32.mxu0 %vm12077_vm1, %v12078_v12 }
 0xf25   :  { %11547 = vmatprep.subr.bf16.mxu0 %v12076_v25 }
 0xf28   :  { %11549 = vmatpush3.bf16.msra.mxu0 %v12261_v61 }
 0xf29   :  { %11550 = vmatprep.subr.bf16.mxu0 %v12076_v25 }
 0xf2b   :  { %10564 = vmatmul.mubr.f32.vlgmr.msra.gmra.mrb[14].mxu0 %v6210_v62 }
 0xf2c   :  { %11552 = vmatpush3.bf16.msra.mxu0 %v12428_v60  ;;  %10582 = vmatprep.mubr.msk.f32.mxu0 %vm12077_vm1, %v12078_v12 }
 0xf2d   :  { %11553 = vmatprep.subr.bf16.mxu0 %v12076_v25 }
 0xf30   :  { %11555 = vmatpush3.bf16.msra.mxu0 %v12439_v4 }
 0xf31   :  { %11556 = vmatprep.subr.bf16.mxu0 %v12076_v25 }
 0xf34   :  { %11558 = vmatpush3.bf16.msra.mxu0 %v12449_v11 }
 0xf35   :  { %11559 = vmatprep.subr.bf16.mxu0 %v12076_v25 }
 0xf38   :  { %11561 = vmatpush3.bf16.msra.mxu0 %v12459_v10 }
 0xf39   :  { %11562 = vmatprep.subr.bf16.mxu0 %v12076_v25 }
 0xf68   :  { %v5576_v42 = vpop.permute.xlu1 %5575 }
 0xf69   :  { %v5578_v61 = vsel %vm755_vm2, %v5572_v58, %v5576_v42 }
 0xf6a   :  { %v5580_v13 = vsel %vm1270_vm3, %v5578_v61, 0 }
 0xf6b   :  { %v5655_v16 = vand.u32 4294901760, %v5580_v13 }
 0xf6d   :  { %v5656_v17 = vsub.f32 %v5580_v13, %v5655_v16 }
 0xf6f   :  { %v5657_v20 = vand.u32 4294901760, %v5656_v17 }
 0xf71   :  { %v5658_v18 = vsub.f32 %v5656_v17, %v5657_v20 }
 0xf73   :  { %v5659_v19 = vand.u32 4294901760, %v5658_v18 }
 0xf75   :  { %10403 = vmatmul.mubr.f32.vlgmr.msra.gmra.mrb[16].mxu1 %v5659_v19 }
 0xf76   :  { %11456 = vmatpush3.bf16.msra.mxu1 %v12515_v35  ;;  %10421 = vmatprep.mubr.msk.f32.mxu1 %vm12077_vm1, %v12078_v12 }
 0xf77   :  { %11457 = vmatprep.subr.bf16.mxu1 %v12076_v25 }
 0xf7a   :  { %11459 = vmatpush3.bf16.msra.mxu1 %v12464_v37 }
 0xf7b   :  { %11460 = vmatprep.subr.bf16.mxu1 %v12076_v25 }
 0xf7e   :  { %11462 = vmatpush3.bf16.msra.mxu1 %v12466_v53 }
 0xf7f   :  { %11463 = vmatprep.subr.bf16.mxu1 %v12076_v25 }
 0xf82   :  { %11465 = vmatpush3.bf16.msra.mxu1 %v12468_v63 }
 0xf83   :  { %11466 = vmatprep.subr.bf16.mxu1 %v12076_v25 }
 0xf85   :  { %10422 = vmatmul.mubr.f32.vlgmr.msra.gmra.mrb[16].mxu1 %v5655_v16 }
 0xf86   :  { %11468 = vmatpush3.bf16.msra.mxu1 %v12541_v39  ;;  %10440 = vmatprep.mubr.msk.f32.mxu1 %vm12077_vm1, %v12078_v12 }
 0xf87   :  { %11469 = vmatprep.subr.bf16.mxu1 %v12076_v25 }
 0xf8a   :  { %11471 = vmatpush3.bf16.msra.mxu1 %v12470_v0 }
 0xf8b   :  { %11472 = vmatprep.subr.bf16.mxu1 %v12076_v25 }
 0xf8e   :  { %11474 = vmatpush3.bf16.msra.mxu1 %v12472_v1 }
 0xf8f   :  { %11475 = vmatprep.subr.bf16.mxu1 %v12076_v25 }
 0xf92   :  { %11477 = vmatpush3.bf16.msra.mxu1 %v12474_v2 }
 0xf93   :  { %11478 = vmatprep.subr.bf16.mxu1 %v12076_v25 }
 0xf95   :  { %10441 = vmatmul.mubr.f32.vlgmr.msra.gmra.mrb[16].mxu1 %v5656_v17  ;;  %v7219_v17 = vld [vmem:[%s13491_s6 + $0x18] sm:$0xff] }
 0xf96   :  { %11480 = vmatpush3.bf16.msra.mxu1 %v12428_v60  ;;  %10459 = vmatprep.mubr.msk.f32.mxu1 %vm12077_vm1, %v12078_v12  ;;  %v7242_v18 = vand.u32 4294901760, %v7219_v17 }
 0xf97   :  { %11481 = vmatprep.subr.bf16.mxu1 %v12076_v25 }
 0xf9a   :  { %11483 = vmatpush3.bf16.msra.mxu1 %v12439_v4 }
 0xf9b   :  { %11484 = vmatprep.subr.bf16.mxu1 %v12076_v25 }
 0xf9e   :  { %11486 = vmatpush3.bf16.msra.mxu1 %v12449_v11 }
 0xf9f   :  { %11487 = vmatprep.subr.bf16.mxu1 %v12076_v25 }
 0xfa2   :  { %11489 = vmatpush3.bf16.msra.mxu1 %v12459_v10 }
 0xfa3   :  { %11490 = vmatprep.subr.bf16.mxu1 %v12076_v25 }
 0xfa5   :  { %10460 = vmatmul.mubr.f32.vlgmr.msra.gmra.mrb[16].mxu1 %v5657_v20 }
 0xfa6   :  { %11492 = vmatpush3.bf16.msra.mxu1 %v12594_v40  ;;  %10478 = vmatprep.mubr.msk.f32.mxu1 %vm12077_vm1, %v12078_v12 }
 0xfa7   :  { %11493 = vmatprep.subr.bf16.mxu1 %v12076_v25 }
 0xfaa   :  { %11495 = vmatpush3.bf16.msra.mxu1 %v12476_v5 }
 0xfab   :  { %11496 = vmatprep.subr.bf16.mxu1 %v12076_v25 }
 0xfae   :  { %11498 = vmatpush3.bf16.msra.mxu1 %v12478_v6 }
 0xfaf   :  { %11499 = vmatprep.subr.bf16.mxu1 %v12076_v25 }
 0xfb2   :  { %11501 = vmatpush3.bf16.msra.mxu1 %v12480_v7 }
 0xfb3   :  { %11502 = vmatprep.subr.bf16.mxu1 %v12076_v25 }
 0xfb5   :  { %10479 = vmatmul.mubr.f32.vlgmr.msra.gmra.mrb[16].mxu1 %v5655_v16 }
 0xfb6   :  { %11504 = vmatpush3.bf16.msra.mxu1 %v12428_v60  ;;  %10497 = vmatprep.mubr.msk.f32.mxu1 %vm12077_vm1, %v12078_v12 }
 0xfb7   :  { %11505 = vmatprep.subr.bf16.mxu1 %v12076_v25 }
 0xfba   :  { %11507 = vmatpush3.bf16.msra.mxu1 %v12439_v4 }
 0xfbb   :  { %11508 = vmatprep.subr.bf16.mxu1 %v12076_v25 }
 0xfbe   :  { %11510 = vmatpush3.bf16.msra.mxu1 %v12449_v11 }
 0xfbf   :  { %11511 = vmatprep.subr.bf16.mxu1 %v12076_v25 }
 0xfc2   :  { %11513 = vmatpush3.bf16.msra.mxu1 %v12459_v10 }
 0xfc3   :  { %11622 = vmatprep.subr.bf16.mxu1 %v12076_v25 }
 0xfc5   :  { %10498 = vmatmul.mubr.f32.vlgmr.msra.gmra.mrb[16].mxu1 %v5655_v16  ;;  %v7218_v16 = vld [vmem:[%s13491_s6 + $0x10] sm:$0xff] }
 0xfc6   :  { %10688 = vmatprep.mubr.msk.f32.mxu1 %vm12077_vm1, %v12078_v12  ;;  %v7239_v20 = vand.u32 4294901760, %v7218_v16 }
 0xffe   :  { %v6622_v55 = vpop.f32.mrb[14].mxu0 }
 0xfff   :  { %v6626_v29 = vadd.f32 %v12403_v45, %v6622_v55  ;;  %v10565_v30 = vpop.f32.mrb[15].mxu0 }
0x1000   :  { %v7327_v30 = vsub.f32 %v7218_v16, %v7239_v20 }
0x1001   :  { %12039 = vtanh.f32 %v6626_v29  ;;  %v11626_v29 = vpack.c.bf16 %v7242_v18, %v7239_v20 }
0x100b   :  { %v12040_v32 = vpop.eup %12039 }
0x100c   :  { %6632 = vrot.lane.b32.xlu1 %v12040_v32, %s12079_s3  ;;  %v6628_v34 = vmul.f32 0.5, %v12040_v32  ;;  %v7334_v32 = vsub.f32 %v7219_v17, %v7242_v18 }
0x100e   :  { %v6629_v36 = vadd.f32 0.5, %v6628_v34 }
0x1010   :  { %v6630_v52 = vmul.f32 %v6629_v36, %v12999_v31 }
0x107e   :  { %v6633_v38 = vpop.permute.xlu1 %6632 }
0x107f   :  { %v6635_v44 = vmul.f32 %v6633_v38, %v6629_v36 }
0x1081   :  { %6637 = vrot.lane.b32.xlu1 %v6635_v44, %s12080_s24  ;;  %v7328_v44 = vand.u32 4294901760, %v7327_v30 }
0x1098   :  { %v6115_v56 = vpop.f32.mrb[16].mxu1 }
0x1099   :  { %v11818_v50 = vadd.f32 %v13112_v48, %v6115_v56  ;;  %v10499_v45 = vpop.f32.mrb[17].mxu1  ;;  %v7335_v56 = vand.u32 4294901760, %v7334_v32 }
0x109a   :  { %v7329_v45 = vsub.f32 %v7327_v30, %v7328_v44 }
0x109b   :  { %12041 = vtanh.f32 %v11818_v50 }
0x10a5   :  { %v12042_v51 = vpop.eup %12041 }
0x10a6   :  { %6124 = vrot.lane.b32.xlu0 %v12042_v51, %s12079_s3  ;;  %v6120_v33 = vmul.f32 0.5, %v12042_v51  ;;  %v7336_v51 = vsub.f32 %v7334_v32, %v7335_v56 }
0x10a8   :  { %v6121_v8 = vadd.f32 0.5, %v6120_v33 }
0x10aa   :  { %v6122_v3 = vmul.f32 %v6121_v8, %v13005_v41 }
0x10f3   :  { %v6638_v24 = vpop.permute.xlu1 %6637 }
0x10f4   :  { %v6640_v47 = vadd.f32 %v6638_v24, %v6630_v52 }
0x10f6   :  { %12043 = vtanh.f32 %v6640_v47  ;;  %v7330_v47 = vand.u32 4294901760, %v7329_v45 }
0x1100   :  { %v12044_v54 = vpop.eup %12043 }
0x1101   :  { %6643 = vrot.lane.b32.xlu1 %v12044_v54, %s12079_s3  ;;  %v7337_v54 = vand.u32 4294901760, %v7336_v51 }
0x1103   :  { %v11632_v33 = vpack.c.bf16 %v7337_v54, %v7330_v47 }
0x1118   :  { %v6125_v14 = vpop.permute.xlu0 %6124 }
0x1119   :  { %v6127_v15 = vmul.f32 %v6125_v14, %v6121_v8  ;;  %v11638_v14 = vpack.c.bf16 %v7334_v32, %v7327_v30 }
0x111b   :  { %6129 = vrot.lane.b32.xlu0 %v6127_v15, %s12080_s24 }
0x1173   :  { %v6644_v46 = vpop.permute.xlu1 %6643 }
0x1174   :  { %v6646_v21 = vmul.f32 %v6644_v46, %v6629_v36 }
0x118d   :  { %v6130_v49 = vpop.permute.xlu0 %6129 }
0x118e   :  { %v13120_v9 = vadd.f32 %v6130_v49, %v6122_v3  ;;  %v11650_v3 = vpack.c.bf16 %v7335_v56, %v7328_v44 }
0x1190   :  { %12045 = vtanh.f32 %v13120_v9 }
0x119a   :  { %v12046_v31 = vpop.eup %12045 }
0x119b   :  { %6135 = vrot.lane.b32.xlu0 %v12046_v31, %s12079_s3 }
0x119f   :  { %6648 = vrot.lane.b32.xlu0 %v6646_v21, %s12080_s24 }
0x120d   :  { %v6136_v22 = vpop.permute.xlu0 %6135 }
0x120e   :  { %v6138_v23 = vmul.f32 %v6136_v22, %v6121_v8 }
0x1210   :  { %6652 = vrot.lane.b32.xlu1 %v6138_v23, %s12079_s3 }
0x1211   :  { %v6649_v57 = vpop.permute.xlu0 %6648 }
0x1282   :  { %v6653_v58 = vpop.permute.xlu1 %6652 }
0x1283   :  { %v6655_v41 = vsel %vm755_vm2, %v6649_v57, %v6653_v58  ;;  %v7718_v57 = vld [vmem:[%s13493_s8] sm:$0xff]  ;;  %v7719_v58 = vld [vmem:[%s13493_s8 + $0x8] sm:$0xff] }
0x1284   :  { %v6657_v59 = vsel %vm1270_vm3, %v6655_v41, 0  ;;  %v7737_v41 = vand.u32 4294901760, %v7718_v57 }
0x1285   :  { %v6732_v62 = vand.u32 4294901760, %v6657_v59 }
0x1287   :  { %v6733_v26 = vsub.f32 %v6657_v59, %v6732_v62  ;;  %v7740_v59 = vand.u32 4294901760, %v7719_v58 }
0x1289   :  { %v6734_v43 = vand.u32 4294901760, %v6733_v26 }
0x128b   :  { %v6735_v27 = vsub.f32 %v6733_v26, %v6734_v43 }
0x128d   :  { %v6736_v28 = vand.u32 4294901760, %v6735_v27 }
0x128f   :  { %10583 = vmatmul.mubr.f32.vlgmr.msra.gmra.mrb[16].mxu0 %v6736_v28 }
0x1290   :  { %11564 = vmatpush3.bf16.msra.mxu0 %v12515_v35  ;;  %10601 = vmatprep.mubr.msk.f32.mxu0 %vm12077_vm1, %v12078_v12  ;;  %v7217_v35 = vld [vmem:[%s13491_s6 + $0x8] sm:$0xff] }
0x1291   :  { %11565 = vmatprep.subr.bf16.mxu0 %v12076_v25 }
0x1294   :  { %11567 = vmatpush3.bf16.msra.mxu0 %v12464_v37 }
0x1295   :  { %11568 = vmatprep.subr.bf16.mxu0 %v12076_v25 }
0x1298   :  { %11570 = vmatpush3.bf16.msra.mxu0 %v12466_v53 }
0x1299   :  { %11571 = vmatprep.subr.bf16.mxu0 %v12076_v25 }
0x129c   :  { %11573 = vmatpush3.bf16.msra.mxu0 %v12468_v63 }
0x129d   :  { %11574 = vmatprep.subr.bf16.mxu0 %v12076_v25 }
0x129f   :  { %10602 = vmatmul.mubr.f32.vlgmr.msra.gmra.mrb[16].mxu0 %v6732_v62 }
0x12a0   :  { %11576 = vmatpush3.bf16.msra.mxu0 %v12541_v39  ;;  %10620 = vmatprep.mubr.msk.f32.mxu0 %vm12077_vm1, %v12078_v12 }
0x12a1   :  { %11577 = vmatprep.subr.bf16.mxu0 %v12076_v25 }
0x12a4   :  { %11579 = vmatpush3.bf16.msra.mxu0 %v12470_v0 }
0x12a5   :  { %11580 = vmatprep.subr.bf16.mxu0 %v12076_v25 }
0x12a8   :  { %11582 = vmatpush3.bf16.msra.mxu0 %v12472_v1 }
0x12a9   :  { %11583 = vmatprep.subr.bf16.mxu0 %v12076_v25 }
0x12ac   :  { %11585 = vmatpush3.bf16.msra.mxu0 %v12474_v2 }
0x12ad   :  { %11586 = vmatprep.subr.bf16.mxu0 %v12076_v25 }
0x12af   :  { %10621 = vmatmul.mubr.f32.vlgmr.msra.gmra.mrb[16].mxu0 %v6733_v26  ;;  %v7720_v26 = vld [vmem:[%s13493_s8 + $0x10] sm:$0xff] }
0x12b0   :  { %11588 = vmatpush3.bf16.msra.mxu0 %v12428_v60  ;;  %10639 = vmatprep.mubr.msk.f32.mxu0 %vm12077_vm1, %v12078_v12  ;;  %v7743_v27 = vand.u32 4294901760, %v7720_v26 }
0x12b1   :  { %11589 = vmatprep.subr.bf16.mxu0 %v12076_v25 }
0x12b4   :  { %11591 = vmatpush3.bf16.msra.mxu0 %v12439_v4 }
0x12b5   :  { %11592 = vmatprep.subr.bf16.mxu0 %v12076_v25 }
0x12b8   :  { %11594 = vmatpush3.bf16.msra.mxu0 %v12449_v11 }
0x12b9   :  { %11595 = vmatprep.subr.bf16.mxu0 %v12076_v25 }
0x12bc   :  { %11597 = vmatpush3.bf16.msra.mxu0 %v12459_v10 }
0x12bd   :  { %11598 = vmatprep.subr.bf16.mxu0 %v12076_v25 }
0x12bf   :  { %10640 = vmatmul.mubr.f32.vlgmr.msra.gmra.mrb[16].mxu0 %v6734_v43  ;;  %v7721_v43 = vld [vmem:[%s13493_s8 + $0x18] sm:$0xff] }
0x12c0   :  { %11600 = vmatpush3.bf16.msra.mxu0 %v12594_v40  ;;  %10658 = vmatprep.mubr.msk.f32.mxu0 %vm12077_vm1, %v12078_v12  ;;  %v7236_v40 = vand.u32 4294901760, %v7217_v35  ;;  %v7746_v28 = vand.u32 4294901760, %v7721_v43 }
0x12c1   :  { %11601 = vmatprep.subr.bf16.mxu0 %v12076_v25 }
0x12c2   :  { %v7320_v13 = vsub.f32 %v7217_v35, %v7236_v40 }
0x12c4   :  { %11603 = vmatpush3.bf16.msra.mxu0 %v12476_v5  ;;  %v7321_v55 = vand.u32 4294901760, %v7320_v13 }
0x12c5   :  { %11604 = vmatprep.subr.bf16.mxu0 %v12076_v25 }
0x12c6   :  { %v7322_v36 = vsub.f32 %v7320_v13, %v7321_v55 }
0x12c8   :  { %11606 = vmatpush3.bf16.msra.mxu0 %v12478_v6 }
0x12c9   :  { %11607 = vmatprep.subr.bf16.mxu0 %v12076_v25 }
0x12cc   :  { %11609 = vmatpush3.bf16.msra.mxu0 %v12480_v7  ;;  %v7216_v7 = vld [vmem:[%s13491_s6] sm:$0xff] }
0x12cd   :  { %11610 = vmatprep.subr.bf16.mxu0 %v12076_v25  ;;  %v7233_v39 = vand.u32 4294901760, %v7216_v7 }
0x12cf   :  { %10659 = vmatmul.mubr.f32.vlgmr.msra.gmra.mrb[16].mxu0 %v6732_v62  ;;  %v13191_v42 = vpack.c.bf16 %v7236_v40, %v7233_v39  ;;  %v7313_v61 = vsub.f32 %v7216_v7, %v7233_v39  ;;  %v13270_v39 = vsub.f32 %v7720_v26, %v7743_v27  ;;  %v13272_v40 = vsub.f32 %v7721_v43, %v7746_v28 }
0x12d0   :  { %11612 = vmatpush3.bf16.msra.mxu0 %v12428_v60  ;;  %10677 = vmatprep.mubr.msk.f32.mxu0 %vm12077_vm1, %v12078_v12 }
0x12d1   :  { %11613 = vmatprep.subr.bf16.mxu0 %v12076_v25  ;;  %11624 = vmatpush3.bf16.msra.mxu1 %v13191_v42  ;;  %v7314_v19 = vand.u32 4294901760, %v7313_v61  ;;  %v11635_v8 = vpack.c.bf16 %v7320_v13, %v7313_v61 }
0x12d2   :  { %11625 = vmatprep.subr.bf16.mxu1 %v12076_v25 }
0x12d3   :  { %v7315_v34 = vsub.f32 %v7313_v61, %v7314_v19  ;;  %v11647_v15 = vpack.c.bf16 %v7321_v55, %v7314_v19  ;;  %v7836_v55 = vand.u32 4294901760, %v13270_v39 }
0x12d4   :  { %11615 = vmatpush3.bf16.msra.mxu0 %v12439_v4 }
0x12d5   :  { %11616 = vmatprep.subr.bf16.mxu0 %v12076_v25  ;;  %11627 = vmatpush3.bf16.msra.mxu1 %v11626_v29  ;;  %v7316_v38 = vand.u32 4294901760, %v7315_v34  ;;  %v7837_v32 = vsub.f32 %v13270_v39, %v7836_v55 }
0x12d6   :  { %11628 = vmatprep.subr.bf16.mxu1 %v12076_v25 }
0x12d8   :  { %11618 = vmatpush3.bf16.msra.mxu0 %v12449_v11 }
0x12d9   :  { %11619 = vmatprep.subr.bf16.mxu0 %v12076_v25 }
0x12dc   :  { %11621 = vmatpush3.bf16.msra.mxu0 %v12459_v10 }
0x12dd   :  { %11730 = vmatprep.subr.bf16.mxu0 %v12076_v25 }
0x12df   :  { %10678 = vmatmul.mubr.f32.vlgmr.msra.gmra.mrb[16].mxu0 %v6732_v62  ;;  %v13234_v62 = vpack.c.bf16 %v7740_v59, %v7737_v41 }
0x12e0   :  { %10876 = vmatprep.mubr.msk.f32.mxu0 %vm12077_vm1, %v12078_v12 }
0x13b2   :  { %v7192_v60 = vpop.f32.mrb[16].mxu0 }
0x13b3   :  { %v11819_v37 = vadd.f32 %v13112_v48, %v7192_v60  ;;  %v10679_v53 = vpop.f32.mrb[17].mxu0  ;;  %v7323_v48 = vand.u32 4294901760, %v7322_v36  ;;  %v13244_v60 = vpack.c.bf16 %v7746_v28, %v7743_v27 }
0x13b4   :  { %v7723_v53 = vld [vmem:[%s13493_s8 + $0x28] sm:$0xff] }
0x13b5   :  { %12047 = vtanh.f32 %v11819_v37  ;;  %v11629_v24 = vpack.c.bf16 %v7323_v48, %v7316_v38  ;;  %v7722_v37 = vld [vmem:[%s13493_s8 + $0x20] sm:$0xff]  ;;  %v7838_v38 = vand.u32 4294901760, %v7837_v32 }
0x13bf   :  { %v12048_v4 = vpop.eup %12047 }
0x13c0   :  { %7201 = vrot.lane.b32.xlu0 %v12048_v4, %s12079_s3  ;;  %v7197_v63 = vmul.f32 0.5, %v12048_v4  ;;  %v7749_v4 = vand.u32 4294901760, %v7722_v37 }
0x13c2   :  { %v7198_v11 = vadd.f32 0.5, %v7197_v63  ;;  %v7752_v63 = vand.u32 4294901760, %v7723_v53 }
0x13c4   :  { %v7199_v10 = vmul.f32 %v7198_v11, %v13120_v9  ;;  %v13276_v61 = vsub.f32 %v7723_v53, %v7752_v63 }
0x13c6   :  { %v7857_v48 = vand.u32 4294901760, %v13276_v61 }
0x13c8   :  { %v7858_v51 = vsub.f32 %v13276_v61, %v7857_v48 }
0x1432   :  { %v7202_v0 = vpop.permute.xlu0 %7201 }
0x1433   :  { %v7204_v1 = vmul.f32 %v7202_v0, %v7198_v11  ;;  %v13256_v0 = vsub.f32 %v7719_v58, %v7740_v59 }
0x1435   :  { %7206 = vrot.lane.b32.xlu1 %v7204_v1, %s12080_s24  ;;  %v13258_v1 = vpack.c.bf16 %v7752_v63, %v7749_v4  ;;  %v7829_v35 = vand.u32 4294901760, %v13256_v0 }
0x1437   :  { %v7830_v18 = vsub.f32 %v13256_v0, %v7829_v35 }
0x1439   :  { %v7831_v30 = vand.u32 4294901760, %v7830_v18  ;;  %v8281_v18 = vld [vmem:[%s13495_s10 + $0x38] sm:$0xff] }
0x14a7   :  { %v7207_v2 = vpop.permute.xlu1 %7206 }
0x14a8   :  { %v7209_v5 = vadd.f32 %v7207_v2, %v7199_v10  ;;  %v7724_v10 = vld [vmem:[%s13493_s8 + $0x30] sm:$0xff]  ;;  %v7725_v2 = vld [vmem:[%s13493_s8 + $0x38] sm:$0xff] }
0x14aa   :  { %12049 = vtanh.f32 %v7209_v5  ;;  %v7755_v5 = vand.u32 4294901760, %v7724_v10 }
0x14ac   :  { %v13280_v16 = vsub.f32 %v7724_v10, %v7755_v5 }
0x14ae   :  { %v7864_v47 = vand.u32 4294901760, %v13280_v16 }
0x14b4   :  { %v12050_v6 = vpop.eup %12049 }
0x14b5   :  { %7212 = vrot.lane.b32.xlu0 %v12050_v6, %s12079_s3  ;;  %v7758_v6 = vand.u32 4294901760, %v7725_v2 }
0x14b7   :  { %v13278_v13 = vpack.c.bf16 %v7758_v6, %v7755_v5  ;;  %v13282_v17 = vsub.f32 %v7725_v2, %v7758_v6  ;;  %v8277_v5 = vld [vmem:[%s13495_s10 + $0x18] sm:$0xff] }
0x14b9   :  { %v7871_v54 = vand.u32 4294901760, %v13282_v17 }
0x14bb   :  { %v11716_v58 = vpack.c.bf16 %v7871_v54, %v7864_v47 }
0x1527   :  { %v7213_v50 = vpop.permute.xlu0 %7212 }
0x1528   :  { %v7215_v52 = vmul.f32 %v7213_v50, %v7198_v11  ;;  %v13254_v11 = vsub.f32 %v7718_v57, %v7737_v41  ;;  %v8847_v41 = vld [vmem:[%s13492_s7] ss:$0 sm:$0xff] }
0x152a   :  { %7228 = vrot.lane.b32.xlu1 %v7215_v52, %s12080_s24  ;;  %v7822_v7 = vand.u32 4294901760, %v13254_v11 }
0x152c   :  { %v7823_v20 = vsub.f32 %v13254_v11, %v7822_v7 }
0x152e   :  { %v7824_v19 = vand.u32 4294901760, %v7823_v20  ;;  %v8280_v20 = vld [vmem:[%s13495_s10 + $0x30] sm:$0xff] }
0x1530   :  { %v11671_v36 = vpack.c.bf16 %v7831_v30, %v7824_v19  ;;  %v8311_v19 = vand.u32 4294901760, %v8280_v20 }
0x159c   :  { %v7229_v49 = vpop.permute.xlu1 %7228 }
0x159d   :  { %v7230_v9 = vsel %vm755_vm2, %v7229_v49, 0 }
0x159e   :  { %v7301_v31 = vand.u32 4294901760, %v7230_v9 }
0x15a0   :  { %v7302_v46 = vsub.f32 %v7230_v9, %v7301_v31  ;;  %v11683_v9 = vpack.c.bf16 %v13256_v0, %v13254_v11  ;;  %v8275_v0 = vld [vmem:[%s13495_s10 + $0x8] sm:$0xff] }
0x15a1   :  { %v8296_v2 = vand.u32 4294901760, %v8275_v0 }
0x15a2   :  { %v7303_v21 = vand.u32 4294901760, %v7302_v46 }
0x15a4   :  { %v7304_v22 = vsub.f32 %v7302_v46, %v7303_v21 }
0x15a6   :  { %v7305_v23 = vand.u32 4294901760, %v7304_v22  ;;  %v11707_v22 = vpack.c.bf16 %v7829_v35, %v7822_v7  ;;  %v8302_v7 = vand.u32 4294901760, %v8277_v5 }
0x15a8   :  { %10689 = vmatmul.mubr.f32.vlgmr.msra.gmra.mrb[18].mxu1 %v7305_v23 }
0x15a9   :  { %11630 = vmatpush3.bf16.msra.mxu1 %v11629_v24  ;;  %10699 = vmatprep.mubr.msk.f32.mxu1 %vm12077_vm1, %v12078_v12  ;;  %v7859_v24 = vand.u32 4294901760, %v7858_v51 }
0x15aa   :  { %11631 = vmatprep.subr.bf16.mxu1 %v12076_v25 }
0x15ad   :  { %11633 = vmatpush3.bf16.msra.mxu1 %v11632_v33 }
0x15ae   :  { %11634 = vmatprep.subr.bf16.mxu1 %v12076_v25 }
0x15b0   :  { %10700 = vmatmul.mubr.f32.vlgmr.msra.gmra.mrb[18].mxu1 %v7301_v31 }
0x15b1   :  { %11636 = vmatpush3.bf16.msra.mxu1 %v11635_v8  ;;  %10710 = vmatprep.mubr.msk.f32.mxu1 %vm12077_vm1, %v12078_v12  ;;  %v7865_v8 = vsub.f32 %v13280_v16, %v7864_v47 }
0x15b2   :  { %11637 = vmatprep.subr.bf16.mxu1 %v12076_v25 }
0x15b5   :  { %11639 = vmatpush3.bf16.msra.mxu1 %v11638_v14  ;;  %v7872_v14 = vsub.f32 %v13282_v17, %v7871_v54 }
0x15b6   :  { %11640 = vmatprep.subr.bf16.mxu1 %v12076_v25 }
0x15b8   :  { %10711 = vmatmul.mubr.f32.vlgmr.msra.gmra.mrb[18].mxu1 %v7302_v46 }
0x15b9   :  { %11642 = vmatpush3.bf16.msra.mxu1 %v13191_v42  ;;  %10721 = vmatprep.mubr.msk.f32.mxu1 %vm12077_vm1, %v12078_v12 }
0x15ba   :  { %11643 = vmatprep.subr.bf16.mxu1 %v12076_v25 }
0x15bd   :  { %11645 = vmatpush3.bf16.msra.mxu1 %v11626_v29 }
0x15be   :  { %11646 = vmatprep.subr.bf16.mxu1 %v12076_v25 }
0x15c0   :  { %10722 = vmatmul.mubr.f32.vlgmr.msra.gmra.mrb[18].mxu1 %v7303_v21  ;;  %v11692_v21 = vpack.c.bf16 %v13282_v17, %v13280_v16  ;;  %v13377_v16 = vsub.f32 %v8275_v0, %v8296_v2 }
0x15c1   :  { %11648 = vmatpush3.bf16.msra.mxu1 %v11647_v15  ;;  %10732 = vmatprep.mubr.msk.f32.mxu1 %vm12077_vm1, %v12078_v12  ;;  %v7866_v15 = vand.u32 4294901760, %v7865_v8 }
0x15c2   :  { %11649 = vmatprep.subr.bf16.mxu1 %v12076_v25  ;;  %v8385_v30 = vand.u32 4294901760, %v13377_v16 }
0x15c5   :  { %11651 = vmatpush3.bf16.msra.mxu1 %v11650_v3  ;;  %v7873_v3 = vand.u32 4294901760, %v7872_v14 }
0x15c6   :  { %11652 = vmatprep.subr.bf16.mxu1 %v12076_v25 }
0x15c7   :  { %v11680_v49 = vpack.c.bf16 %v7873_v3, %v7866_v15 }
0x15c8   :  { %10733 = vmatmul.mubr.f32.vlgmr.msra.gmra.mrb[18].mxu1 %v7301_v31 }
0x15c9   :  { %11654 = vmatpush3.bf16.msra.mxu1 %v13191_v42  ;;  %10743 = vmatprep.mubr.msk.f32.mxu1 %vm12077_vm1, %v12078_v12  ;;  %v13274_v42 = vsub.f32 %v7722_v37, %v7749_v4 }
0x15ca   :  { %11655 = vmatprep.subr.bf16.mxu1 %v12076_v25 }
0x15cb   :  { %v7850_v56 = vand.u32 4294901760, %v13274_v42  ;;  %v11689_v46 = vpack.c.bf16 %v13276_v61, %v13274_v42 }
0x15cd   :  { %11657 = vmatpush3.bf16.msra.mxu1 %v11626_v29  ;;  %v7843_v29 = vand.u32 4294901760, %v13272_v40  ;;  %v7851_v45 = vsub.f32 %v13274_v42, %v7850_v56  ;;  %v11713_v57 = vpack.c.bf16 %v7857_v48, %v7850_v56  ;;  %v13401_v56 = vsub.f32 %v8280_v20, %v8311_v19 }
0x15ce   :  { %11658 = vmatprep.subr.bf16.mxu1 %v12076_v25 }
0x15cf   :  { %v7844_v34 = vsub.f32 %v13272_v40, %v7843_v29  ;;  %v7852_v52 = vand.u32 4294901760, %v7851_v45  ;;  %v11710_v23 = vpack.c.bf16 %v7843_v29, %v7836_v55  ;;  %v8314_v55 = vand.u32 4294901760, %v8281_v18 }
0x15d0   :  { %10744 = vmatmul.mubr.f32.vlgmr.msra.gmra.mrb[18].mxu1 %v7301_v31  ;;  %v11686_v31 = vpack.c.bf16 %v13272_v40, %v13270_v39  ;;  %v8278_v39 = vld [vmem:[%s13495_s10 + $0x20] sm:$0xff]  ;;  %v8279_v40 = vld [vmem:[%s13495_s10 + $0x28] sm:$0xff]  ;;  %v8386_v45 = vsub.f32 %v13377_v16, %v8385_v30 }
0x15d1   :  { %10762 = vmatprep.mubr.msk.f32.mxu1 %vm12077_vm1, %v12078_v12  ;;  %11660 = vmatpush3.bf16.msra.mxu1 %v13234_v62  ;;  %v7845_v44 = vand.u32 4294901760, %v7844_v34  ;;  %v11677_v33 = vpack.c.bf16 %v7859_v24, %v7852_v52  ;;  %v8305_v42 = vand.u32 4294901760, %v8278_v39  ;;  %v8308_v61 = vand.u32 4294901760, %v8279_v40 }
0x15d2   :  { %11661 = vmatprep.subr.bf16.mxu1 %v12076_v25  ;;  %v13393_v34 = vsub.f32 %v8277_v5, %v8302_v7  ;;  %v13403_v48 = vsub.f32 %v8281_v18, %v8314_v55  ;;  %v8387_v47 = vand.u32 4294901760, %v8386_v45 }
0x15d3   :  { %v11674_v50 = vpack.c.bf16 %v7845_v44, %v7838_v38  ;;  %v13379_v17 = vpack.c.bf16 %v8308_v61, %v8305_v42  ;;  %v13397_v38 = vsub.f32 %v8279_v40, %v8308_v61  ;;  %v13399_v44 = vpack.c.bf16 %v8314_v55, %v8311_v19 }
0x15d4   :  { %v8399_v24 = vand.u32 4294901760, %v13393_v34 }
0x15d5   :  { %11663 = vmatpush3.bf16.msra.mxu1 %v13244_v60 }
0x15d6   :  { %11664 = vmatprep.subr.bf16.mxu1 %v12076_v25 }
0x15d9   :  { %11666 = vmatpush3.bf16.msra.mxu1 %v13258_v1 }
0x15da   :  { %11667 = vmatprep.subr.bf16.mxu1 %v12076_v25 }
0x15dd   :  { %11669 = vmatpush3.bf16.msra.mxu1 %v13278_v13 }
0x15de   :  { %11670 = vmatprep.subr.bf16.mxu1 %v12076_v25 }
0x16a3   :  { %v7713_v59 = vpop.f32.mrb[18].mxu1 }
0x16a4   :  { %v11820_v26 = vadd.f32 %v8847_v41, %v7713_v59  ;;  %v10745_v43 = vpop.f32.mrb[19].mxu1 }
0x16a6   :  { %v7717_v27 = vmax.f32 %v11820_v26, 0.0 }
0x16a8   :  { %v7734_v28 = vsel %vm1270_vm3, %v7717_v27, 0 }
0x16a9   :  { %v7809_v37 = vand.u32 4294901760, %v7734_v28 }
0x16ab   :  { %v7810_v53 = vsub.f32 %v7734_v28, %v7809_v37 }
0x16ad   :  { %v7811_v4 = vand.u32 4294901760, %v7810_v53 }
0x16af   :  { %v7812_v63 = vsub.f32 %v7810_v53, %v7811_v4 }
0x16b1   :  { %v7813_v11 = vand.u32 4294901760, %v7812_v63 }
0x16b3   :  { %10763 = vmatmul.mubr.f32.vlgmr.msra.gmra.mrb[20].mxu1 %v7813_v11 }
0x16b4   :  { %11672 = vmatpush3.bf16.msra.mxu1 %v11671_v36  ;;  %10781 = vmatprep.mubr.msk.f32.mxu1 %vm12077_vm1, %v12078_v12  ;;  %v13395_v36 = vsub.f32 %v8278_v39, %v8305_v42 }
0x16b5   :  { %11673 = vmatprep.subr.bf16.mxu1 %v12076_v25 }
0x16b6   :  { %v8406_v3 = vand.u32 4294901760, %v13395_v36 }
0x16b8   :  { %11675 = vmatpush3.bf16.msra.mxu1 %v11674_v50 }
0x16b9   :  { %11676 = vmatprep.subr.bf16.mxu1 %v12076_v25 }
0x16bc   :  { %11678 = vmatpush3.bf16.msra.mxu1 %v11677_v33  ;;  %v8400_v33 = vsub.f32 %v13393_v34, %v8399_v24 }
0x16bd   :  { %11679 = vmatprep.subr.bf16.mxu1 %v12076_v25 }
0x16be   :  { %v8401_v15 = vand.u32 4294901760, %v8400_v33 }
0x16c0   :  { %11681 = vmatpush3.bf16.msra.mxu1 %v11680_v49  ;;  %v8413_v49 = vand.u32 4294901760, %v13397_v38 }
0x16c1   :  { %11682 = vmatprep.subr.bf16.mxu1 %v12076_v25 }
0x16c3   :  { %10782 = vmatmul.mubr.f32.vlgmr.msra.gmra.mrb[20].mxu1 %v7809_v37 }
0x16c4   :  { %11684 = vmatpush3.bf16.msra.mxu1 %v11683_v9  ;;  %10800 = vmatprep.mubr.msk.f32.mxu1 %vm12077_vm1, %v12078_v12 }
0x16c5   :  { %11685 = vmatprep.subr.bf16.mxu1 %v12076_v25 }
0x16c8   :  { %11687 = vmatpush3.bf16.msra.mxu1 %v11686_v31  ;;  %v8407_v31 = vsub.f32 %v13395_v36, %v8406_v3 }
0x16c9   :  { %11688 = vmatprep.subr.bf16.mxu1 %v12076_v25 }
0x16cc   :  { %11690 = vmatpush3.bf16.msra.mxu1 %v11689_v46  ;;  %v8414_v46 = vsub.f32 %v13397_v38, %v8413_v49 }
0x16cd   :  { %11691 = vmatprep.subr.bf16.mxu1 %v12076_v25 }
0x16d0   :  { %11693 = vmatpush3.bf16.msra.mxu1 %v11692_v21  ;;  %v8408_v21 = vand.u32 4294901760, %v8407_v31 }
0x16d1   :  { %11694 = vmatprep.subr.bf16.mxu1 %v12076_v25 }
0x16d3   :  { %10801 = vmatmul.mubr.f32.vlgmr.msra.gmra.mrb[20].mxu1 %v7810_v53  ;;  %v11761_v53 = vpack.c.bf16 %v13397_v38, %v13395_v36 }
0x16d4   :  { %11696 = vmatpush3.bf16.msra.mxu1 %v13234_v62  ;;  %10819 = vmatprep.mubr.msk.f32.mxu1 %vm12077_vm1, %v12078_v12 }
0x16d5   :  { %11697 = vmatprep.subr.bf16.mxu1 %v12076_v25 }
0x16d8   :  { %11699 = vmatpush3.bf16.msra.mxu1 %v13244_v60 }
0x16d9   :  { %11700 = vmatprep.subr.bf16.mxu1 %v12076_v25 }
0x16dc   :  { %11702 = vmatpush3.bf16.msra.mxu1 %v13258_v1 }
0x16dd   :  { %11703 = vmatprep.subr.bf16.mxu1 %v12076_v25 }
0x16e0   :  { %11705 = vmatpush3.bf16.msra.mxu1 %v13278_v13 }
0x16e1   :  { %11706 = vmatprep.subr.bf16.mxu1 %v12076_v25 }
0x16e3   :  { %10820 = vmatmul.mubr.f32.vlgmr.msra.gmra.mrb[20].mxu1 %v7811_v4  ;;  %v11764_v4 = vpack.c.bf16 %v13403_v48, %v13401_v56 }
0x16e4   :  { %11708 = vmatpush3.bf16.msra.mxu1 %v11707_v22  ;;  %10838 = vmatprep.mubr.msk.f32.mxu1 %vm12077_vm1, %v12078_v12  ;;  %v8415_v22 = vand.u32 4294901760, %v8414_v46 }
0x16e5   :  { %11709 = vmatprep.subr.bf16.mxu1 %v12076_v25 }
0x16e8   :  { %11711 = vmatpush3.bf16.msra.mxu1 %v11710_v23  ;;  %v8420_v23 = vand.u32 4294901760, %v13401_v56 }
0x16e9   :  { %11712 = vmatprep.subr.bf16.mxu1 %v12076_v25 }
0x16ea   :  { %v8421_v41 = vsub.f32 %v13401_v56, %v8420_v23 }
0x16ec   :  { %11714 = vmatpush3.bf16.msra.mxu1 %v11713_v57  ;;  %v8427_v57 = vand.u32 4294901760, %v13403_v48  ;;  %v8422_v26 = vand.u32 4294901760, %v8421_v41 }
0x16ed   :  { %11715 = vmatprep.subr.bf16.mxu1 %v12076_v25 }
0x16ee   :  { %v8428_v59 = vsub.f32 %v13403_v48, %v8427_v57  ;;  %v11788_v0 = vpack.c.bf16 %v8427_v57, %v8420_v23 }
0x16f0   :  { %11717 = vmatpush3.bf16.msra.mxu1 %v11716_v58  ;;  %v11749_v58 = vpack.c.bf16 %v8415_v22, %v8408_v21  ;;  %v8429_v43 = vand.u32 4294901760, %v8428_v59 }
0x16f1   :  { %11718 = vmatprep.subr.bf16.mxu1 %v12076_v25 }
0x16f2   :  { %v11752_v27 = vpack.c.bf16 %v8429_v43, %v8422_v26 }
0x16f3   :  { %10839 = vmatmul.mubr.f32.vlgmr.msra.gmra.mrb[20].mxu1 %v7809_v37 }
0x16f4   :  { %11720 = vmatpush3.bf16.msra.mxu1 %v13234_v62  ;;  %10857 = vmatprep.mubr.msk.f32.mxu1 %vm12077_vm1, %v12078_v12  ;;  %v8274_v62 = vld [vmem:[%s13495_s10] sm:$0xff] }
0x16f5   :  { %11721 = vmatprep.subr.bf16.mxu1 %v12076_v25  ;;  %v8293_v10 = vand.u32 4294901760, %v8274_v62 }
0x16f8   :  { %11723 = vmatpush3.bf16.msra.mxu1 %v13244_v60  ;;  %v13355_v60 = vpack.c.bf16 %v8296_v2, %v8293_v10 }
0x16f9   :  { %11724 = vmatprep.subr.bf16.mxu1 %v12076_v25 }
0x16fa   :  { %11732 = vmatpush3.bf16.msra.mxu0 %v13355_v60 }
0x16fb   :  { %11733 = vmatprep.subr.bf16.mxu0 %v12076_v25 }
0x16fc   :  { %11726 = vmatpush3.bf16.msra.mxu1 %v13258_v1  ;;  %v8276_v1 = vld [vmem:[%s13495_s10 + $0x10] sm:$0xff] }
0x16fd   :  { %11727 = vmatprep.subr.bf16.mxu1 %v12076_v25  ;;  %v8299_v6 = vand.u32 4294901760, %v8276_v1 }
0x16ff   :  { %v13365_v35 = vpack.c.bf16 %v8302_v7, %v8299_v6  ;;  %v13391_v32 = vsub.f32 %v8276_v1, %v8299_v6 }
0x1700   :  { %11729 = vmatpush3.bf16.msra.mxu1 %v13278_v13  ;;  %v13375_v13 = vsub.f32 %v8274_v62, %v8293_v10  ;;  %v11785_v62 = vpack.c.bf16 %v8413_v49, %v8406_v3  ;;  %v8848_v10 = vld [vmem:[%s13494_s9] ss:$0 sm:$0xff] }
0x1701   :  { %11735 = vmatpush3.bf16.msra.mxu0 %v13365_v35  ;;  %v8392_v52 = vand.u32 4294901760, %v13391_v32 }
0x1702   :  { %11736 = vmatprep.subr.bf16.mxu0 %v12076_v25  ;;  %v8378_v29 = vand.u32 4294901760, %v13375_v13  ;;  %v11755_v28 = vpack.c.bf16 %v13377_v16, %v13375_v13 }
0x1703   :  { %10858 = vmatmul.mubr.f32.vlgmr.msra.gmra.mrb[20].mxu1 %v7809_v37  ;;  %v8393_v54 = vsub.f32 %v13391_v32, %v8392_v52  ;;  %v11758_v37 = vpack.c.bf16 %v13393_v34, %v13391_v32  ;;  %v11782_v11 = vpack.c.bf16 %v8399_v24, %v8392_v52 }
0x1704   :  { %v8379_v50 = vsub.f32 %v13375_v13, %v8378_v29  ;;  %v11779_v63 = vpack.c.bf16 %v8385_v30, %v8378_v29 }
0x1705   :  { %11738 = vmatpush3.bf16.msra.mxu0 %v13379_v17  ;;  %v8394_v14 = vand.u32 4294901760, %v8393_v54 }
0x1706   :  { %11739 = vmatprep.subr.bf16.mxu0 %v12076_v25  ;;  %v8380_v51 = vand.u32 4294901760, %v8379_v50 }
0x1707   :  { %v11746_v9 = vpack.c.bf16 %v8401_v15, %v8394_v14 }
0x1708   :  { %v11743_v8 = vpack.c.bf16 %v8387_v47, %v8380_v51 }
0x1709   :  { %11741 = vmatpush3.bf16.msra.mxu0 %v13399_v44 }
0x170a   :  { %11742 = vmatprep.subr.bf16.mxu0 %v12076_v25 }
0x17d6   :  { %v8269_v2 = vpop.f32.mrb[20].mxu1 }
0x17d7   :  { %v11821_v1 = vadd.f32 %v8848_v10, %v8269_v2  ;;  %v10859_v5 = vpop.f32.mrb[21].mxu1 }
0x17d9   :  { %v8273_v6 = vmax.f32 %v11821_v1, 0.0 }
0x17db   :  { %v8290_v7 = vsel %vm1270_vm3, %v8273_v6, 0 }
0x17dc   :  { %v8365_v39 = vand.u32 4294901760, %v8290_v7 }
0x17de   :  { %v8366_v40 = vsub.f32 %v8290_v7, %v8365_v39 }
0x17e0   :  { %v8367_v42 = vand.u32 4294901760, %v8366_v40 }
0x17e2   :  { %v8368_v61 = vsub.f32 %v8366_v40, %v8367_v42 }
0x17e4   :  { %v8369_v13 = vand.u32 4294901760, %v8368_v61 }
0x17e6   :  { %10877 = vmatmul.mubr.f32.vlgmr.msra.gmra.mrb[18].mxu0 %v8369_v13 }
0x17e7   :  { %11744 = vmatpush3.bf16.msra.mxu0 %v11743_v8  ;;  %10895 = vmatprep.mubr.msk.f32.mxu0 %vm12077_vm1, %v12078_v12 }
0x17e8   :  { %11745 = vmatprep.subr.bf16.mxu0 %v12076_v25 }
0x17eb   :  { %11747 = vmatpush3.bf16.msra.mxu0 %v11746_v9 }
0x17ec   :  { %11748 = vmatprep.subr.bf16.mxu0 %v12076_v25 }
0x17ef   :  { %11750 = vmatpush3.bf16.msra.mxu0 %v11749_v58 }
0x17f0   :  { %11751 = vmatprep.subr.bf16.mxu0 %v12076_v25 }
0x17f3   :  { %11753 = vmatpush3.bf16.msra.mxu0 %v11752_v27 }
0x17f4   :  { %11754 = vmatprep.subr.bf16.mxu0 %v12076_v25 }
0x17f6   :  { %10896 = vmatmul.mubr.f32.vlgmr.msra.gmra.mrb[18].mxu0 %v8365_v39 }
0x17f7   :  { %11756 = vmatpush3.bf16.msra.mxu0 %v11755_v28  ;;  %10914 = vmatprep.mubr.msk.f32.mxu0 %vm12077_vm1, %v12078_v12 }
0x17f8   :  { %11757 = vmatprep.subr.bf16.mxu0 %v12076_v25 }
0x17fb   :  { %11759 = vmatpush3.bf16.msra.mxu0 %v11758_v37 }
0x17fc   :  { %11760 = vmatprep.subr.bf16.mxu0 %v12076_v25 }
0x17ff   :  { %11762 = vmatpush3.bf16.msra.mxu0 %v11761_v53 }
0x1800   :  { %11763 = vmatprep.subr.bf16.mxu0 %v12076_v25 }
0x1803   :  { %11765 = vmatpush3.bf16.msra.mxu0 %v11764_v4 }
0x1804   :  { %11766 = vmatprep.subr.bf16.mxu0 %v12076_v25 }
0x1806   :  { %10915 = vmatmul.mubr.f32.vlgmr.msra.gmra.mrb[18].mxu0 %v8366_v40 }
0x1807   :  { %11768 = vmatpush3.bf16.msra.mxu0 %v13355_v60  ;;  %10933 = vmatprep.mubr.msk.f32.mxu0 %vm12077_vm1, %v12078_v12 }
0x1808   :  { %11769 = vmatprep.subr.bf16.mxu0 %v12076_v25 }
0x180b   :  { %11771 = vmatpush3.bf16.msra.mxu0 %v13365_v35 }
0x180c   :  { %11772 = vmatprep.subr.bf16.mxu0 %v12076_v25 }
0x180f   :  { %11774 = vmatpush3.bf16.msra.mxu0 %v13379_v17 }
0x1810   :  { %11775 = vmatprep.subr.bf16.mxu0 %v12076_v25 }
0x1813   :  { %11777 = vmatpush3.bf16.msra.mxu0 %v13399_v44 }
0x1814   :  { %11778 = vmatprep.subr.bf16.mxu0 %v12076_v25 }
0x1816   :  { %10934 = vmatmul.mubr.f32.vlgmr.msra.gmra.mrb[18].mxu0 %v8367_v42 }
0x1817   :  { %11780 = vmatpush3.bf16.msra.mxu0 %v11779_v63  ;;  %10952 = vmatprep.mubr.msk.f32.mxu0 %vm12077_vm1, %v12078_v12 }
0x1818   :  { %11781 = vmatprep.subr.bf16.mxu0 %v12076_v25 }
0x181b   :  { %11783 = vmatpush3.bf16.msra.mxu0 %v11782_v11 }
0x181c   :  { %11784 = vmatprep.subr.bf16.mxu0 %v12076_v25 }
0x181f   :  { %11786 = vmatpush3.bf16.msra.mxu0 %v11785_v62 }
0x1820   :  { %11787 = vmatprep.subr.bf16.mxu0 %v12076_v25 }
0x1823   :  { %11789 = vmatpush3.bf16.msra.mxu0 %v11788_v0 }
0x1824   :  { %11790 = vmatprep.subr.bf16.mxu0 %v12076_v25 }
0x1826   :  { %10953 = vmatmul.mubr.f32.vlgmr.msra.gmra.mrb[18].mxu0 %v8365_v39 }
0x1827   :  { %11792 = vmatpush3.bf16.msra.mxu0 %v13355_v60  ;;  %10971 = vmatprep.mubr.msk.f32.mxu0 %vm12077_vm1, %v12078_v12  ;;  %v8849_v60 = vld [vmem:[%s13496_s11] ss:$0 sm:$0xff] }
0x1828   :  { %11793 = vmatprep.subr.bf16.mxu0 %v12076_v25 }
0x182b   :  { %11795 = vmatpush3.bf16.msra.mxu0 %v13365_v35 }
0x182c   :  { %11796 = vmatprep.subr.bf16.mxu0 %v12076_v25 }
0x182f   :  { %11798 = vmatpush3.bf16.msra.mxu0 %v13379_v17 }
0x1830   :  { %11799 = vmatprep.subr.bf16.mxu0 %v12076_v25 }
0x1833   :  { %11801 = vmatpush3.bf16.msra.mxu0 %v13399_v44 }
0x1836   :  { %10972 = vmatmul.mubr.f32.vlgmr.msra.gmra.mrb[18].mxu0 %v8365_v39 }
0x1909   :  { %v8825_v12 = vpop.f32.mrb[18].mxu0 }
0x190a   :  { %v11822_v16 = vadd.f32 %v8849_v60, %v8825_v12  ;;  %v10973_v20 = vpop.f32.mrb[19].mxu0 }
0x190c   :  { %8830 = vst.msk [vmem:[#allocation2] sm:$0xff] %vm8829_vm4, %v11822_v16 }
0x190d   :  { %12063 = shalt.err (!%p12060_p4)
}
0x190e   :  { %s12064_s22 = scalar_lea.hbm %s13497_s12, 128 }
0x190f   :  { %p12065_p5 = scmp.ne.s32.totalorder %s13497_s12, %s12064_s22  ;;  %p12068_p6 = scmp.lt.u32.totalorder %s12064_s22, %s13497_s12 }
0x1911   :  { %p12070_p7 = pnand %p12068_p6, %p12065_p5 }
0x1913   :  { %12073 = shalt.err (!%p12070_p7)
}
0x1914   :  { %8840 = dma.vmem_to_hbm [thread:$0]  %s8838_s19, 128, %s13497_s12, [#allocation3]  }
0x1915   :  { %12074 = dma.done.wait [#allocation3], 128  }
0x1916   :  { %12075 = vsyncadd [#allocation3], 4294967168 }
0x1917   :  { %8844 = vsyncpa [#allocation3], 1 }

</bundles_post_ra>
